<compile_context>
chip_gen: v7x
topology: tpu7x:2x2x1
jax: 0.10.0
libtpu: 0.0.40
codegen_flags: <defaults>
</compile_context>

<pallas_src>
import functools

import jax
import jax.numpy as jnp
from jax.experimental import pallas as pl
from jax.experimental.pallas import tpu as pltpu


# ----------------------------------------------------------------------------
# Kernel 1: fused per-image backbone
#   space-to-depth stem conv + swish -> 1x1 expand + swish -> depthwise 3x3 +
#   swish -> SE gate -> folded project+head 1x1 + swish -> global avg pool
# ----------------------------------------------------------------------------
def _fused_backbone_kernel(s2d_ref, sw_ref, sb_ref, ew_ref, eb_ref,
                           dw_ref, dwb_ref, w1_ref, b1_ref, w2_ref, b2_ref,
                           phw_ref, phb_ref, pooled_ref, pad_scr, *, ho, wo):
    f32 = jnp.float32
    bf16 = jnp.bfloat16
    S = ho * wo
    inv_s = 1.0 / S

    # --- stem: 3x3 stride-2 conv as a stride-1 2x2 conv over the s2d input ---
    # s2d_ref block: (1, ho+1, wo+1, 12); tap (ti,tj) reads a shifted window.
    st = jnp.broadcast_to(sb_ref[...], (S, 16)).astype(f32)
    for ti in range(2):
        for tj in range(2):
            tap = s2d_ref[0, ti:ti + ho, tj:tj + wo, :].reshape(S, 12)
            st = st + jnp.dot(tap, sw_ref[ti * 2 + tj],
                              preferred_element_type=f32)
    st = st * jax.nn.sigmoid(st)                                  # swish (S,16)

    # --- 1x1 expand (16 -> 64) + swish, interior pixels only -----------------
    e = jnp.dot(st.astype(bf16), ew_ref[...],
                preferred_element_type=f32) + eb_ref[...]
    e = e * jax.nn.sigmoid(e)                                     # (S, 64)

    # Zero-haloed VMEM tile for the depthwise taps (never touches HBM).
    pad_scr[...] = jnp.zeros_like(pad_scr)
    pad_scr[1:1 + ho, 1:1 + wo, :] = e.reshape(ho, wo, 64)

    # --- depthwise 3x3 + swish (9 shifted taps from the VMEM tile) -----------
    w9 = dw_ref[...].reshape(9, 1, 1, 64)          # hoisted out of the tap loop
    acc = jnp.broadcast_to(dwb_ref[...].reshape(1, 1, 64), (ho, wo, 64))
    t = 0
    for i in range(3):                              # static unroll: VPU fma chain
        for j in range(3):
            acc = acc + pad_scr[i:i + ho, j:j + wo, :] * w9[t]
            t += 1
    d = acc * jax.nn.sigmoid(acc)                                  # (ho, wo, 64)
    d2 = d.reshape(S, 64)

    # --- squeeze-excite gate from the per-image channel mean -----------------
    m = (jnp.sum(d2, axis=0, keepdims=True) * inv_s).astype(bf16)  # (1, 64)
    h = jnp.dot(m, w1_ref[...], preferred_element_type=f32) + b1_ref[...]
    h = h * jax.nn.sigmoid(h)                                      # swish
    g = jax.nn.sigmoid(jnp.dot(h.astype(bf16), w2_ref[...],
                               preferred_element_type=f32) + b2_ref[...])

    # --- gated, folded project+head (64 -> 128) + swish + global avg pool ----
    x = (d2 * g).astype(bf16)                                      # (S, 64)
    hc = jnp.dot(x, phw_ref[...], preferred_element_type=f32) + phb_ref[...]
    hc = hc * jax.nn.sigmoid(hc)                                   # (S, 128)
    pooled_ref[...] = (jnp.sum(hc, axis=0, keepdims=True)
                       * inv_s).reshape(1, 1, 128)


def fused_backbone(s2d, p, ho, wo):
    N = s2d.shape[0]
    S = ho * wo
    hp = ho + 2
    wp = ((wo + 2 + 7) // 8) * 8            # sublane-aligned haloed width
    kern = functools.partial(_fused_backbone_kernel, ho=ho, wo=wo)
    cost = pl.CostEstimate(
        flops=2 * N * S * (4 * 12 * 16 + 16 * 64 + 9 * 64 + 64 * 128),
        transcendentals=N * S * (16 + 64 + 64 + 128),
        bytes_accessed=int(s2d.size) * 2 + N * 128 * 4 + 64 * 1024)
    return pl.pallas_call(
        kern,
        out_shape=jax.ShapeDtypeStruct((N, 1, 128), jnp.float32),
        grid_spec=pltpu.PrefetchScalarGridSpec(
            num_scalar_prefetch=0,
            grid=(N,),
            in_specs=[
                pl.BlockSpec((1, ho + 1, wo + 1, 12), lambda b: (b, 0, 0, 0)),
                pl.BlockSpec((4, 12, 16), lambda b: (0, 0, 0)),
                pl.BlockSpec((1, 16), lambda b: (0, 0)),
                pl.BlockSpec((16, 64), lambda b: (0, 0)),
                pl.BlockSpec((1, 64), lambda b: (0, 0)),
                pl.BlockSpec((9, 64), lambda b: (0, 0)),
                pl.BlockSpec((1, 64), lambda b: (0, 0)),
                pl.BlockSpec((64, 4), lambda b: (0, 0)),
                pl.BlockSpec((1, 4), lambda b: (0, 0)),
                pl.BlockSpec((4, 64), lambda b: (0, 0)),
                pl.BlockSpec((1, 64), lambda b: (0, 0)),
                pl.BlockSpec((64, 128), lambda b: (0, 0)),
                pl.BlockSpec((1, 128), lambda b: (0, 0)),
            ],
            out_specs=pl.BlockSpec((1, 1, 128), lambda b: (b, 0, 0)),
            scratch_shapes=[pltpu.VMEM((hp, wp, 64), jnp.float32)]),
        compiler_params=pltpu.CompilerParams(
            dimension_semantics=("parallel",),
            vmem_limit_bytes=64 * 1024 * 1024),
        cost_estimate=cost,
    )(s2d, p["stem_w"], p["stem_b"], p["exp_w"], p["exp_b"],
      p["dw_w"], p["dw_b"], p["se_w1"], p["se_b1"], p["se_w2"], p["se_b2"],
      p["ph_w"], p["ph_b"])


# ----------------------------------------------------------------------------
# Kernel 2: FC(->1024 padded) -> ReLU -> Linear(->2) -> softmax, fused
# ----------------------------------------------------------------------------
def _head_kernel(x_ref, wfc_ref, bfc_ref, w2_ref, b2_ref, o_ref):
    x = x_ref[...].astype(jnp.bfloat16)                            # (N, 128)
    logits = jnp.dot(x, wfc_ref[...],
                     preferred_element_type=jnp.float32) + bfc_ref[...]
    f = jnp.maximum(logits, 0.0)                                   # F.relu
    z = jnp.dot(f.astype(jnp.bfloat16), w2_ref[...],
                preferred_element_type=jnp.float32) + b2_ref[...]  # (N, 2)
    z = z - jnp.max(z, axis=1, keepdims=True)                      # softmax dim=1
    e = jnp.exp(z)
    o_ref[...] = e / jnp.sum(e, axis=1, keepdims=True)


def head(pooled, fc_w, fc_b, out_w, out_b):
    N = pooled.shape[0]
    return pl.pallas_call(
        _head_kernel,
        out_shape=jax.ShapeDtypeStruct((N, 2), jnp.float32),
    )(pooled, fc_w, fc_b, out_w, out_b)


# ----------------------------------------------------------------------------
# Parameter setup (BN folded into synthetic conv weights; proj@head folded)
# ----------------------------------------------------------------------------
def init_params(key):
    bf = jnp.bfloat16

    def nrm(k, shape, scale=0.05, dtype=jnp.float32):
        return (scale * jax.random.normal(k, shape, jnp.float32)).astype(dtype)

    ks = jax.random.split(key, 17)
    p = {}
    # Stem 3x3 stride-2 conv (3 -> 16), repacked into 4 space-to-depth taps of
    # 12 channels each:  (ti, p)->ki: (0,1)->0 (1,0)->1 (1,1)->2, same for cols.
    w33 = nrm(ks[0], (3, 3, 3, 16))                   # (ki, kj, cin, cout)
    wt = jnp.zeros((2, 2, 2, 2, 3, 16), jnp.float32)  # (ti, tj, p, q, c, cout)
    for ti, pp, ki in ((0, 1, 0), (1, 0, 1), (1, 1, 2)):
        for tj, qq, kj in ((0, 1, 0), (1, 0, 1), (1, 1, 2)):
            wt = wt.at[ti, tj, pp, qq].set(w33[ki, kj])
    p["stem_w"] = wt.reshape(4, 12, 16).astype(bf)
    p["stem_b"] = nrm(ks[1], (1, 16))
    p["exp_w"] = nrm(ks[2], (16, 64), dtype=bf)       # MBConv expand 1x1
    p["exp_b"] = nrm(ks[3], (1, 64))
    p["dw_w"] = nrm(ks[4], (9, 64))                   # depthwise 3x3 (per tap)
    p["dw_b"] = nrm(ks[5], (1, 64))
    p["se_w1"] = nrm(ks[6], (64, 4), dtype=bf)        # squeeze-excite 64->4->64
    p["se_b1"] = nrm(ks[7], (1, 4))
    p["se_w2"] = nrm(ks[8], (4, 64), dtype=bf)
    p["se_b2"] = nrm(ks[9], (1, 64))
    # Project (64->24) and head-conv (24->128) folded into one (64,128) matmul
    # (no nonlinearity in between, so the fold is exact up to bf16 rounding).
    proj_w = nrm(ks[10], (64, 24))
    proj_b = nrm(ks[11], (1, 24))
    hc_w = nrm(ks[12], (24, 128))
    hc_b = nrm(ks[13], (1, 128))
    p["ph_w"] = (proj_w @ hc_w).astype(bf)
    p["ph_b"] = proj_b @ hc_w + hc_b
    # Backbone classifier 128->1000 and output_layer 1000->2, padded to 1024
    # lanes with exact zeros (numerically identical to the 1000-wide version).
    fc_w = nrm(ks[14], (128, 1000))
    fc_b = jnp.zeros((1, 1000), jnp.float32)
    out_w = nrm(ks[15], (1000, 2))
    out_b = nrm(ks[16], (1, 2))
    p["fc_w"] = jnp.pad(fc_w, ((0, 0), (0, 24))).astype(bf)
    p["fc_b"] = jnp.pad(fc_b, ((0, 0), (0, 24)))
    p["out_w"] = jnp.pad(out_w, ((0, 24), (0, 0))).astype(bf)
    p["out_b"] = out_b
    return p


# ----------------------------------------------------------------------------
# Forward pass
# ----------------------------------------------------------------------------
def custom_efficientnet_forward(x_nchw, p):
    x = jnp.transpose(x_nchw, (0, 2, 3, 1)).astype(jnp.bfloat16)   # NCHW -> NHWC
    N, H, W, C = x.shape
    assert H % 2 == 0 and W % 2 == 0, "toy backbone assumes even H, W"
    ho, wo = H // 2, W // 2
    assert wo % 8 == 0, "toy backbone assumes wo % 8 == 0 for aligned reshapes"

    # Space-to-depth(2) + 1-px top/left zero pad on the tiny 3-channel input:
    # the stride-2 stem becomes a stride-1 2x2 conv with 12 channels in-kernel
    # (no im2col patch tensor, no stem activation round trip through HBM).
    s2d = x.reshape(N, ho, 2, wo, 2, C).transpose(0, 1, 3, 2, 4, 5)
    s2d = s2d.reshape(N, ho, wo, 4 * C)
    s2d = jnp.pad(s2d, ((0, 0), (1, 0), (1, 0), (0, 0)))           # (N,ho+1,wo+1,12)

    pooled = fused_backbone(s2d, p, ho, wo).reshape(N, 128)

    # --- FC(1000 padded) -> ReLU -> Linear(1000,2) -> softmax(dim=1) ---------
    return head(pooled, p["fc_w"], p["fc_b"], p["out_w"], p["out_b"])


if __name__ == "__main__":
    key = jax.random.PRNGKey(0)
    kx, kp = jax.random.split(key)
    x = jax.random.normal(kx, (2, 3, 32, 32), dtype=jnp.float32)   # NCHW like PyTorch
    params = init_params(kp)

    out = jax.jit(custom_efficientnet_forward)(x, params)
    out = jax.block_until_ready(out)

    assert out.shape == (2, 2)
    assert bool(jnp.all(jnp.isfinite(out)))
    assert bool(jnp.allclose(jnp.sum(out, axis=1), 1.0, atol=1e-4))  # softmax rows
    print("KERNEL_OK")
</pallas_src>

<mosaic_0001>
module attributes {stable_mosaic.version = 11 : i64} {
  func.func @_fused_backbone_kernel(%arg0: i32, %arg1: memref<1x17x17x12xbf16, #tpu.memory_space<vmem>>, %arg2: memref<4x12x16xbf16, #tpu.memory_space<vmem>>, %arg3: memref<1x16xf32, #tpu.memory_space<vmem>>, %arg4: memref<16x64xbf16, #tpu.memory_space<vmem>>, %arg5: memref<1x64xf32, #tpu.memory_space<vmem>>, %arg6: memref<9x64xf32, #tpu.memory_space<vmem>>, %arg7: memref<1x64xf32, #tpu.memory_space<vmem>>, %arg8: memref<64x4xbf16, #tpu.memory_space<vmem>>, %arg9: memref<1x4xf32, #tpu.memory_space<vmem>>, %arg10: memref<4x64xbf16, #tpu.memory_space<vmem>>, %arg11: memref<1x64xf32, #tpu.memory_space<vmem>>, %arg12: memref<64x128xbf16, #tpu.memory_space<vmem>>, %arg13: memref<1x128xf32, #tpu.memory_space<vmem>>, %arg14: memref<1x1x128xf32, #tpu.memory_space<vmem>>, %arg15: memref<18x24x64xf32, #tpu.memory_space<vmem>>) attributes {dimension_semantics = [#tpu.dimension_semantics<parallel>], iteration_bounds = array<i64: 2>, scalar_prefetch = 0 : i64, scratch_operands = 1 : i64, tpu.core_type = #tpu.core_type<tc>, window_params = [{transform_indices = @transform_0, window_bounds = array<i64: 1, 17, 17, 12>}, {pipeline_mode = #tpu.pipeline_mode<synchronous>, transform_indices = @transform_1, window_bounds = array<i64: 4, 12, 16>}, {pipeline_mode = #tpu.pipeline_mode<synchronous>, transform_indices = @transform_2, window_bounds = array<i64: 1, 16>}, {pipeline_mode = #tpu.pipeline_mode<synchronous>, transform_indices = @transform_3, window_bounds = array<i64: 16, 64>}, {pipeline_mode = #tpu.pipeline_mode<synchronous>, transform_indices = @transform_4, window_bounds = array<i64: 1, 64>}, {pipeline_mode = #tpu.pipeline_mode<synchronous>, transform_indices = @transform_5, window_bounds = array<i64: 9, 64>}, {pipeline_mode = #tpu.pipeline_mode<synchronous>, transform_indices = @transform_6, window_bounds = array<i64: 1, 64>}, {pipeline_mode = #tpu.pipeline_mode<synchronous>, transform_indices = @transform_7, window_bounds = array<i64: 64, 4>}, {pipeline_mode = #tpu.pipeline_mode<synchronous>, transform_indices = @transform_8, window_bounds = array<i64: 1, 4>}, {pipeline_mode = #tpu.pipeline_mode<synchronous>, transform_indices = @transform_9, window_bounds = array<i64: 4, 64>}, {pipeline_mode = #tpu.pipeline_mode<synchronous>, transform_indices = @transform_10, window_bounds = array<i64: 1, 64>}, {pipeline_mode = #tpu.pipeline_mode<synchronous>, transform_indices = @transform_11, window_bounds = array<i64: 64, 128>}, {pipeline_mode = #tpu.pipeline_mode<synchronous>, transform_indices = @transform_12, window_bounds = array<i64: 1, 128>}, {transform_indices = @transform_13, window_bounds = array<i64: 1, 1, 128>}]} {
    %c0 = arith.constant 0 : index
    %c0_0 = arith.constant 0 : index
    %0 = vector.load %arg3[%c0, %c0_0] : memref<1x16xf32, #tpu.memory_space<vmem>>, vector<1x16xf32>
    %1 = vector.shape_cast %0 : vector<1x16xf32> to vector<1x16xf32>
    %2 = vector.broadcast %1 : vector<1x16xf32> to vector<256x16xf32>
    %c0_1 = arith.constant 0 : index
    %c0_2 = arith.constant 0 : index
    %c0_3 = arith.constant 0 : index
    %c0_4 = arith.constant 0 : index
    %3 = vector.load %arg1[%c0_1, %c0_2, %c0_3, %c0_4] : memref<1x17x17x12xbf16, #tpu.memory_space<vmem>>, vector<1x16x16x12xbf16>
    %4 = vector.shape_cast %3 : vector<1x16x16x12xbf16> to vector<16x16x12xbf16>
    %5 = vector.shape_cast %4 : vector<16x16x12xbf16> to vector<256x12xbf16>
    %c0_5 = arith.constant 0 : index
    %c0_6 = arith.constant 0 : index
    %c0_7 = arith.constant 0 : index
    %6 = vector.load %arg2[%c0_5, %c0_6, %c0_7] : memref<4x12x16xbf16, #tpu.memory_space<vmem>>, vector<1x12x16xbf16>
    %7 = vector.shape_cast %6 : vector<1x12x16xbf16> to vector<12x16xbf16>
    %cst = arith.constant dense<0.000000e+00> : vector<256x16xf32>
    %8 = tpu.matmul %5, %7, %cst {dimension_numbers = #tpu.dot_dimension_numbers<[1], [0], [0], [1], [0, 0, 1, 1], [], []>} : vector<256x12xbf16>, vector<12x16xbf16>, vector<256x16xf32> -> vector<256x16xf32>
    %9 = arith.addf %2, %8 : vector<256x16xf32>
    %c0_8 = arith.constant 0 : index
    %c0_9 = arith.constant 0 : index
    %c1 = arith.constant 1 : index
    %c0_10 = arith.constant 0 : index
    %10 = vector.load %arg1[%c0_8, %c0_9, %c1, %c0_10] : memref<1x17x17x12xbf16, #tpu.memory_space<vmem>>, vector<1x16x16x12xbf16>
    %11 = vector.shape_cast %10 : vector<1x16x16x12xbf16> to vector<16x16x12xbf16>
    %12 = vector.shape_cast %11 : vector<16x16x12xbf16> to vector<256x12xbf16>
    %c1_11 = arith.constant 1 : index
    %c0_12 = arith.constant 0 : index
    %c0_13 = arith.constant 0 : index
    %13 = vector.load %arg2[%c1_11, %c0_12, %c0_13] : memref<4x12x16xbf16, #tpu.memory_space<vmem>>, vector<1x12x16xbf16>
    %14 = vector.shape_cast %13 : vector<1x12x16xbf16> to vector<12x16xbf16>
    %cst_14 = arith.constant dense<0.000000e+00> : vector<256x16xf32>
    %15 = tpu.matmul %12, %14, %cst_14 {dimension_numbers = #tpu.dot_dimension_numbers<[1], [0], [0], [1], [0, 0, 1, 1], [], []>} : vector<256x12xbf16>, vector<12x16xbf16>, vector<256x16xf32> -> vector<256x16xf32>
    %16 = arith.addf %9, %15 : vector<256x16xf32>
    %c0_15 = arith.constant 0 : index
    %c1_16 = arith.constant 1 : index
    %c0_17 = arith.constant 0 : index
    %c0_18 = arith.constant 0 : index
    %17 = vector.load %arg1[%c0_15, %c1_16, %c0_17, %c0_18] : memref<1x17x17x12xbf16, #tpu.memory_space<vmem>>, vector<1x16x16x12xbf16>
    %18 = vector.shape_cast %17 : vector<1x16x16x12xbf16> to vector<16x16x12xbf16>
    %19 = vector.shape_cast %18 : vector<16x16x12xbf16> to vector<256x12xbf16>
    %c2 = arith.constant 2 : index
    %c0_19 = arith.constant 0 : index
    %c0_20 = arith.constant 0 : index
    %20 = vector.load %arg2[%c2, %c0_19, %c0_20] : memref<4x12x16xbf16, #tpu.memory_space<vmem>>, vector<1x12x16xbf16>
    %21 = vector.shape_cast %20 : vector<1x12x16xbf16> to vector<12x16xbf16>
    %cst_21 = arith.constant dense<0.000000e+00> : vector<256x16xf32>
    %22 = tpu.matmul %19, %21, %cst_21 {dimension_numbers = #tpu.dot_dimension_numbers<[1], [0], [0], [1], [0, 0, 1, 1], [], []>} : vector<256x12xbf16>, vector<12x16xbf16>, vector<256x16xf32> -> vector<256x16xf32>
    %23 = arith.addf %16, %22 : vector<256x16xf32>
    %c0_22 = arith.constant 0 : index
    %c1_23 = arith.constant 1 : index
    %c1_24 = arith.constant 1 : index
    %c0_25 = arith.constant 0 : index
    %24 = vector.load %arg1[%c0_22, %c1_23, %c1_24, %c0_25] : memref<1x17x17x12xbf16, #tpu.memory_space<vmem>>, vector<1x16x16x12xbf16>
    %25 = vector.shape_cast %24 : vector<1x16x16x12xbf16> to vector<16x16x12xbf16>
    %26 = vector.shape_cast %25 : vector<16x16x12xbf16> to vector<256x12xbf16>
    %c3 = arith.constant 3 : index
    %c0_26 = arith.constant 0 : index
    %c0_27 = arith.constant 0 : index
    %27 = vector.load %arg2[%c3, %c0_26, %c0_27] : memref<4x12x16xbf16, #tpu.memory_space<vmem>>, vector<1x12x16xbf16>
    %28 = vector.shape_cast %27 : vector<1x12x16xbf16> to vector<12x16xbf16>
    %cst_28 = arith.constant dense<0.000000e+00> : vector<256x16xf32>
    %29 = tpu.matmul %26, %28, %cst_28 {dimension_numbers = #tpu.dot_dimension_numbers<[1], [0], [0], [1], [0, 0, 1, 1], [], []>} : vector<256x12xbf16>, vector<12x16xbf16>, vector<256x16xf32> -> vector<256x16xf32>
    %30 = arith.addf %23, %29 : vector<256x16xf32>
    %31 = arith.negf %30 : vector<256x16xf32>
    %32 = math.exp %31 : vector<256x16xf32>
    %cst_29 = arith.constant 1.000000e+00 : f32
    %33 = vector.broadcast %cst_29 : f32 to vector<256x16xf32>
    %34 = arith.addf %33, %32 : vector<256x16xf32>
    %35 = arith.divf %33, %34 : vector<256x16xf32>
    %36 = arith.mulf %30, %35 : vector<256x16xf32>
    %37 = arith.truncf %36 : vector<256x16xf32> to vector<256x16xbf16>
    %c0_30 = arith.constant 0 : index
    %c0_31 = arith.constant 0 : index
    %38 = vector.load %arg4[%c0_30, %c0_31] : memref<16x64xbf16, #tpu.memory_space<vmem>>, vector<16x64xbf16>
    %cst_32 = arith.constant dense<0.000000e+00> : vector<256x64xf32>
    %39 = tpu.matmul %37, %38, %cst_32 {dimension_numbers = #tpu.dot_dimension_numbers<[1], [0], [0], [1], [0, 0, 1, 1], [], []>} : vector<256x16xbf16>, vector<16x64xbf16>, vector<256x64xf32> -> vector<256x64xf32>
    %c0_33 = arith.constant 0 : index
    %c0_34 = arith.constant 0 : index
    %40 = vector.load %arg5[%c0_33, %c0_34] : memref<1x64xf32, #tpu.memory_space<vmem>>, vector<1x64xf32>
    %41 = vector.broadcast %40 : vector<1x64xf32> to vector<256x64xf32>
    %42 = arith.addf %39, %41 : vector<256x64xf32>
    %43 = arith.negf %42 : vector<256x64xf32>
    %44 = math.exp %43 : vector<256x64xf32>
    %cst_35 = arith.constant 1.000000e+00 : f32
    %45 = vector.broadcast %cst_35 : f32 to vector<256x64xf32>
    %46 = arith.addf %45, %44 : vector<256x64xf32>
    %47 = arith.divf %45, %46 : vector<256x64xf32>
    %48 = arith.mulf %42, %47 : vector<256x64xf32>
    %cst_36 = arith.constant 0.000000e+00 : f32
    %49 = vector.broadcast %cst_36 : f32 to vector<18x24x64xf32>
    %c0_37 = arith.constant 0 : index
    %c0_38 = arith.constant 0 : index
    %c0_39 = arith.constant 0 : index
    %50 = vector.load %arg15[%c0_37, %c0_38, %c0_39] : memref<18x24x64xf32, #tpu.memory_space<vmem>>, vector<18x24x64xf32>
    tpu.vector_store %arg15[%c0_37, %c0_38, %c0_39], %49 {strides = array<i32>} : memref<18x24x64xf32, #tpu.memory_space<vmem>>, vector<18x24x64xf32>,
    %51 = vector.shape_cast %48 : vector<256x64xf32> to vector<16x16x64xf32>
    %c1_40 = arith.constant 1 : index
    %c1_41 = arith.constant 1 : index
    %c0_42 = arith.constant 0 : index
    %52 = vector.load %arg15[%c1_40, %c1_41, %c0_42] : memref<18x24x64xf32, #tpu.memory_space<vmem>>, vector<16x16x64xf32>
    tpu.vector_store %arg15[%c1_40, %c1_41, %c0_42], %51 {strides = array<i32>} : memref<18x24x64xf32, #tpu.memory_space<vmem>>, vector<16x16x64xf32>,
    %c0_43 = arith.constant 0 : index
    %c0_44 = arith.constant 0 : index
    %53 = vector.load %arg6[%c0_43, %c0_44] : memref<9x64xf32, #tpu.memory_space<vmem>>, vector<9x64xf32>
    %54 = vector.shape_cast %53 : vector<9x64xf32> to vector<9x1x1x64xf32>
    %c0_45 = arith.constant 0 : index
    %c0_46 = arith.constant 0 : index
    %55 = vector.load %arg7[%c0_45, %c0_46] : memref<1x64xf32, #tpu.memory_space<vmem>>, vector<1x64xf32>
    %56 = vector.shape_cast %55 : vector<1x64xf32> to vector<1x1x64xf32>
    %57 = vector.shape_cast %56 : vector<1x1x64xf32> to vector<1x1x64xf32>
    %58 = vector.broadcast %57 : vector<1x1x64xf32> to vector<16x16x64xf32>
    %c0_47 = arith.constant 0 : index
    %c0_48 = arith.constant 0 : index
    %c0_49 = arith.constant 0 : index
    %59 = vector.load %arg15[%c0_47, %c0_48, %c0_49] : memref<18x24x64xf32, #tpu.memory_space<vmem>>, vector<16x16x64xf32>
    %60 = vector.extract_strided_slice %54 {offsets = [0, 0, 0, 0], sizes = [1, 1, 1, 64], strides = [1, 1, 1, 1]} : vector<9x1x1x64xf32> to vector<1x1x1x64xf32>
    %61 = vector.shape_cast %60 : vector<1x1x1x64xf32> to vector<1x1x64xf32>
    %62 = vector.broadcast %61 : vector<1x1x64xf32> to vector<16x16x64xf32>
    %63 = arith.mulf %59, %62 : vector<16x16x64xf32>
    %64 = arith.addf %58, %63 : vector<16x16x64xf32>
    %c0_50 = arith.constant 0 : index
    %c1_51 = arith.constant 1 : index
    %c0_52 = arith.constant 0 : index
    %65 = vector.load %arg15[%c0_50, %c1_51, %c0_52] : memref<18x24x64xf32, #tpu.memory_space<vmem>>, vector<16x16x64xf32>
    %66 = vector.extract_strided_slice %54 {offsets = [1, 0, 0, 0], sizes = [1, 1, 1, 64], strides = [1, 1, 1, 1]} : vector<9x1x1x64xf32> to vector<1x1x1x64xf32>
    %67 = vector.shape_cast %66 : vector<1x1x1x64xf32> to vector<1x1x64xf32>
    %68 = vector.broadcast %67 : vector<1x1x64xf32> to vector<16x16x64xf32>
    %69 = arith.mulf %65, %68 : vector<16x16x64xf32>
    %70 = arith.addf %64, %69 : vector<16x16x64xf32>
    %c0_53 = arith.constant 0 : index
    %c2_54 = arith.constant 2 : index
    %c0_55 = arith.constant 0 : index
    %71 = vector.load %arg15[%c0_53, %c2_54, %c0_55] : memref<18x24x64xf32, #tpu.memory_space<vmem>>, vector<16x16x64xf32>
    %72 = vector.extract_strided_slice %54 {offsets = [2, 0, 0, 0], sizes = [1, 1, 1, 64], strides = [1, 1, 1, 1]} : vector<9x1x1x64xf32> to vector<1x1x1x64xf32>
    %73 = vector.shape_cast %72 : vector<1x1x1x64xf32> to vector<1x1x64xf32>
    %74 = vector.broadcast %73 : vector<1x1x64xf32> to vector<16x16x64xf32>
    %75 = arith.mulf %71, %74 : vector<16x16x64xf32>
    %76 = arith.addf %70, %75 : vector<16x16x64xf32>
    %c1_56 = arith.constant 1 : index
    %c0_57 = arith.constant 0 : index
    %c0_58 = arith.constant 0 : index
    %77 = vector.load %arg15[%c1_56, %c0_57, %c0_58] : memref<18x24x64xf32, #tpu.memory_space<vmem>>, vector<16x16x64xf32>
    %78 = vector.extract_strided_slice %54 {offsets = [3, 0, 0, 0], sizes = [1, 1, 1, 64], strides = [1, 1, 1, 1]} : vector<9x1x1x64xf32> to vector<1x1x1x64xf32>
    %79 = vector.shape_cast %78 : vector<1x1x1x64xf32> to vector<1x1x64xf32>
    %80 = vector.broadcast %79 : vector<1x1x64xf32> to vector<16x16x64xf32>
    %81 = arith.mulf %77, %80 : vector<16x16x64xf32>
    %82 = arith.addf %76, %81 : vector<16x16x64xf32>
    %c1_59 = arith.constant 1 : index
    %c1_60 = arith.constant 1 : index
    %c0_61 = arith.constant 0 : index
    %83 = vector.load %arg15[%c1_59, %c1_60, %c0_61] : memref<18x24x64xf32, #tpu.memory_space<vmem>>, vector<16x16x64xf32>
    %84 = vector.extract_strided_slice %54 {offsets = [4, 0, 0, 0], sizes = [1, 1, 1, 64], strides = [1, 1, 1, 1]} : vector<9x1x1x64xf32> to vector<1x1x1x64xf32>
    %85 = vector.shape_cast %84 : vector<1x1x1x64xf32> to vector<1x1x64xf32>
    %86 = vector.broadcast %85 : vector<1x1x64xf32> to vector<16x16x64xf32>
    %87 = arith.mulf %83, %86 : vector<16x16x64xf32>
    %88 = arith.addf %82, %87 : vector<16x16x64xf32>
    %c1_62 = arith.constant 1 : index
    %c2_63 = arith.constant 2 : index
    %c0_64 = arith.constant 0 : index
    %89 = vector.load %arg15[%c1_62, %c2_63, %c0_64] : memref<18x24x64xf32, #tpu.memory_space<vmem>>, vector<16x16x64xf32>
    %90 = vector.extract_strided_slice %54 {offsets = [5, 0, 0, 0], sizes = [1, 1, 1, 64], strides = [1, 1, 1, 1]} : vector<9x1x1x64xf32> to vector<1x1x1x64xf32>
    %91 = vector.shape_cast %90 : vector<1x1x1x64xf32> to vector<1x1x64xf32>
    %92 = vector.broadcast %91 : vector<1x1x64xf32> to vector<16x16x64xf32>
    %93 = arith.mulf %89, %92 : vector<16x16x64xf32>
    %94 = arith.addf %88, %93 : vector<16x16x64xf32>
    %c2_65 = arith.constant 2 : index
    %c0_66 = arith.constant 0 : index
    %c0_67 = arith.constant 0 : index
    %95 = vector.load %arg15[%c2_65, %c0_66, %c0_67] : memref<18x24x64xf32, #tpu.memory_space<vmem>>, vector<16x16x64xf32>
    %96 = vector.extract_strided_slice %54 {offsets = [6, 0, 0, 0], sizes = [1, 1, 1, 64], strides = [1, 1, 1, 1]} : vector<9x1x1x64xf32> to vector<1x1x1x64xf32>
    %97 = vector.shape_cast %96 : vector<1x1x1x64xf32> to vector<1x1x64xf32>
    %98 = vector.broadcast %97 : vector<1x1x64xf32> to vector<16x16x64xf32>
    %99 = arith.mulf %95, %98 : vector<16x16x64xf32>
    %100 = arith.addf %94, %99 : vector<16x16x64xf32>
    %c2_68 = arith.constant 2 : index
    %c1_69 = arith.constant 1 : index
    %c0_70 = arith.constant 0 : index
    %101 = vector.load %arg15[%c2_68, %c1_69, %c0_70] : memref<18x24x64xf32, #tpu.memory_space<vmem>>, vector<16x16x64xf32>
    %102 = vector.extract_strided_slice %54 {offsets = [7, 0, 0, 0], sizes = [1, 1, 1, 64], strides = [1, 1, 1, 1]} : vector<9x1x1x64xf32> to vector<1x1x1x64xf32>
    %103 = vector.shape_cast %102 : vector<1x1x1x64xf32> to vector<1x1x64xf32>
    %104 = vector.broadcast %103 : vector<1x1x64xf32> to vector<16x16x64xf32>
    %105 = arith.mulf %101, %104 : vector<16x16x64xf32>
    %106 = arith.addf %100, %105 : vector<16x16x64xf32>
    %c2_71 = arith.constant 2 : index
    %c2_72 = arith.constant 2 : index
    %c0_73 = arith.constant 0 : index
    %107 = vector.load %arg15[%c2_71, %c2_72, %c0_73] : memref<18x24x64xf32, #tpu.memory_space<vmem>>, vector<16x16x64xf32>
    %108 = vector.extract_strided_slice %54 {offsets = [8, 0, 0, 0], sizes = [1, 1, 1, 64], strides = [1, 1, 1, 1]} : vector<9x1x1x64xf32> to vector<1x1x1x64xf32>
    %109 = vector.shape_cast %108 : vector<1x1x1x64xf32> to vector<1x1x64xf32>
    %110 = vector.broadcast %109 : vector<1x1x64xf32> to vector<16x16x64xf32>
    %111 = arith.mulf %107, %110 : vector<16x16x64xf32>
    %112 = arith.addf %106, %111 : vector<16x16x64xf32>
    %113 = arith.negf %112 : vector<16x16x64xf32>
    %114 = math.exp %113 : vector<16x16x64xf32>
    %cst_74 = arith.constant 1.000000e+00 : f32
    %115 = vector.broadcast %cst_74 : f32 to vector<16x16x64xf32>
    %116 = arith.addf %115, %114 : vector<16x16x64xf32>
    %117 = arith.divf %115, %116 : vector<16x16x64xf32>
    %118 = arith.mulf %112, %117 : vector<16x16x64xf32>
    %119 = vector.shape_cast %118 : vector<16x16x64xf32> to vector<256x64xf32>
    %cst_75 = arith.constant dense<0.000000e+00> : vector<64xf32>
    %120 = vector.multi_reduction <add>, %119, %cst_75 [0] : vector<256x64xf32> to vector<64xf32>
    %121 = vector.shape_cast %120 : vector<64xf32> to vector<1x64xf32>
    %cst_76 = arith.constant 3.906250e-03 : f32
    %122 = vector.broadcast %cst_76 : f32 to vector<1x64xf32>
    %123 = arith.mulf %121, %122 : vector<1x64xf32>
    %124 = arith.truncf %123 : vector<1x64xf32> to vector<1x64xbf16>
    %c0_77 = arith.constant 0 : index
    %c0_78 = arith.constant 0 : index
    %125 = vector.load %arg8[%c0_77, %c0_78] : memref<64x4xbf16, #tpu.memory_space<vmem>>, vector<64x4xbf16>
    %cst_79 = arith.constant dense<0.000000e+00> : vector<1x4xf32>
    %126 = tpu.matmul %124, %125, %cst_79 {dimension_numbers = #tpu.dot_dimension_numbers<[1], [0], [0], [1], [0, 0, 1, 1], [], []>} : vector<1x64xbf16>, vector<64x4xbf16>, vector<1x4xf32> -> vector<1x4xf32>
    %c0_80 = arith.constant 0 : index
    %c0_81 = arith.constant 0 : index
    %127 = vector.load %arg9[%c0_80, %c0_81] : memref<1x4xf32, #tpu.memory_space<vmem>>, vector<1x4xf32>
    %128 = arith.addf %126, %127 : vector<1x4xf32>
    %129 = arith.negf %128 : vector<1x4xf32>
    %130 = math.exp %129 : vector<1x4xf32>
    %cst_82 = arith.constant 1.000000e+00 : f32
    %131 = vector.broadcast %cst_82 : f32 to vector<1x4xf32>
    %132 = arith.addf %131, %130 : vector<1x4xf32>
    %133 = arith.divf %131, %132 : vector<1x4xf32>
    %134 = arith.mulf %128, %133 : vector<1x4xf32>
    %135 = arith.truncf %134 : vector<1x4xf32> to vector<1x4xbf16>
    %c0_83 = arith.constant 0 : index
    %c0_84 = arith.constant 0 : index
    %136 = vector.load %arg10[%c0_83, %c0_84] : memref<4x64xbf16, #tpu.memory_space<vmem>>, vector<4x64xbf16>
    %cst_85 = arith.constant dense<0.000000e+00> : vector<1x64xf32>
    %137 = tpu.matmul %135, %136, %cst_85 {dimension_numbers = #tpu.dot_dimension_numbers<[1], [0], [0], [1], [0, 0, 1, 1], [], []>} : vector<1x4xbf16>, vector<4x64xbf16>, vector<1x64xf32> -> vector<1x64xf32>
    %c0_86 = arith.constant 0 : index
    %c0_87 = arith.constant 0 : index
    %138 = vector.load %arg11[%c0_86, %c0_87] : memref<1x64xf32, #tpu.memory_space<vmem>>, vector<1x64xf32>
    %139 = arith.addf %137, %138 : vector<1x64xf32>
    %140 = arith.negf %139 : vector<1x64xf32>
    %141 = math.exp %140 : vector<1x64xf32>
    %cst_88 = arith.constant 1.000000e+00 : f32
    %142 = vector.broadcast %cst_88 : f32 to vector<1x64xf32>
    %143 = arith.addf %142, %141 : vector<1x64xf32>
    %144 = arith.divf %142, %143 : vector<1x64xf32>
    %145 = vector.broadcast %144 : vector<1x64xf32> to vector<256x64xf32>
    %146 = arith.mulf %119, %145 : vector<256x64xf32>
    %147 = arith.truncf %146 : vector<256x64xf32> to vector<256x64xbf16>
    %c0_89 = arith.constant 0 : index
    %c0_90 = arith.constant 0 : index
    %148 = vector.load %arg12[%c0_89, %c0_90] : memref<64x128xbf16, #tpu.memory_space<vmem>>, vector<64x128xbf16>
    %cst_91 = arith.constant dense<0.000000e+00> : vector<256x128xf32>
    %149 = tpu.matmul %147, %148, %cst_91 {dimension_numbers = #tpu.dot_dimension_numbers<[1], [0], [0], [1], [0, 0, 1, 1], [], []>} : vector<256x64xbf16>, vector<64x128xbf16>, vector<256x128xf32> -> vector<256x128xf32>
    %c0_92 = arith.constant 0 : index
    %c0_93 = arith.constant 0 : index
    %150 = vector.load %arg13[%c0_92, %c0_93] : memref<1x128xf32, #tpu.memory_space<vmem>>, vector<1x128xf32>
    %151 = vector.broadcast %150 : vector<1x128xf32> to vector<256x128xf32>
    %152 = arith.addf %149, %151 : vector<256x128xf32>
    %153 = arith.negf %152 : vector<256x128xf32>
    %154 = math.exp %153 : vector<256x128xf32>
    %cst_94 = arith.constant 1.000000e+00 : f32
    %155 = vector.broadcast %cst_94 : f32 to vector<256x128xf32>
    %156 = arith.addf %155, %154 : vector<256x128xf32>
    %157 = arith.divf %155, %156 : vector<256x128xf32>
    %158 = arith.mulf %152, %157 : vector<256x128xf32>
    %cst_95 = arith.constant dense<0.000000e+00> : vector<128xf32>
    %159 = vector.multi_reduction <add>, %158, %cst_95 [0] : vector<256x128xf32> to vector<128xf32>
    %160 = vector.shape_cast %159 : vector<128xf32> to vector<1x128xf32>
    %cst_96 = arith.constant 3.906250e-03 : f32
    %161 = vector.broadcast %cst_96 : f32 to vector<1x128xf32>
    %162 = arith.mulf %160, %161 : vector<1x128xf32>
    %163 = vector.shape_cast %162 : vector<1x128xf32> to vector<1x1x128xf32>
    %c0_97 = arith.constant 0 : index
    %c0_98 = arith.constant 0 : index
    %c0_99 = arith.constant 0 : index
    %164 = vector.load %arg14[%c0_97, %c0_98, %c0_99] : memref<1x1x128xf32, #tpu.memory_space<vmem>>, vector<1x1x128xf32>
    tpu.vector_store %arg14[%c0_97, %c0_98, %c0_99], %163 {strides = array<i32>} : memref<1x1x128xf32, #tpu.memory_space<vmem>>, vector<1x1x128xf32>,
    return
  }
  func.func @transform_0(%arg0: i32) -> (i32, i32, i32, i32) {
    %c0_i32 = arith.constant 0 : i32
    %c0_i32_0 = arith.constant 0 : i32
    %c0_i32_1 = arith.constant 0 : i32
    %c0_i32_2 = arith.constant 0 : i32
    return %arg0, %c0_i32, %c0_i32_0, %c0_i32_1 : i32, i32, i32, i32
  }
  func.func @transform_1(%arg0: i32) -> (i32, i32, i32) {
    %c0_i32 = arith.constant 0 : i32
    %c0_i32_0 = arith.constant 0 : i32
    %c0_i32_1 = arith.constant 0 : i32
    %c0_i32_2 = arith.constant 0 : i32
    return %c0_i32, %c0_i32_0, %c0_i32_1 : i32, i32, i32
  }
  func.func @transform_2(%arg0: i32) -> (i32, i32) {
    %c0_i32 = arith.constant 0 : i32
    %c0_i32_0 = arith.constant 0 : i32
    %c0_i32_1 = arith.constant 0 : i32
    return %c0_i32, %c0_i32_0 : i32, i32
  }
  func.func @transform_3(%arg0: i32) -> (i32, i32) {
    %c0_i32 = arith.constant 0 : i32
    %c0_i32_0 = arith.constant 0 : i32
    %c0_i32_1 = arith.constant 0 : i32
    return %c0_i32, %c0_i32_0 : i32, i32
  }
  func.func @transform_4(%arg0: i32) -> (i32, i32) {
    %c0_i32 = arith.constant 0 : i32
    %c0_i32_0 = arith.constant 0 : i32
    %c0_i32_1 = arith.constant 0 : i32
    return %c0_i32, %c0_i32_0 : i32, i32
  }
  func.func @transform_5(%arg0: i32) -> (i32, i32) {
    %c0_i32 = arith.constant 0 : i32
    %c0_i32_0 = arith.constant 0 : i32
    %c0_i32_1 = arith.constant 0 : i32
    return %c0_i32, %c0_i32_0 : i32, i32
  }
  func.func @transform_6(%arg0: i32) -> (i32, i32) {
    %c0_i32 = arith.constant 0 : i32
    %c0_i32_0 = arith.constant 0 : i32
    %c0_i32_1 = arith.constant 0 : i32
    return %c0_i32, %c0_i32_0 : i32, i32
  }
  func.func @transform_7(%arg0: i32) -> (i32, i32) {
    %c0_i32 = arith.constant 0 : i32
    %c0_i32_0 = arith.constant 0 : i32
    %c0_i32_1 = arith.constant 0 : i32
    return %c0_i32, %c0_i32_0 : i32, i32
  }
  func.func @transform_8(%arg0: i32) -> (i32, i32) {
    %c0_i32 = arith.constant 0 : i32
    %c0_i32_0 = arith.constant 0 : i32
    %c0_i32_1 = arith.constant 0 : i32
    return %c0_i32, %c0_i32_0 : i32, i32
  }
  func.func @transform_9(%arg0: i32) -> (i32, i32) {
    %c0_i32 = arith.constant 0 : i32
    %c0_i32_0 = arith.constant 0 : i32
    %c0_i32_1 = arith.constant 0 : i32
    return %c0_i32, %c0_i32_0 : i32, i32
  }
  func.func @transform_10(%arg0: i32) -> (i32, i32) {
    %c0_i32 = arith.constant 0 : i32
    %c0_i32_0 = arith.constant 0 : i32
    %c0_i32_1 = arith.constant 0 : i32
    return %c0_i32, %c0_i32_0 : i32, i32
  }
  func.func @transform_11(%arg0: i32) -> (i32, i32) {
    %c0_i32 = arith.constant 0 : i32
    %c0_i32_0 = arith.constant 0 : i32
    %c0_i32_1 = arith.constant 0 : i32
    return %c0_i32, %c0_i32_0 : i32, i32
  }
  func.func @transform_12(%arg0: i32) -> (i32, i32) {
    %c0_i32 = arith.constant 0 : i32
    %c0_i32_0 = arith.constant 0 : i32
    %c0_i32_1 = arith.constant 0 : i32
    return %c0_i32, %c0_i32_0 : i32, i32
  }
  func.func @transform_13(%arg0: i32) -> (i32, i32, i32) {
    %c0_i32 = arith.constant 0 : i32
    %c0_i32_0 = arith.constant 0 : i32
    %c0_i32_1 = arith.constant 0 : i32
    return %arg0, %c0_i32, %c0_i32_0 : i32, i32, i32
  }
}

module attributes {stable_mosaic.version = 11 : i64} {
  func.func @_head_kernel(%arg0: memref<2x128xf32, #tpu.memory_space<vmem>>, %arg1: memref<128x1024xbf16, #tpu.memory_space<vmem>>, %arg2: memref<1x1024xf32, #tpu.memory_space<vmem>>, %arg3: memref<1024x2xbf16, #tpu.memory_space<vmem>>, %arg4: memref<1x2xf32, #tpu.memory_space<vmem>>, %arg5: memref<2x2xf32, #tpu.memory_space<vmem>>) attributes {dimension_semantics = [], scalar_prefetch = 0 : i64, scratch_operands = 0 : i64, tpu.core_type = #tpu.core_type<tc>} {
    %c0 = arith.constant 0 : index
    %c0_0 = arith.constant 0 : index
    %0 = vector.load %arg0[%c0, %c0_0] : memref<2x128xf32, #tpu.memory_space<vmem>>, vector<2x128xf32>
    %1 = arith.truncf %0 : vector<2x128xf32> to vector<2x128xbf16>
    %c0_1 = arith.constant 0 : index
    %c0_2 = arith.constant 0 : index
    %2 = vector.load %arg1[%c0_1, %c0_2] : memref<128x1024xbf16, #tpu.memory_space<vmem>>, vector<128x1024xbf16>
    %cst = arith.constant dense<0.000000e+00> : vector<2x1024xf32>
    %3 = tpu.matmul %1, %2, %cst {dimension_numbers = #tpu.dot_dimension_numbers<[1], [0], [0], [1], [0, 0, 1, 1], [], []>} : vector<2x128xbf16>, vector<128x1024xbf16>, vector<2x1024xf32> -> vector<2x1024xf32>
    %c0_3 = arith.constant 0 : index
    %c0_4 = arith.constant 0 : index
    %4 = vector.load %arg2[%c0_3, %c0_4] : memref<1x1024xf32, #tpu.memory_space<vmem>>, vector<1x1024xf32>
    %5 = vector.broadcast %4 : vector<1x1024xf32> to vector<2x1024xf32>
    %6 = arith.addf %3, %5 : vector<2x1024xf32>
    %cst_5 = arith.constant 0.000000e+00 : f32
    %7 = vector.broadcast %cst_5 : f32 to vector<2x1024xf32>
    %8 = arith.maximumf %6, %7 : vector<2x1024xf32>
    %9 = arith.truncf %8 : vector<2x1024xf32> to vector<2x1024xbf16>
    %c0_6 = arith.constant 0 : index
    %c0_7 = arith.constant 0 : index
    %10 = vector.load %arg3[%c0_6, %c0_7] : memref<1024x2xbf16, #tpu.memory_space<vmem>>, vector<1024x2xbf16>
    %cst_8 = arith.constant dense<0.000000e+00> : vector<2x2xf32>
    %11 = tpu.matmul %9, %10, %cst_8 {dimension_numbers = #tpu.dot_dimension_numbers<[1], [0], [0], [1], [0, 0, 1, 1], [], []>} : vector<2x1024xbf16>, vector<1024x2xbf16>, vector<2x2xf32> -> vector<2x2xf32>
    %c0_9 = arith.constant 0 : index
    %c0_10 = arith.constant 0 : index
    %12 = vector.load %arg4[%c0_9, %c0_10] : memref<1x2xf32, #tpu.memory_space<vmem>>, vector<1x2xf32>
    %13 = vector.broadcast %12 : vector<1x2xf32> to vector<2x2xf32>
    %14 = arith.addf %11, %13 : vector<2x2xf32>
    %cst_11 = arith.constant dense<0xFF800000> : vector<2xf32>
    %15 = vector.multi_reduction <maximumf>, %14, %cst_11 [1] : vector<2x2xf32> to vector<2xf32>
    %16 = vector.shape_cast %15 : vector<2xf32> to vector<2x1xf32>
    %17 = vector.broadcast %16 : vector<2x1xf32> to vector<2x2xf32>
    %18 = arith.subf %14, %17 : vector<2x2xf32>
    %19 = math.exp %18 : vector<2x2xf32>
    %cst_12 = arith.constant dense<0.000000e+00> : vector<2xf32>
    %20 = vector.multi_reduction <add>, %19, %cst_12 [1] : vector<2x2xf32> to vector<2xf32>
    %21 = vector.shape_cast %20 : vector<2xf32> to vector<2x1xf32>
    %22 = vector.broadcast %21 : vector<2x1xf32> to vector<2x2xf32>
    %23 = arith.divf %19, %22 : vector<2x2xf32>
    %c0_13 = arith.constant 0 : index
    %c0_14 = arith.constant 0 : index
    %24 = vector.load %arg5[%c0_13, %c0_14] : memref<2x2xf32, #tpu.memory_space<vmem>>, vector<2x2xf32>
    tpu.vector_store %arg5[%c0_13, %c0_14], %23 {strides = array<i32>} : memref<2x2xf32, #tpu.memory_space<vmem>>, vector<2x2xf32>,
    return
  }
}

</mosaic_0001>

<bundles_post_ra>
// kernel: custom_efficientnet_forward.3
= control target key start
LH: loop header
LB: loop body
LE: loop exit
PB: predicated region body
PF: predicated region fallthrough
CT: control target
= control target key end

     0   :  { %v1647_v8 = vmov 0   ;;  %s2117_s0 = inlined_call_operand.vmem [shape: f32[2,128], index: 0, kind: input, shape index: {}]   ;;  %s2118_s1 = inlined_call_operand.vmem [shape: bf16[128,1024], index: 1, kind: input, shape index: {}]   ;;  %s2119_s2 = inlined_call_operand.vmem [shape: f32[1,1024], index: 2, kind: input, shape index: {}]   ;;  %s2120_s3 = inlined_call_operand.vmem [shape: bf16[1024,2], index: 3, kind: input, shape index: {}]   ;;  %s2121_s4 = inlined_call_operand.vmem [shape: f32[1,2], index: 4, kind: input, shape index: {}]   ;;  %s2122_s5 = inlined_call_operand.hbm [shape: f32[2,2], index: 5, kind: output, shape index: {}]  }
   0x1   :  { %v24_v0 = vld [vmem:[%s2118_s1] sm:$0xff]  ;;  %v25_v2 = vld [vmem:[%s2118_s1 + $0x8] sm:$0xff]  ;;  %482 = vmatprep.mubr.bf16.mxu0 %v1647_v8  ;;  %523 = vmatprep.mubr.bf16.mxu1 %v1647_v8  ;;  %v26_v60 = vld [vmem:[%s2118_s1 + $0x10] sm:$0xff] }
   0x2   :  { %v28_v1 = vld [vmem:[%s2118_s1 + $0x20] sm:$0xff]  ;;  %v29_v4 = vld [vmem:[%s2118_s1 + $0x28] sm:$0xff]  ;;  %v30_v63 = vld [vmem:[%s2118_s1 + $0x30] sm:$0xff] }
   0x3   :  { %v1337_v3 = vcombine.high %v24_v0, %v28_v1  ;;  %v1336_v5 = vcombine.low %v24_v0, %v28_v1  ;;  %v32_v6 = vld [vmem:[%s2118_s1 + $0x40] sm:$0xff]  ;;  %v1339_v9 = vcombine.high %v25_v2, %v29_v4  ;;  %v1338_v10 = vcombine.low %v25_v2, %v29_v4  ;;  %v33_v12 = vld [vmem:[%s2118_s1 + $0x48] sm:$0xff]  ;;  %v27_v2 = vld [vmem:[%s2118_s1 + $0x18] sm:$0xff] }
   0x4   :  { %v36_v7 = vld [vmem:[%s2118_s1 + $0x60] sm:$0xff]  ;;  %v37_v13 = vld [vmem:[%s2118_s1 + $0x68] sm:$0xff] }
   0x5   :  { %v1345_v11 = vcombine.high %v32_v6, %v36_v7  ;;  %v40_v14 = vld [vmem:[%s2118_s1 + $0x80] sm:$0xff]  ;;  %450 = vmatprep.subr.bf16.mxu0 %v1337_v3  ;;  %v1347_v15 = vcombine.high %v33_v12, %v37_v13  ;;  %v41_v17 = vld [vmem:[%s2118_s1 + $0x88] sm:$0xff]  ;;  %491 = vmatprep.subr.bf16.mxu1 %v1339_v9  ;;  %v1344_v19 = vcombine.low %v32_v6, %v36_v7  ;;  %v31_v3 = vld [vmem:[%s2118_s1 + $0x38] sm:$0xff] }
   0x6   :  { %v44_v16 = vld [vmem:[%s2118_s1 + $0xa0] sm:$0xff]  ;;  %v45_v18 = vld [vmem:[%s2118_s1 + $0xa8] sm:$0xff]  ;;  %451 = vmatpush1.bf16.msra.mxu0 %v1336_v5  ;;  %492 = vmatpush1.bf16.msra.mxu1 %v1338_v10  ;;  %v1346_v20 = vcombine.low %v33_v12, %v37_v13  ;;  %v34_v5 = vld [vmem:[%s2118_s1 + $0x50] sm:$0xff]  ;;  %v1341_v7 = vcombine.high %v26_v60, %v30_v63  ;;  %v1343_v10 = vcombine.high %v27_v2, %v31_v3 }
   0x7   :  { %452 = vmatprep.subr.bf16.mxu0 %v1345_v11  ;;  %v1353_v21 = vcombine.high %v40_v14, %v44_v16  ;;  %493 = vmatprep.subr.bf16.mxu1 %v1347_v15  ;;  %v1355_v22 = vcombine.high %v41_v17, %v45_v18  ;;  %v48_v23 = vld [vmem:[%s2118_s1 + $0xc0] sm:$0xff]  ;;  %v49_v25 = vld [vmem:[%s2118_s1 + $0xc8] sm:$0xff]  ;;  %v1352_v27 = vcombine.low %v40_v14, %v44_v16  ;;  %v38_v9 = vld [vmem:[%s2118_s1 + $0x70] sm:$0xff] }
   0x8   :  { %v52_v24 = vld [vmem:[%s2118_s1 + $0xe0] sm:$0xff]  ;;  %v53_v26 = vld [vmem:[%s2118_s1 + $0xe8] sm:$0xff]  ;;  %v1354_v28 = vcombine.low %v41_v17, %v45_v18  ;;  %v35_v11 = vld [vmem:[%s2118_s1 + $0x58] sm:$0xff]  ;;  %v1340_v14 = vcombine.low %v26_v60, %v30_v63  ;;  %v1342_v16 = vcombine.low %v27_v2, %v31_v3  ;;  %v1349_v17 = vcombine.high %v34_v5, %v38_v9 }
   0x9   :  { %v1361_v29 = vcombine.high %v48_v23, %v52_v24  ;;  %v1363_v30 = vcombine.high %v49_v25, %v53_v26  ;;  %v56_v31 = vld [vmem:[%s2118_s1 + $0x100] sm:$0xff]  ;;  %v57_v33 = vld [vmem:[%s2118_s1 + $0x108] sm:$0xff]  ;;  %v1360_v35 = vcombine.low %v48_v23, %v52_v24  ;;  %v1362_v36 = vcombine.low %v49_v25, %v53_v26  ;;  %v39_v13 = vld [vmem:[%s2118_s1 + $0x78] sm:$0xff] }
   0xa   :  { %453 = vmatpush1.bf16.msra.mxu0 %v1344_v19  ;;  %494 = vmatpush1.bf16.msra.mxu1 %v1346_v20  ;;  %v60_v32 = vld [vmem:[%s2118_s1 + $0x120] sm:$0xff]  ;;  %v61_v34 = vld [vmem:[%s2118_s1 + $0x128] sm:$0xff]  ;;  %v42_v15 = vld [vmem:[%s2118_s1 + $0x90] sm:$0xff]  ;;  %v1351_v19 = vcombine.high %v35_v11, %v39_v13  ;;  %v1350_v24 = vcombine.low %v35_v11, %v39_v13 }
   0xb   :  { %454 = vmatprep.subr.bf16.mxu0 %v1353_v21  ;;  %495 = vmatprep.subr.bf16.mxu1 %v1355_v22  ;;  %v1369_v37 = vcombine.high %v56_v31, %v60_v32  ;;  %v1371_v38 = vcombine.high %v57_v33, %v61_v34  ;;  %v64_v39 = vld [vmem:[%s2118_s1 + $0x140] sm:$0xff]  ;;  %v65_v41 = vld [vmem:[%s2118_s1 + $0x148] sm:$0xff]  ;;  %v1368_v43 = vcombine.low %v56_v31, %v60_v32  ;;  %v46_v18 = vld [vmem:[%s2118_s1 + $0xb0] sm:$0xff] }
   0xc   :  { %v68_v40 = vld [vmem:[%s2118_s1 + $0x160] sm:$0xff]  ;;  %v69_v42 = vld [vmem:[%s2118_s1 + $0x168] sm:$0xff]  ;;  %v1370_v44 = vcombine.low %v57_v33, %v61_v34  ;;  %v43_v20 = vld [vmem:[%s2118_s1 + $0x98] sm:$0xff]  ;;  %v1348_v22 = vcombine.low %v34_v5, %v38_v9  ;;  %v1357_v25 = vcombine.high %v42_v15, %v46_v18 }
   0xd   :  { %v1377_v45 = vcombine.high %v64_v39, %v68_v40  ;;  %v1379_v46 = vcombine.high %v65_v41, %v69_v42  ;;  %v72_v47 = vld [vmem:[%s2118_s1 + $0x180] sm:$0xff]  ;;  %v73_v49 = vld [vmem:[%s2118_s1 + $0x188] sm:$0xff]  ;;  %v1376_v51 = vcombine.low %v64_v39, %v68_v40  ;;  %v1378_v52 = vcombine.low %v65_v41, %v69_v42  ;;  %v47_v21 = vld [vmem:[%s2118_s1 + $0xb8] sm:$0xff] }
   0xe   :  { %455 = vmatpush1.bf16.msra.mxu0 %v1352_v27  ;;  %496 = vmatpush1.bf16.msra.mxu1 %v1354_v28  ;;  %v76_v48 = vld [vmem:[%s2118_s1 + $0x1a0] sm:$0xff]  ;;  %v77_v50 = vld [vmem:[%s2118_s1 + $0x1a8] sm:$0xff]  ;;  %v50_v23 = vld [vmem:[%s2118_s1 + $0xd0] sm:$0xff]  ;;  %v1359_v27 = vcombine.high %v43_v20, %v47_v21  ;;  %v1358_v32 = vcombine.low %v43_v20, %v47_v21 }
   0xf   :  { %456 = vmatprep.subr.bf16.mxu0 %v1361_v29  ;;  %497 = vmatprep.subr.bf16.mxu1 %v1363_v30  ;;  %v1385_v53 = vcombine.high %v72_v47, %v76_v48  ;;  %v80_v54 = vld [vmem:[%s2118_s1 + $0x1c0] sm:$0xff]  ;;  %v1387_v56 = vcombine.high %v73_v49, %v77_v50  ;;  %v81_v57 = vld [vmem:[%s2118_s1 + $0x1c8] sm:$0xff]  ;;  %v1384_v59 = vcombine.low %v72_v47, %v76_v48  ;;  %v54_v26 = vld [vmem:[%s2118_s1 + $0xf0] sm:$0xff] }
  0x10   :  { %v84_v55 = vld [vmem:[%s2118_s1 + $0x1e0] sm:$0xff]  ;;  %v85_v58 = vld [vmem:[%s2118_s1 + $0x1e8] sm:$0xff]  ;;  %v1386_v61 = vcombine.low %v73_v49, %v77_v50  ;;  %v51_v28 = vld [vmem:[%s2118_s1 + $0xd8] sm:$0xff]  ;;  %v1356_v30 = vcombine.low %v42_v15, %v46_v18  ;;  %v1365_v33 = vcombine.high %v50_v23, %v54_v26 }
  0x11   :  { %v1393_v62 = vcombine.high %v80_v54, %v84_v55  ;;  %v1395_v0 = vcombine.high %v81_v57, %v85_v58  ;;  %v22_v1 = vld [vmem:[%s2117_s0] sm:$0x3]  ;;  %v1392_v4 = vcombine.low %v80_v54, %v84_v55  ;;  %v1394_v6 = vcombine.low %v81_v57, %v85_v58  ;;  %v55_v29 = vld [vmem:[%s2118_s1 + $0xf8] sm:$0xff]  ;;  %v58_v31 = vld [vmem:[%s2118_s1 + $0x110] sm:$0xff] }
  0x12   :  { %457 = vmatpush1.bf16.msra.mxu0 %v1360_v35  ;;  %498 = vmatpush1.bf16.msra.mxu1 %v1362_v36  ;;  %v1801_v12 = vpack.c.bf16 %v22_v1, %v22_v1  ;;  %v62_v34 = vld [vmem:[%s2118_s1 + $0x130] sm:$0xff]  ;;  %v1367_v35 = vcombine.high %v51_v28, %v55_v29  ;;  %v63_v36 = vld [vmem:[%s2118_s1 + $0x138] sm:$0xff]  ;;  %v1366_v40 = vcombine.low %v51_v28, %v55_v29  ;;  %v1555_v1 = vld [vmem:[%s2120_s3 + $0x40] sm:$0xff]  }
  0x13   :  { %458 = vmatprep.subr.bf16.mxu0 %v1369_v37  ;;  %499 = vmatprep.subr.bf16.mxu1 %v1371_v38  ;;  %v1364_v37 = vcombine.low %v50_v23, %v54_v26  ;;  %v66_v38 = vld [vmem:[%s2118_s1 + $0x150] sm:$0xff]  ;;  %v1373_v41 = vcombine.high %v58_v31, %v62_v34  ;;  %v67_v42 = vld [vmem:[%s2118_s1 + $0x158] sm:$0xff]  ;;  %v1556_v3 = vld [vmem:[%s2120_s3 + $0xc0] sm:$0xff]  }
  0x14   :  { %v70_v39 = vld [vmem:[%s2118_s1 + $0x170] sm:$0xff]  ;;  %v75_v50 = vld [vmem:[%s2118_s1 + $0x198] sm:$0xff]  ;;  %v1557_v5 = vld [vmem:[%s2120_s3] sm:$0xff]  }
  0x15   :  { %v78_v47 = vld [vmem:[%s2118_s1 + $0x1b0] sm:$0xff]  ;;  %v1381_v49 = vcombine.high %v66_v38, %v70_v39  ;;  %v83_v58 = vld [vmem:[%s2118_s1 + $0x1d8] sm:$0xff]  ;;  %v1560_v9 = vld [vmem:[%s2120_s3 + $0xc8] sm:$0xff]  }
  0x16   :  { %459 = vmatpush1.bf16.msra.mxu0 %v1368_v43  ;;  %500 = vmatpush1.bf16.msra.mxu1 %v1370_v44  ;;  %v71_v43 = vld [vmem:[%s2118_s1 + $0x178] sm:$0xff]  ;;  %v82_v54 = vld [vmem:[%s2118_s1 + $0x1d0] sm:$0xff]  ;;  %v1562_v11 = vld [vmem:[%s2120_s3 + $0x88] sm:$0xff]  }
  0x17   :  { %460 = vmatprep.subr.bf16.mxu0 %v1377_v45  ;;  %501 = vmatprep.subr.bf16.mxu1 %v1379_v46  ;;  %v1372_v45 = vcombine.low %v58_v31, %v62_v34  ;;  %v74_v46 = vld [vmem:[%s2118_s1 + $0x190] sm:$0xff] }
  0x18   :  { %v86_v55 = vld [vmem:[%s2118_s1 + $0x1f0] sm:$0xff]  ;;  %v1389_v57 = vcombine.high %v74_v46, %v78_v47 }
  0x19   :  { %v1397_v63 = vcombine.high %v82_v54, %v86_v55  ;;  %v1396_v2 = vcombine.low %v82_v54, %v86_v55  ;;  %v1563_v13 = vld [vmem:[%s2120_s3 + $0x50] sm:$0xff]  }
  0x1a   :  { %461 = vmatpush1.bf16.msra.mxu0 %v1376_v51  ;;  %502 = vmatpush1.bf16.msra.mxu1 %v1378_v52  ;;  %v79_v51 = vld [vmem:[%s2118_s1 + $0x1b8] sm:$0xff]  ;;  %v1383_v52 = vcombine.high %v67_v42, %v71_v43  ;;  %v1565_v15 = vld [vmem:[%s2120_s3 + $0x10] sm:$0xff]  }
  0x1b   :  { %462 = vmatprep.subr.bf16.mxu0 %v1385_v53  ;;  %503 = vmatprep.subr.bf16.mxu1 %v1387_v56  ;;  %v1380_v53 = vcombine.low %v66_v38, %v70_v39  ;;  %v1382_v56 = vcombine.low %v67_v42, %v71_v43  ;;  %v1391_v60 = vcombine.high %v75_v50, %v79_v51 }
  0x1e   :  { %463 = vmatpush1.bf16.msra.mxu0 %v1384_v59  ;;  %504 = vmatpush1.bf16.msra.mxu1 %v1386_v61  ;;  %v87_v59 = vld [vmem:[%s2118_s1 + $0x1f8] sm:$0xff]  ;;  %v1388_v61 = vcombine.low %v74_v46, %v78_v47 }
  0x1f   :  { %464 = vmatprep.subr.bf16.mxu0 %v1393_v62  ;;  %505 = vmatprep.subr.bf16.mxu1 %v1395_v0  ;;  %v1390_v62 = vcombine.low %v75_v50, %v79_v51  ;;  %v1399_v0 = vcombine.high %v83_v58, %v87_v59 }
  0x22   :  { %465 = vmatpush1.bf16.msra.mxu0 %v1392_v4  ;;  %506 = vmatpush1.bf16.msra.mxu1 %v1394_v6  ;;  %v1398_v4 = vcombine.low %v83_v58, %v87_v59  ;;  %v1558_v6 = vld [vmem:[%s2120_s3 + $0x80] sm:$0xff]  }
  0x23   :  { %532 = vmatprep.subr.bf16.mxu0 %v1341_v7  ;;  %573 = vmatprep.subr.bf16.mxu1 %v1343_v10  ;;  %v1559_v7 = vld [vmem:[%s2120_s3 + $0x48] sm:$0xff]  }
  0x24   :  { %v1561_v10 = vld [vmem:[%s2120_s3 + $0x8] sm:$0xff]  }
  0x25   :  { %483 = vmatmul.mubr.bf16.vlgmr.msra.gmra.mrb[0].mxu0 %v1801_v12  ;;  %524 = vmatmul.mubr.bf16.vlgmr.msra.gmra.mrb[0].mxu1 %v1801_v12 }
  0x26   :  { %533 = vmatpush1.bf16.msra.mxu0 %v1340_v14  ;;  %574 = vmatpush1.bf16.msra.mxu1 %v1342_v16  ;;  %v1564_v14 = vld [vmem:[%s2120_s3 + $0xd0] sm:$0xff]  }
  0x27   :  { %534 = vmatprep.subr.bf16.mxu0 %v1349_v17  ;;  %575 = vmatprep.subr.bf16.mxu1 %v1351_v19 }
  0x28   :  { %564 = vmatprep.mubr.bf16.mxu0 %v1647_v8  ;;  %605 = vmatprep.mubr.bf16.mxu1 %v1647_v8  ;;  %v59_v8 = vld [vmem:[%s2118_s1 + $0x118] sm:$0xff] }
  0x29   :  { %v1375_v44 = vcombine.high %v59_v8, %v63_v36  ;;  %v1374_v48 = vcombine.low %v59_v8, %v63_v36 }
  0x2a   :  { %535 = vmatpush1.bf16.msra.mxu0 %v1348_v22  ;;  %576 = vmatpush1.bf16.msra.mxu1 %v1350_v24 }
  0x2b   :  { %536 = vmatprep.subr.bf16.mxu0 %v1357_v25  ;;  %577 = vmatprep.subr.bf16.mxu1 %v1359_v27 }
  0x2e   :  { %537 = vmatpush1.bf16.msra.mxu0 %v1356_v30  ;;  %578 = vmatpush1.bf16.msra.mxu1 %v1358_v32 }
  0x2f   :  { %538 = vmatprep.subr.bf16.mxu0 %v1365_v33  ;;  %579 = vmatprep.subr.bf16.mxu1 %v1367_v35 }
  0x32   :  { %539 = vmatpush1.bf16.msra.mxu0 %v1364_v37  ;;  %580 = vmatpush1.bf16.msra.mxu1 %v1366_v40 }
  0x33   :  { %540 = vmatprep.subr.bf16.mxu0 %v1373_v41  ;;  %581 = vmatprep.subr.bf16.mxu1 %v1375_v44 }
  0x36   :  { %541 = vmatpush1.bf16.msra.mxu0 %v1372_v45  ;;  %582 = vmatpush1.bf16.msra.mxu1 %v1374_v48 }
  0x37   :  { %542 = vmatprep.subr.bf16.mxu0 %v1381_v49  ;;  %583 = vmatprep.subr.bf16.mxu1 %v1383_v52 }
  0x3a   :  { %543 = vmatpush1.bf16.msra.mxu0 %v1380_v53  ;;  %584 = vmatpush1.bf16.msra.mxu1 %v1382_v56 }
  0x3b   :  { %544 = vmatprep.subr.bf16.mxu0 %v1389_v57  ;;  %585 = vmatprep.subr.bf16.mxu1 %v1391_v60 }
  0x3e   :  { %545 = vmatpush1.bf16.msra.mxu0 %v1388_v61  ;;  %586 = vmatpush1.bf16.msra.mxu1 %v1390_v62 }
  0x3f   :  { %546 = vmatprep.subr.bf16.mxu0 %v1397_v63  ;;  %587 = vmatprep.subr.bf16.mxu1 %v1399_v0 }
  0x42   :  { %547 = vmatpush1.bf16.msra.mxu0 %v1396_v2  ;;  %588 = vmatpush1.bf16.msra.mxu1 %v1398_v4 }
  0x43   :  { %1465 = vmatprep.subr.bf16.mxu0 %v1555_v1  ;;  %1487 = vmatprep.subr.bf16.mxu1 %v1556_v3 }
  0x45   :  { %565 = vmatmul.mubr.bf16.vlgmr.msra.gmra.mrb[4].mxu0 %v1801_v12  ;;  %606 = vmatmul.mubr.bf16.vlgmr.msra.gmra.mrb[4].mxu1 %v1801_v12 }
  0x46   :  { %1466 = vmatpush3.bf16.msra.mxu0 %v1557_v5  ;;  %1488 = vmatpush3.bf16.msra.mxu1 %v1558_v6 }
  0x47   :  { %1467 = vmatprep.subr.bf16.mxu0 %v1559_v7  ;;  %1489 = vmatprep.subr.bf16.mxu1 %v1560_v9 }
  0x4a   :  { %1468 = vmatpush3.bf16.msra.mxu0 %v1561_v10 }
  0x4b   :  { %10 = vsyncpa [#allocation3], 0  ;;  %1490 = vmatpush3.bf16.msra.mxu1 %v1562_v11  ;;  %1469 = vmatprep.subr.bf16.mxu0 %v1563_v13  ;;  %v1566_v12 = vld [vmem:[%s2120_s3 + $0x90] sm:$0xff]   ;;  %v1567_v16 = vld [vmem:[%s2120_s3 + $0x58] sm:$0xff]   ;;  %v90_v37 = vlaneseq  ;;  %vm1309_vm0 = vcmask 9216  }
  0x4c   :  { %1491 = vmatprep.subr.bf16.mxu1 %v1564_v14  ;;  %v1568_v17 = vld [vmem:[%s2120_s3 + $0xd8] sm:$0xff]   ;;  %v1571_v20 = vld [vmem:[%s2120_s3 + $0x60] sm:$0xff]   ;;  %v1575_v24 = vld [vmem:[%s2120_s3 + $0x68] sm:$0xff]  }
  0x4d   :  { %v1569_v18 = vld [vmem:[%s2120_s3 + $0x18] sm:$0xff]   ;;  %v1572_v21 = vld [vmem:[%s2120_s3 + $0xe0] sm:$0xff]   ;;  %v1576_v25 = vld [vmem:[%s2120_s3 + $0xe8] sm:$0xff]   ;;  %v1986_v38 = vshrl.u32 %v90_v37, 7 }
  0x4e   :  { %1470 = vmatpush3.bf16.msra.mxu0 %v1565_v15  ;;  %v1570_v19 = vld [vmem:[%s2120_s3 + $0x98] sm:$0xff]   ;;  %v1573_v22 = vld [vmem:[%s2120_s3 + $0x20] sm:$0xff]   ;;  %v1577_v26 = vld [vmem:[%s2120_s3 + $0x28] sm:$0xff]  }
  0x4f   :  { %1492 = vmatpush3.bf16.msra.mxu1 %v1566_v12  ;;  %1471 = vmatprep.subr.bf16.mxu0 %v1567_v16  ;;  %v1574_v23 = vld [vmem:[%s2120_s3 + $0xa0] sm:$0xff]   ;;  %v1578_v27 = vld [vmem:[%s2120_s3 + $0xa8] sm:$0xff]   ;;  %v1579_v28 = vld [vmem:[%s2120_s3 + $0x70] sm:$0xff]   ;;  %v92_v39 = vsub.s32 0, %v1986_v38  ;;  %v100_v41 = vsub.s32 2, %v1986_v38  ;;  %v96_v42 = vsub.s32 1, %v1986_v38 }
  0x50   :  { %1493 = vmatprep.subr.bf16.mxu1 %v1568_v17  ;;  %v1580_v29 = vld [vmem:[%s2120_s3 + $0xf0] sm:$0xff]   ;;  %v1583_v32 = vld [vmem:[%s2120_s3 + $0x78] sm:$0xff]   ;;  %v1587_v8 = vld [vmem:[%s2120_s3 + $0x140] sm:$0xff]   ;;  %v104_v43 = vsub.s32 3, %v1986_v38 }
  0x51   :  { %v1581_v30 = vld [vmem:[%s2120_s3 + $0x30] sm:$0xff]   ;;  %v1584_v33 = vld [vmem:[%s2120_s3 + $0xf8] sm:$0xff]   ;;  %v1588_v36 = vld [vmem:[%s2120_s3 + $0x1c0] sm:$0xff]  }
  0x52   :  { %1472 = vmatpush3.bf16.msra.mxu0 %v1569_v18  ;;  %v1582_v31 = vld [vmem:[%s2120_s3 + $0xb0] sm:$0xff]   ;;  %v1585_v34 = vld [vmem:[%s2120_s3 + $0x38] sm:$0xff]   ;;  %v1992_v40 = vld [vmem:[%s2119_s2] sm:$0xff] }
  0x53   :  { %1494 = vmatpush3.bf16.msra.mxu1 %v1570_v19  ;;  %1473 = vmatprep.subr.bf16.mxu0 %v1571_v20  ;;  %v1586_v35 = vld [vmem:[%s2120_s3 + $0xb8] sm:$0xff]   ;;  %v93_v44 = vrot.slane %v1992_v40, %v92_v39  ;;  %v101_v45 = vrot.slane %v1992_v40, %v100_v41  ;;  %v97_v46 = vrot.slane %v1992_v40, %v96_v42  ;;  %v1589_v3 = vld [vmem:[%s2120_s3 + $0x100] sm:$0xff]   ;;  %v1591_v6 = vld [vmem:[%s2120_s3 + $0x148] sm:$0xff]  }
  0x54   :  { %1495 = vmatprep.subr.bf16.mxu1 %v1572_v21  ;;  %v105_v47 = vrot.slane %v1992_v40, %v104_v43  ;;  %v1590_v5 = vld [vmem:[%s2120_s3 + $0x180] sm:$0xff]   ;;  %v1592_v7 = vld [vmem:[%s2120_s3 + $0x1c8] sm:$0xff]   ;;  %v1595_v11 = vld [vmem:[%s2120_s3 + $0x150] sm:$0xff]  }
  0x55   :  { %v1593_v9 = vld [vmem:[%s2120_s3 + $0x108] sm:$0xff]   ;;  %v1596_v13 = vld [vmem:[%s2120_s3 + $0x1d0] sm:$0xff]   ;;  %v1599_v12 = vld [vmem:[%s2120_s3 + $0x158] sm:$0xff]  }
  0x56   :  { %1474 = vmatpush3.bf16.msra.mxu0 %v1573_v22  ;;  %v1594_v10 = vld [vmem:[%s2120_s3 + $0x188] sm:$0xff]   ;;  %v1597_v14 = vld [vmem:[%s2120_s3 + $0x110] sm:$0xff]   ;;  %v1600_v16 = vld [vmem:[%s2120_s3 + $0x1d8] sm:$0xff]  }
  0x57   :  { %1496 = vmatpush3.bf16.msra.mxu1 %v1574_v23  ;;  %1475 = vmatprep.subr.bf16.mxu0 %v1575_v24  ;;  %v1598_v15 = vld [vmem:[%s2120_s3 + $0x190] sm:$0xff]   ;;  %v1601_v17 = vld [vmem:[%s2120_s3 + $0x118] sm:$0xff]   ;;  %v1603_v19 = vld [vmem:[%s2120_s3 + $0x160] sm:$0xff]  }
  0x58   :  { %1497 = vmatprep.subr.bf16.mxu1 %v1576_v25  ;;  %v1602_v18 = vld [vmem:[%s2120_s3 + $0x198] sm:$0xff]   ;;  %v1604_v20 = vld [vmem:[%s2120_s3 + $0x1e0] sm:$0xff]   ;;  %v1607_v23 = vld [vmem:[%s2120_s3 + $0x168] sm:$0xff]   ;;  %v108_v25 = vsub.s32 4, %v1986_v38 }
  0x59   :  { %v1605_v21 = vld [vmem:[%s2120_s3 + $0x120] sm:$0xff]   ;;  %v1608_v24 = vld [vmem:[%s2120_s3 + $0x1e8] sm:$0xff]   ;;  %v1614_v37 = vld [vmem:[%s2120_s3 + $0x1b0] sm:$0xff]  }
  0x5a   :  { %1476 = vmatpush3.bf16.msra.mxu0 %v1577_v26  ;;  %v1606_v22 = vld [vmem:[%s2120_s3 + $0x1a0] sm:$0xff]   ;;  %v1609_v26 = vld [vmem:[%s2120_s3 + $0x128] sm:$0xff]   ;;  %v1616_v41 = vld [vmem:[%s2120_s3 + $0x1f8] sm:$0xff]  }
  0x5b   :  { %1498 = vmatpush3.bf16.msra.mxu1 %v1578_v27  ;;  %1477 = vmatprep.subr.bf16.mxu0 %v1579_v28  ;;  %v116_v27 = vsub.s32 6, %v1986_v38  ;;  %v112_v28 = vsub.s32 5, %v1986_v38 }
  0x5c   :  { %1499 = vmatprep.subr.bf16.mxu1 %v1580_v29  ;;  %v1610_v29 = vld [vmem:[%s2120_s3 + $0x1a8] sm:$0xff]  }
  0x5e   :  { %1478 = vmatpush3.bf16.msra.mxu0 %v1581_v30  ;;  %v120_v30 = vsub.s32 7, %v1986_v38  ;;  %v1615_v38 = vld [vmem:[%s2120_s3 + $0x178] sm:$0xff]  }
  0x5f   :  { %1500 = vmatpush3.bf16.msra.mxu1 %v1582_v31  ;;  %1479 = vmatprep.subr.bf16.mxu0 %v1583_v32  ;;  %v1611_v31 = vld [vmem:[%s2120_s3 + $0x170] sm:$0xff]  }
  0x60   :  { %1501 = vmatprep.subr.bf16.mxu1 %v1584_v33  ;;  %v1612_v32 = vld [vmem:[%s2120_s3 + $0x1f0] sm:$0xff]   ;;  %v109_v33 = vrot.slane %v1992_v40, %v108_v25 }
  0x62   :  { %1480 = vmatpush3.bf16.msra.mxu0 %v1585_v34  ;;  %v117_v34 = vrot.slane %v1992_v40, %v116_v27 }
  0x63   :  { %1502 = vmatpush3.bf16.msra.mxu1 %v1586_v35  ;;  %1509 = vmatprep.subr.bf16.mxu0 %v1587_v8  ;;  %v113_v35 = vrot.slane %v1992_v40, %v112_v28  ;;  %v1613_v8 = vld [vmem:[%s2120_s3 + $0x130] sm:$0xff]  }
  0x64   :  { %1531 = vmatprep.subr.bf16.mxu1 %v1588_v36  ;;  %v121_v36 = vrot.slane %v1992_v40, %v120_v30 }
  0xf8   :  { %v484_v48 = vpop.f32.mrb[0].mxu0  ;;  %v525_v50 = vpop.f32.mrb[0].mxu1 }
  0xf9   :  { %v485_v49 = vadd.f32 %v484_v48, %v93_v44  ;;  %v486_v51 = vpop.f32.mrb[1].mxu0  ;;  %v526_v52 = vadd.f32 %v525_v50, %v101_v45  ;;  %v527_v54 = vpop.f32.mrb[1].mxu1  ;;  %v1617_v48 = vld [vmem:[%s2120_s3 + $0x138] sm:$0xff]  }
  0xfa   :  { %v487_v53 = vadd.f32 %v486_v51, %v97_v46  ;;  %v488_v55 = vpop.f32.mrb[2].mxu0  ;;  %v528_v57 = vadd.f32 %v527_v54, %v105_v47  ;;  %v529_v58 = vpop.f32.mrb[2].mxu1 }
  0xfb   :  { %v614_v56 = vmax.f32 %v485_v49, 0.0  ;;  %v489_v59 = vpop.f32.mrb[3].mxu0  ;;  %v616_v60 = vmax.f32 %v526_v52, 0.0  ;;  %v530_v62 = vpop.f32.mrb[3].mxu1 }
  0xfc   :  { %v615_v61 = vmax.f32 %v487_v53, 0.0  ;;  %v617_v0 = vmax.f32 %v528_v57, 0.0  ;;  %v1618_v53 = vld [vmem:[%s2120_s3 + $0x1b8] sm:$0xff]   ;;  %s1648_s3 = smov [#allocation2]  }
  0xfd   :  { %v622_v63 = vpack.c.bf16 %v614_v56, %v614_v56  ;;  %v624_v1 = vpack.c.bf16 %v616_v60, %v616_v60 }
  0xfe   :  { %v623_v2 = vpack.c.bf16 %v615_v61, %v615_v61  ;;  %v625_v4 = vpack.c.bf16 %v617_v0, %v617_v0  ;;  %v1400_v0 = vld [vmem:[%s2121_s4] ss:$0 sm:$0xff]  ;;  %s1328_s4 = sshll.u32 %s1648_s3, 4  ;;  %s1329_s4 = int_to_ptr.vmem [resolvable:$true] %s1328_s4 }
  0xff   :  { %s1623_s15 = scalar_lea.vmem %s1329_s4, 32  ;;  %p1628_p1 = scmp.lt.s32.totalorder %s1329_s4, %s1329_s4 }
 0x100   :  { %1181 = vmatprep.mubr.bf16.mxu0 %v623_v2  ;;  %1221 = vmatprep.mubr.bf16.mxu1 %v625_v4  ;;  %p1624_p0 = scmp.ne.s32.totalorder %s1329_s4, %s1623_s15  ;;  %p1629_p2 = scmp.lt.s32.totalorder %s1623_s15, %s1623_s15 }
 0x101   :  { %1182 = vmatmul.mubr.bf16.vlgmr.msra.gmra.mrb[8].mxu0 %v622_v63  ;;  %1222 = vmatmul.mubr.bf16.vlgmr.msra.gmra.mrb[8].mxu1 %v624_v1 }
 0x102   :  { %1510 = vmatpush3.bf16.msra.mxu0 %v1589_v3  ;;  %1532 = vmatpush3.bf16.msra.mxu1 %v1590_v5  ;;  %p1630_p3 = por %p1629_p2, %p1628_p1 }
 0x103   :  { %1511 = vmatprep.subr.bf16.mxu0 %v1591_v6  ;;  %1533 = vmatprep.subr.bf16.mxu1 %v1592_v7 }
 0x104   :  { %p1631_p4 = pnand %p1630_p3, %p1624_p0 }
 0x106   :  { %1512 = vmatpush3.bf16.msra.mxu0 %v1593_v9  ;;  %1534 = vmatpush3.bf16.msra.mxu1 %v1594_v10 }
 0x107   :  { %1513 = vmatprep.subr.bf16.mxu0 %v1595_v11  ;;  %1535 = vmatprep.subr.bf16.mxu1 %v1596_v13 }
 0x10a   :  { %1514 = vmatpush3.bf16.msra.mxu0 %v1597_v14  ;;  %1536 = vmatpush3.bf16.msra.mxu1 %v1598_v15 }
 0x10b   :  { %1515 = vmatprep.subr.bf16.mxu0 %v1599_v12  ;;  %1537 = vmatprep.subr.bf16.mxu1 %v1600_v16 }
 0x10e   :  { %1516 = vmatpush3.bf16.msra.mxu0 %v1601_v17  ;;  %1538 = vmatpush3.bf16.msra.mxu1 %v1602_v18 }
 0x10f   :  { %1517 = vmatprep.subr.bf16.mxu0 %v1603_v19  ;;  %1539 = vmatprep.subr.bf16.mxu1 %v1604_v20 }
 0x112   :  { %1518 = vmatpush3.bf16.msra.mxu0 %v1605_v21  ;;  %1540 = vmatpush3.bf16.msra.mxu1 %v1606_v22 }
 0x113   :  { %1519 = vmatprep.subr.bf16.mxu0 %v1607_v23  ;;  %1541 = vmatprep.subr.bf16.mxu1 %v1608_v24 }
 0x116   :  { %1520 = vmatpush3.bf16.msra.mxu0 %v1609_v26  ;;  %1542 = vmatpush3.bf16.msra.mxu1 %v1610_v29 }
 0x117   :  { %1521 = vmatprep.subr.bf16.mxu0 %v1611_v31  ;;  %1543 = vmatprep.subr.bf16.mxu1 %v1612_v32 }
 0x118   :  { %v566_v39 = vpop.f32.mrb[4].mxu0  ;;  %v607_v43 = vpop.f32.mrb[4].mxu1 }
 0x119   :  { %v567_v42 = vadd.f32 %v566_v39, %v109_v33  ;;  %v568_v44 = vpop.f32.mrb[5].mxu0  ;;  %v608_v45 = vadd.f32 %v607_v43, %v117_v34  ;;  %v609_v46 = vpop.f32.mrb[5].mxu1 }
 0x11a   :  { %v569_v40 = vadd.f32 %v568_v44, %v113_v35  ;;  %v570_v47 = vpop.f32.mrb[6].mxu0  ;;  %1522 = vmatpush3.bf16.msra.mxu0 %v1613_v8  ;;  %v610_v50 = vadd.f32 %v609_v46, %v121_v36  ;;  %v611_v51 = vpop.f32.mrb[6].mxu1  ;;  %1544 = vmatpush3.bf16.msra.mxu1 %v1614_v37 }
 0x11b   :  { %v618_v49 = vmax.f32 %v567_v42, 0.0  ;;  %v571_v52 = vpop.f32.mrb[7].mxu0  ;;  %1523 = vmatprep.subr.bf16.mxu0 %v1615_v38  ;;  %v620_v54 = vmax.f32 %v608_v45, 0.0  ;;  %v612_v56 = vpop.f32.mrb[7].mxu1  ;;  %1545 = vmatprep.subr.bf16.mxu1 %v1616_v41 }
 0x11c   :  { %v619_v55 = vmax.f32 %v569_v40, 0.0  ;;  %v621_v57 = vmax.f32 %v610_v50, 0.0 }
 0x11d   :  { %v628_v58 = vpack.c.bf16 %v620_v54, %v620_v54  ;;  %v626_v60 = vpack.c.bf16 %v618_v49, %v618_v49 }
 0x11e   :  { %v627_v59 = vpack.c.bf16 %v619_v55, %v619_v55  ;;  %1524 = vmatpush3.bf16.msra.mxu0 %v1617_v48  ;;  %v629_v61 = vpack.c.bf16 %v621_v57, %v621_v57  ;;  %1546 = vmatpush3.bf16.msra.mxu1 %v1618_v53 }
 0x120   :  { %1261 = vmatprep.mubr.bf16.mxu0 %v627_v59  ;;  %1301 = vmatprep.mubr.bf16.mxu1 %v629_v61 }
 0x121   :  { %1262 = vmatmul.mubr.bf16.vlgmr.msra.gmra.mrb[12].mxu0 %v626_v60  ;;  %1302 = vmatmul.mubr.bf16.vlgmr.msra.gmra.mrb[12].mxu1 %v628_v58 }
 0x1d4   :  { %v1481_v62 = vpop.f32.mrb[8].mxu0  ;;  %v1503_v63 = vpop.f32.mrb[8].mxu1 }
 0x1d5   :  { %v1482_v1 = vpop.f32.mrb[9].mxu0  ;;  %v1504_v3 = vpop.f32.mrb[9].mxu1 }
 0x1d6   :  { %v1483_v2 = vadd.f32 %v1482_v1, %v1481_v62  ;;  %v1484_v4 = vpop.f32.mrb[10].mxu0  ;;  %v1505_v5 = vadd.f32 %v1504_v3, %v1503_v63  ;;  %v1506_v6 = vpop.f32.mrb[10].mxu1 }
 0x1d7   :  { %v1485_v7 = vpop.f32.mrb[11].mxu0  ;;  %v1507_v10 = vpop.f32.mrb[11].mxu1 }
 0x1d8   :  { %v1184_v9 = vadd.f32 %v1483_v2, %v1400_v0 }
 0x1da   :  { %v1224_v11 = vadd.f32 %v1505_v5, %v1184_v9 }
 0x1f4   :  { %v1525_v13 = vpop.f32.mrb[12].mxu0  ;;  %v1547_v14 = vpop.f32.mrb[12].mxu1 }
 0x1f5   :  { %v1526_v15 = vpop.f32.mrb[13].mxu0  ;;  %v1548_v16 = vpop.f32.mrb[13].mxu1 }
 0x1f6   :  { %v1527_v12 = vadd.f32 %v1526_v15, %v1525_v13  ;;  %v1528_v17 = vpop.f32.mrb[14].mxu0  ;;  %v1549_v18 = vadd.f32 %v1548_v16, %v1547_v14  ;;  %v1550_v19 = vpop.f32.mrb[14].mxu1 }
 0x1f7   :  { %v1529_v20 = vpop.f32.mrb[15].mxu0  ;;  %v1551_v22 = vpop.f32.mrb[15].mxu1 }
 0x1f8   :  { %v1264_v21 = vadd.f32 %v1527_v12, %v1224_v11 }
 0x1fa   :  { %v1304_v23 = vadd.f32 %v1549_v18, %v1264_v21 }
 0x1fc   :  { %v1310_v24 = vsel %vm1309_vm0, %v1304_v23, -inf }
 0x1fd   :  { %1311 = vmax.xlane.f32.xlu0 %v1310_v24 }
 0x28a   :  { %v1312_v25 = vpop.xlane.xlu0 %1311 }
 0x28b   :  { %v1313_v26 = vsub.f32 %v1304_v23, %v1312_v25 }
 0x28d   :  { %v1314_v27 = vmul.f32 1.442695, %v1313_v26 }
 0x28f   :  { %1619 = vpow2.f32 %v1314_v27 }
 0x299   :  { %v1620_v28 = vpop.eup %1619 }
 0x29a   :  { %v1316_v29 = vsel %vm1309_vm0, %v1620_v28, 0.0 }
 0x29b   :  { %1317 = vadd.xlane.f32.xlu0 %v1316_v29 }
 0x328   :  { %v1318_v30 = vpop.xlane.xlu0 %1317 }
 0x329   :  { %1621 = vrcp.f32 %v1318_v30 }
 0x333   :  { %v1622_v31 = vpop.eup %1621 }
 0x334   :  { %v1320_v32 = vmul.f32 %v1622_v31, %v1620_v28 }
 0x336   :  { %1321 = vst.msk [vmem:[#allocation2] sm:$0x3] %vm1309_vm0, %v1320_v32 }
 0x337   :  { %1634 = shalt.err (!%p1631_p4)
}
 0x338   :  { %s1635_s18 = scalar_lea.hbm %s2122_s5, 32 }
 0x339   :  { %p1636_p5 = scmp.ne.s32.totalorder %s2122_s5, %s1635_s18  ;;  %p1639_p6 = scmp.lt.u32.totalorder %s1635_s18, %s2122_s5 }
 0x33b   :  { %p1641_p7 = pnand %p1639_p6, %p1636_p5 }
 0x33d   :  { %1644 = shalt.err (!%p1641_p7)
}
 0x33e   :  { %1331 = dma.vmem_to_hbm [thread:$0]  %s1329_s4, 32, %s2122_s5, [#allocation3]  }
 0x33f   :  { %1645 = dma.done.wait [#allocation3], 32  }
 0x340   :  { %1646 = vsyncadd [#allocation3], 4294967264 }
 0x341   :  { %1335 = vsyncpa [#allocation3], 1 }

// kernel: custom_efficientnet_forward.2
= control target key start
LH: loop header
LB: loop body
LE: loop exit
PB: predicated region body
PF: predicated region fallthrough
CT: control target
= control target key end

     0   :  { %s10428_s0 = inlined_call_operand.hbm [shape: bf16[2,17,17,12], index: 0, kind: input, shape index: {}]   ;;  %s10429_s1 = inlined_call_operand.hbm [shape: bf16[4,12,16], index: 1, kind: input, shape index: {}]   ;;  %s10430_s2 = inlined_call_operand.hbm [shape: f32[1,16], index: 2, kind: input, shape index: {}]   ;;  %s10431_s3 = inlined_call_operand.hbm [shape: bf16[16,64], index: 3, kind: input, shape index: {}]   ;;  %s10432_s4 = inlined_call_operand.hbm [shape: f32[1,64], index: 4, kind: input, shape index: {}]   ;;  %s10433_s5 = inlined_call_operand.hbm [shape: f32[9,64], index: 5, kind: input, shape index: {}]   ;;  %s10434_s6 = inlined_call_operand.hbm [shape: f32[1,64], index: 6, kind: input, shape index: {}]   ;;  %s10435_s7 = inlined_call_operand.hbm [shape: bf16[64,4], index: 7, kind: input, shape index: {}]   ;;  %s10436_s8 = inlined_call_operand.hbm [shape: f32[1,4], index: 8, kind: input, shape index: {}]   ;;  %s10437_s9 = inlined_call_operand.hbm [shape: bf16[4,64], index: 9, kind: input, shape index: {}]   ;;  %s10438_s10 = inlined_call_operand.hbm [shape: f32[1,64], index: 10, kind: input, shape index: {}]   ;;  %s10439_s11 = inlined_call_operand.hbm [shape: bf16[64,128], index: 11, kind: input, shape index: {}]   ;;  %s10440_s12 = inlined_call_operand.hbm [shape: f32[1,128], index: 12, kind: input, shape index: {}]   ;;  %s10441_s13 = inlined_call_operand.hbm [shape: f32[2,1,128], index: 13, kind: output, shape index: {}]  }
   0x1   :  { %10482 = sst [smem:[#allocation60_spill]] %s10428_s0 }
   0x2   :  { %10483 = sst [smem:[#allocation61_spill]] %s10429_s1 }
   0x3   :  { %10484 = sst [smem:[#allocation62_spill]] %s10430_s2 }
   0x4   :  { %10485 = sst [smem:[#allocation63_spill]] %s10431_s3 }
   0x5   :  { %10486 = sst [smem:[#allocation64_spill]] %s10432_s4 }
   0x6   :  { %10487 = sst [smem:[#allocation65_spill]] %s10433_s5 }
   0x7   :  { %10488 = sst [smem:[#allocation66_spill]] %s10441_s13 }
   0x8   :  { %18 = vsyncpa [#allocation4], 0 }
   0x9   :  { %20 = vsyncpa [#allocation4 + $0x1], 0 }
   0xa   :  { %21 = vsyncpa [#allocation7], 0 }
   0xb   :  { %22 = vsyncpa [#allocation10], 0 }
   0xc   :  { %23 = vsyncpa [#allocation13], 0 }
   0xd   :  { %24 = vsyncpa [#allocation16], 0 }
   0xe   :  { %25 = vsyncpa [#allocation19], 0 }
   0xf   :  { %26 = vsyncpa [#allocation22], 0 }
  0x10   :  { %27 = vsyncpa [#allocation5], 0 }
  0x11   :  { %29 = vsyncpa [#allocation5 + $0x1], 0  ;;  %s7891_s25 = smov 0   ;;  %s7893_s26 = smov 0  }
  0x12   :  { %s7895_s27 = smov 0   ;;  %s7897_s28 = smov 0  }
  0x13 LB: > { %10489 = sst [smem:[#allocation33_spill]] %s7787_s25  ;;  %s7801_s29 = smov [#allocation6]   ;;  %s7799_s28 = sphi %s7897_s28, %s10607_s28   ;;  %s7795_s27 = sphi %s7895_s27, %s10606_s27   ;;  %s7791_s26 = sphi %s7893_s26, %s10605_s26   ;;  %s7787_s25 = sphi %s7891_s25, %s10604_s25  }
  0x14   : > { %s356_s30 = sshll.u32 %s7801_s29, 4  ;;  %s7912_s14 = sadd.s32 4294967295, %s7799_s28   ;;  %s7917_s30 = int_to_ptr.vmem [resolvable:$true] %s356_s30 }
  0x15   : > { %10490 = sst [smem:[#allocation34_spill]] %s7912_s14  ;;  %p5702_p0 = scmp.ge.s32.totalorder %s7799_s28, 1 }
  0x16   : > { %p10452_p1 = scmp.eq.s32.totalorder %s7912_s14, 0  ;;  %p344_p2 = scmp.lt.s32.totalorder %s7799_s28, 3 }
  0x17   : > { %s7802_s16 = smov [#allocation9]   ;;  %s7803_s19 = smov [#allocation12]  }
  0x18   : > { %p7919_p3 = pnand %p5702_p0, %p344_p2  ;;  %s380_s17 = sshll.u32 %s7802_s16, 4  ;;  %s7932_s17 = int_to_ptr.vmem [resolvable:$true] %s380_s17 }
  0x19   : > { %s404_s20 = sshll.u32 %s7803_s19, 4  ;;  %s10494_s1 = sld [smem:[#allocation61_spill]]  ;;  %s7934_s20 = int_to_ptr.vmem [resolvable:$true] %s404_s20 }
  0x1a   : > { %s10491_s15 = scalar_select %p7919_p3, 1, 0 }
  0x1b   : > { %p6653_p5 = pneg %p7919_p3 }
  0x1c   : > { %10492 = sst [smem:[#allocation35_spill]] %s10491_s15 }
  0x1d   : > { %p7928_p6 = pnand %p6653_p5, %p10452_p1 }
  0x1f   : > { %s7343_s23 = scalar_lea.hbm %s10494_s1, 512  ;;  %p7944_p8 = pneg %p7928_p6 }
  0x20   : > { %p7344_p7 = scmp.ne.s32.totalorder %s10494_s1, %s7343_s23  ;;  %p7350_p11 = scmp.lt.u32.totalorder %s7343_s23, %s10494_s1 }
  0x22   : > { %p7346_p9 = pnand %p7944_p8, %p7344_p7 }
  0x24   : > { %p7347_p10 = pneg %p7346_p9 }
  0x26   : > { %p7352_p12 = pnand %p7350_p11, %p7347_p10 }
  0x28   : > { %7355 = shalt.err (!%p7352_p12)
}
  0x29   : > { %s7356_s21 = scalar_lea.vmem %s7917_s30, 512  ;;  %p7364_p5 = scmp.lt.s32.totalorder %s7917_s30, %s7917_s30 }
  0x2a   : > { %p7357_p13 = scmp.ne.s32.totalorder %s7917_s30, %s7356_s21  ;;  %p7365_p4 = scmp.lt.s32.totalorder %s7356_s21, %s7356_s21 }
  0x2c   : > { %p7359_p0 = pnand %p7357_p13, %p7944_p8  ;;  %p7366_p7 = por %p7365_p4, %p7364_p5 }
  0x2e   : > { %p7360_p2 = pneg %p7359_p0 }
  0x30   : > { %p7367_p9 = pnand %p7366_p7, %p7360_p2 }
  0x32   : > { %7370 = shalt.err (!%p7367_p9)
}
  0x33   : > { %s10448_s22 = smov 64   ;;  %s10450_s13 = smov 4  }
  0x34   : > { %6656 = dma.hbm_to_vmem [thread:$0]  (!%p7928_p6), %s10494_s1, 512, %s7917_s30, [#allocation7], %s10448_s22, %s10448_s22, %s10450_s13  }
  0x35   : > { %s10496_s3 = sld [smem:[#allocation63_spill]] }
  0x3b   : > { %s7371_s21 = scalar_lea.hbm %s10496_s3, 128 }
  0x3c   : > { %p7372_p4 = scmp.ne.s32.totalorder %s10496_s3, %s7371_s21  ;;  %p7378_p12 = scmp.lt.u32.totalorder %s7371_s21, %s10496_s3 }
  0x3e   : > { %p7374_p10 = pnand %p7372_p4, %p7944_p8 }
  0x40   : > { %p7375_p11 = pneg %p7374_p10 }
  0x42   : > { %p7380_p13 = pnand %p7378_p12, %p7375_p11 }
  0x44   : > { %7383 = shalt.err (!%p7380_p13)
}
  0x45   : > { %s7384_s30 = scalar_lea.vmem %s7932_s17, 128  ;;  %p7392_p7 = scmp.lt.s32.totalorder %s7932_s17, %s7932_s17 }
  0x46   : > { %p7385_p0 = scmp.ne.s32.totalorder %s7932_s17, %s7384_s30  ;;  %p7393_p9 = scmp.lt.s32.totalorder %s7384_s30, %s7384_s30 }
  0x48   : > { %p7387_p2 = pnand %p7385_p0, %p7944_p8  ;;  %p7394_p4 = por %p7393_p9, %p7392_p7 }
  0x4a   : > { %p7388_p5 = pneg %p7387_p2 }
  0x4c   : > { %p7395_p10 = pnand %p7394_p4, %p7388_p5 }
  0x4e   : > { %7398 = shalt.err (!%p7395_p10)
}
  0x4f   : > { %6662 = dma.hbm_to_vmem [thread:$0]  (!%p7928_p6), %s10496_s3, 128, %s7932_s17, [#allocation10], %s10448_s22, %s10448_s22, %s10450_s13  }
  0x50   : > { %s10497_s5 = sld [smem:[#allocation65_spill]] }
  0x56   : > { %s7399_s23 = scalar_lea.hbm %s10497_s5, 256 }
  0x57   : > { %p7400_p11 = scmp.ne.s32.totalorder %s10497_s5, %s7399_s23  ;;  %p7406_p0 = scmp.lt.u32.totalorder %s7399_s23, %s10497_s5 }
  0x59   : > { %p7402_p12 = pnand %p7400_p11, %p7944_p8 }
  0x5b   : > { %p7403_p13 = pneg %p7402_p12 }
  0x5d   : > { %p7408_p2 = pnand %p7406_p0, %p7403_p13 }
  0x5f   : > { %7411 = shalt.err (!%p7408_p2)
}
  0x60   : > { %s7412_s17 = scalar_lea.vmem %s7934_s20, 256  ;;  %p7420_p4 = scmp.lt.s32.totalorder %s7934_s20, %s7934_s20 }
  0x61   : > { %p7413_p5 = scmp.ne.s32.totalorder %s7934_s20, %s7412_s17  ;;  %p7421_p10 = scmp.lt.s32.totalorder %s7412_s17, %s7412_s17 }
  0x63   : > { %p7415_p7 = pnand %p7413_p5, %p7944_p8  ;;  %p7422_p11 = por %p7421_p10, %p7420_p4 }
  0x65   : > { %p7416_p9 = pneg %p7415_p7 }
  0x67   : > { %p7423_p12 = pnand %p7422_p11, %p7416_p9 }
  0x69   : > { %7426 = shalt.err (!%p7423_p12)
}
  0x6a   : > { %s7806_s30 = smov 128   ;;  %s7807_s0 = smov 8  }
  0x6b   : > { %6668 = dma.hbm_to_vmem [thread:$0]  (!%p7928_p6), %s10497_s5, 256, %s7934_s20, [#allocation13], %s7806_s30, %s7806_s30, %s7807_s0  }
  0x6c   : > { %s7808_s15 = smov [#allocation15]   ;;  %s7809_s24 = smov [#allocation18]  }
  0x6d   : > { %s428_s23 = sshll.u32 %s7808_s15, 4  ;;  %s453_s29 = sshll.u32 %s7809_s24, 4  ;;  %s429_s23 = int_to_ptr.vmem [resolvable:$true] %s428_s23  ;;  %s454_s29 = int_to_ptr.vmem [resolvable:$true] %s453_s29 }
  0x6e   : > { %s7427_s17 = scalar_lea.hbm %s10435_s7, 512 }
  0x6f   : > { %p7428_p13 = scmp.ne.s32.totalorder %s10435_s7, %s7427_s17  ;;  %p7434_p5 = scmp.lt.u32.totalorder %s7427_s17, %s10435_s7 }
  0x71   : > { %p7430_p0 = pnand %p7428_p13, %p7944_p8 }
  0x73   : > { %p7431_p2 = pneg %p7430_p0 }
  0x75   : > { %p7436_p7 = pnand %p7434_p5, %p7431_p2 }
  0x77   : > { %7439 = shalt.err (!%p7436_p7)
}
  0x78   : > { %s7440_s20 = scalar_lea.vmem %s429_s23, 512  ;;  %p7448_p11 = scmp.lt.s32.totalorder %s429_s23, %s429_s23 }
  0x79   : > { %p7441_p9 = scmp.ne.s32.totalorder %s429_s23, %s7440_s20  ;;  %p7449_p12 = scmp.lt.s32.totalorder %s7440_s20, %s7440_s20 }
  0x7b   : > { %p7443_p4 = pnand %p7441_p9, %p7944_p8  ;;  %p7450_p1 = por %p7449_p12, %p7448_p11 }
  0x7d   : > { %p7444_p10 = pneg %p7443_p4 }
  0x7f   : > { %p7451_p3 = pnand %p7450_p1, %p7444_p10 }
  0x81   : > { %7454 = shalt.err (!%p7451_p3)
}
  0x82   : > { %s10498_s22 = smov 4   ;;  %s10499_s13 = smov 64  }
  0x83   : > { %6674 = dma.hbm_to_vmem [thread:$0]  (!%p7928_p6), %s10435_s7, 512, %s429_s23, [#allocation16], %s10499_s13, %s10499_s13, %s10498_s22  }
  0x84   : > { %s7455_s25 = scalar_lea.hbm %s10437_s9, 32 }
  0x85   : > { %p7456_p1 = scmp.ne.s32.totalorder %s10437_s9, %s7455_s25  ;;  %p7462_p0 = scmp.lt.u32.totalorder %s7455_s25, %s10437_s9 }
  0x87   : > { %p7458_p3 = pnand %p7456_p1, %p7944_p8 }
  0x89   : > { %p7459_p13 = pneg %p7458_p3 }
  0x8b   : > { %p7464_p2 = pnand %p7462_p0, %p7459_p13 }
  0x8d   : > { %7467 = shalt.err (!%p7464_p2)
}
  0x8e   : > { %s7468_s21 = scalar_lea.vmem %s454_s29, 32  ;;  %p7476_p4 = scmp.lt.s32.totalorder %s454_s29, %s454_s29 }
  0x8f   : > { %p7469_p5 = scmp.ne.s32.totalorder %s454_s29, %s7468_s21  ;;  %p7477_p10 = scmp.lt.s32.totalorder %s7468_s21, %s7468_s21 }
  0x91   : > { %p7471_p7 = pnand %p7469_p5, %p7944_p8  ;;  %p7478_p11 = por %p7477_p10, %p7476_p4 }
  0x93   : > { %p7472_p9 = pneg %p7471_p7 }
  0x95   : > { %p7479_p12 = pnand %p7478_p11, %p7472_p9 }
  0x97   : > { %7482 = shalt.err (!%p7479_p12)
}
  0x98   : > { %6680 = dma.hbm_to_vmem [thread:$0]  (!%p7928_p6), %s10437_s9, 32, %s454_s29, [#allocation19]  }
  0x99   : > { %s7810_s20 = smov [#allocation21]   ;;  %s7811_s3 = smov [#allocation8]  }
  0x9a   : > { %s474_s1 = sshll.u32 %s7810_s20, 4  ;;  %s370_s30 = sshll.u32 %s7811_s3, 4  ;;  %s475_s1 = int_to_ptr.vmem [resolvable:$true] %s474_s1  ;;  %s371_s30 = int_to_ptr.vmem [resolvable:$true] %s370_s30 }
  0x9b   : > { %s7483_s14 = scalar_lea.hbm %s10439_s11, 512 }
  0x9c   : > { %p7484_p1 = scmp.ne.s32.totalorder %s10439_s11, %s7483_s14  ;;  %p7490_p0 = scmp.lt.u32.totalorder %s7483_s14, %s10439_s11 }
  0x9e   : > { %p7486_p3 = pnand %p7484_p1, %p7944_p8 }
  0xa0   : > { %p7487_p13 = pneg %p7486_p3 }
  0xa2   : > { %p7492_p2 = pnand %p7490_p0, %p7487_p13 }
  0xa4   : > { %7495 = shalt.err (!%p7492_p2)
}
  0xa5   : > { %s7496_s29 = scalar_lea.vmem %s475_s1, 512  ;;  %p7504_p4 = scmp.lt.s32.totalorder %s475_s1, %s475_s1 }
  0xa6   : > { %p7497_p5 = scmp.ne.s32.totalorder %s475_s1, %s7496_s29  ;;  %p7505_p10 = scmp.lt.s32.totalorder %s7496_s29, %s7496_s29 }
  0xa8   : > { %p7499_p7 = pnand %p7497_p5, %p7944_p8  ;;  %p7506_p11 = por %p7505_p10, %p7504_p4 }
  0xaa   : > { %p7500_p9 = pneg %p7499_p7 }
  0xac   : > { %p7507_p12 = pnand %p7506_p11, %p7500_p9 }
  0xae   : > { %7510 = shalt.err (!%p7507_p12)
}
  0xaf   : > { %6686 = dma.hbm_to_vmem [thread:$0]  (!%p7928_p6), %s10439_s11, 512, %s475_s1, [#allocation22], %s10499_s13, %s10499_s13, %s10498_s22  }
  0xb0   : > { %s10500_s2 = sld [smem:[#allocation62_spill]] }
  0xb6   : > { %s7511_s0 = scalar_lea.hbm %s10500_s2, 16 }
  0xb7   : > { %p7512_p1 = scmp.ne.s32.totalorder %s10500_s2, %s7511_s0  ;;  %p7518_p0 = scmp.lt.u32.totalorder %s7511_s0, %s10500_s2 }
  0xb9   : > { %p7514_p3 = pnand %p7512_p1, %p7944_p8 }
  0xbb   : > { %p7515_p13 = pneg %p7514_p3 }
  0xbd   : > { %p7520_p2 = pnand %p7518_p0, %p7515_p13 }
  0xbf   : > { %7523 = shalt.err (!%p7520_p2)
}
  0xc0   : > { %s7524_s19 = scalar_lea.vmem %s371_s30, 16  ;;  %s7531_s1 = scalar_lea.vmem %s371_s30, 32 }
  0xc1   : > { %p7525_p5 = scmp.ne.s32.totalorder %s371_s30, %s7524_s19  ;;  %p7532_p4 = scmp.lt.s32.totalorder %s371_s30, %s371_s30 }
  0xc2   : > { %p7533_p10 = scmp.lt.s32.totalorder %s7531_s1, %s7524_s19 }
  0xc3   : > { %p7527_p7 = pnand %p7525_p5, %p7944_p8 }
  0xc4   : > { %p7534_p11 = por %p7533_p10, %p7532_p4 }
  0xc5   : > { %p7528_p9 = pneg %p7527_p7 }
  0xc7   : > { %p7535_p12 = pnand %p7534_p11, %p7528_p9 }
  0xc9   : > { %7538 = shalt.err (!%p7535_p12)
}
  0xca   : > { %6659 = dma.hbm_to_vmem [thread:$0]  (!%p7928_p6), %s10500_s2, 16, %s371_s30, [#allocation7]  }
  0xcb   : > { %s7812_s23 = smov [#allocation11]   ;;  %s7813_s20 = smov [#allocation14]  }
  0xcc   : > { %s394_s17 = sshll.u32 %s7812_s23, 4  ;;  %s418_s3 = sshll.u32 %s7813_s20, 4  ;;  %s395_s17 = int_to_ptr.vmem [resolvable:$true] %s394_s17  ;;  %s419_s3 = int_to_ptr.vmem [resolvable:$true] %s418_s3 }
  0xcd   : > { %s10501_s4 = sld [smem:[#allocation64_spill]] }
  0xd3   : > { %s7539_s14 = scalar_lea.hbm %s10501_s4, 16 }
  0xd4   : > { %p7540_p1 = scmp.ne.s32.totalorder %s10501_s4, %s7539_s14  ;;  %p7546_p0 = scmp.lt.u32.totalorder %s7539_s14, %s10501_s4 }
  0xd6   : > { %p7542_p3 = pnand %p7540_p1, %p7944_p8 }
  0xd8   : > { %p7543_p13 = pneg %p7542_p3 }
  0xda   : > { %p7548_p2 = pnand %p7546_p0, %p7543_p13 }
  0xdc   : > { %7551 = shalt.err (!%p7548_p2)
}
  0xdd   : > { %s7552_s30 = scalar_lea.vmem %s395_s17, 16  ;;  %s7559_s21 = scalar_lea.vmem %s395_s17, 32 }
  0xde   : > { %p7553_p5 = scmp.ne.s32.totalorder %s395_s17, %s7552_s30  ;;  %p7560_p4 = scmp.lt.s32.totalorder %s395_s17, %s395_s17 }
  0xdf   : > { %p7561_p10 = scmp.lt.s32.totalorder %s7559_s21, %s7552_s30 }
  0xe0   : > { %p7555_p7 = pnand %p7553_p5, %p7944_p8 }
  0xe1   : > { %p7562_p11 = por %p7561_p10, %p7560_p4 }
  0xe2   : > { %p7556_p9 = pneg %p7555_p7 }
  0xe4   : > { %p7563_p12 = pnand %p7562_p11, %p7556_p9 }
  0xe6   : > { %7566 = shalt.err (!%p7563_p12)
}
  0xe7   : > { %6665 = dma.hbm_to_vmem [thread:$0]  (!%p7928_p6), %s10501_s4, 16, %s395_s17, [#allocation10]  }
  0xe8   : > { %s7567_s25 = scalar_lea.hbm %s10434_s6, 16 }
  0xe9   : > { %p7568_p1 = scmp.ne.s32.totalorder %s10434_s6, %s7567_s25  ;;  %p7574_p0 = scmp.lt.u32.totalorder %s7567_s25, %s10434_s6 }
  0xeb   : > { %p7570_p3 = pnand %p7568_p1, %p7944_p8 }
  0xed   : > { %p7571_p13 = pneg %p7570_p3 }
  0xef   : > { %p7576_p2 = pnand %p7574_p0, %p7571_p13 }
  0xf1   : > { %7579 = shalt.err (!%p7576_p2)
}
  0xf2   : > { %s7580_s1 = scalar_lea.vmem %s419_s3, 16  ;;  %s7587_s17 = scalar_lea.vmem %s419_s3, 32 }
  0xf3   : > { %p7581_p5 = scmp.ne.s32.totalorder %s419_s3, %s7580_s1  ;;  %p7588_p4 = scmp.lt.s32.totalorder %s419_s3, %s419_s3 }
  0xf4   : > { %p7589_p10 = scmp.lt.s32.totalorder %s7587_s17, %s7580_s1 }
  0xf5   : > { %p7583_p7 = pnand %p7581_p5, %p7944_p8 }
  0xf6   : > { %p7590_p11 = por %p7589_p10, %p7588_p4 }
  0xf7   : > { %p7584_p9 = pneg %p7583_p7 }
  0xf9   : > { %p7591_p12 = pnand %p7590_p11, %p7584_p9 }
  0xfb   : > { %7594 = shalt.err (!%p7591_p12)
}
  0xfc   : > { %6671 = dma.hbm_to_vmem [thread:$0]  (!%p7928_p6), %s10434_s6, 16, %s419_s3, [#allocation13]  }
  0xfd   : > { %s7814_s29 = smov [#allocation17]   ;;  %s7815_s20 = smov [#allocation20]  }
  0xfe   : > { %s442_s23 = sshll.u32 %s7814_s29, 4  ;;  %s464_s0 = sshll.u32 %s7815_s20, 4  ;;  %s443_s23 = int_to_ptr.vmem [resolvable:$true] %s442_s23  ;;  %s465_s0 = int_to_ptr.vmem [resolvable:$true] %s464_s0 }
  0xff   : > { %s7595_s15 = scalar_lea.hbm %s10436_s8, 16 }
 0x100   : > { %p7596_p1 = scmp.ne.s32.totalorder %s10436_s8, %s7595_s15  ;;  %p7602_p0 = scmp.lt.u32.totalorder %s7595_s15, %s10436_s8 }
 0x102   : > { %p7598_p3 = pnand %p7596_p1, %p7944_p8 }
 0x104   : > { %p7599_p13 = pneg %p7598_p3 }
 0x106   : > { %p7604_p2 = pnand %p7602_p0, %p7599_p13 }
 0x108   : > { %7607 = shalt.err (!%p7604_p2)
}
 0x109   : > { %s7608_s3 = scalar_lea.vmem %s443_s23, 16  ;;  %s7615_s30 = scalar_lea.vmem %s443_s23, 32 }
 0x10a   : > { %p7609_p5 = scmp.ne.s32.totalorder %s443_s23, %s7608_s3  ;;  %p7616_p4 = scmp.lt.s32.totalorder %s443_s23, %s443_s23 }
 0x10b   : > { %p7617_p10 = scmp.lt.s32.totalorder %s7615_s30, %s7608_s3 }
 0x10c   : > { %p7611_p7 = pnand %p7609_p5, %p7944_p8 }
 0x10d   : > { %p7618_p11 = por %p7617_p10, %p7616_p4 }
 0x10e   : > { %p7612_p9 = pneg %p7611_p7 }
 0x110   : > { %p7619_p12 = pnand %p7618_p11, %p7612_p9 }
 0x112   : > { %7622 = shalt.err (!%p7619_p12)
}
 0x113   : > { %6677 = dma.hbm_to_vmem [thread:$0]  (!%p7928_p6), %s10436_s8, 16, %s443_s23, [#allocation16]  }
 0x114   : > { %s7623_s14 = scalar_lea.hbm %s10438_s10, 16 }
 0x115   : > { %p7624_p1 = scmp.ne.s32.totalorder %s10438_s10, %s7623_s14  ;;  %p7630_p0 = scmp.lt.u32.totalorder %s7623_s14, %s10438_s10 }
 0x117   : > { %p7626_p3 = pnand %p7624_p1, %p7944_p8 }
 0x119   : > { %p7627_p13 = pneg %p7626_p3 }
 0x11b   : > { %p7632_p2 = pnand %p7630_p0, %p7627_p13 }
 0x11d   : > { %7635 = shalt.err (!%p7632_p2)
}
 0x11e   : > { %s7636_s17 = scalar_lea.vmem %s465_s0, 16  ;;  %s7643_s23 = scalar_lea.vmem %s465_s0, 32 }
 0x11f   : > { %p7637_p5 = scmp.ne.s32.totalorder %s465_s0, %s7636_s17  ;;  %p7644_p4 = scmp.lt.s32.totalorder %s465_s0, %s465_s0 }
 0x120   : > { %p7645_p10 = scmp.lt.s32.totalorder %s7643_s23, %s7636_s17 }
 0x121   : > { %p7639_p7 = pnand %p7637_p5, %p7944_p8 }
 0x122   : > { %p7646_p11 = por %p7645_p10, %p7644_p4 }
 0x123   : > { %p7640_p9 = pneg %p7639_p7 }
 0x125   : > { %p7647_p12 = pnand %p7646_p11, %p7640_p9 }
 0x127   : > { %7650 = shalt.err (!%p7647_p12)
}
 0x128   : > { %6683 = dma.hbm_to_vmem [thread:$0]  (!%p7928_p6), %s10438_s10, 16, %s465_s0, [#allocation19]  }
 0x129   : > { %s7816_s21 = smov [#allocation23]   ;;  %s7651_s14 = scalar_lea.hbm %s10440_s12, 16 }
 0x12a   : > { %s488_s29 = sshll.u32 %s7816_s21, 4  ;;  %p7652_p1 = scmp.ne.s32.totalorder %s10440_s12, %s7651_s14  ;;  %s489_s29 = int_to_ptr.vmem [resolvable:$true] %s488_s29 }
 0x12b   : > { %p7658_p0 = scmp.lt.u32.totalorder %s7651_s14, %s10440_s12 }
 0x12c   : > { %p7654_p3 = pnand %p7652_p1, %p7944_p8 }
 0x12e   : > { %p7655_p13 = pneg %p7654_p3 }
 0x130   : > { %p7660_p2 = pnand %p7658_p0, %p7655_p13 }
 0x132   : > { %7663 = shalt.err (!%p7660_p2)
}
 0x133   : > { %s7664_s0 = scalar_lea.vmem %s489_s29, 16  ;;  %s7671_s17 = scalar_lea.vmem %s489_s29, 32 }
 0x134   : > { %p7665_p5 = scmp.ne.s32.totalorder %s489_s29, %s7664_s0  ;;  %p7672_p4 = scmp.lt.s32.totalorder %s489_s29, %s489_s29 }
 0x135   : > { %p7673_p10 = scmp.lt.s32.totalorder %s7671_s17, %s7664_s0 }
 0x136   : > { %p7667_p7 = pnand %p7665_p5, %p7944_p8 }
 0x137   : > { %p7674_p11 = por %p7673_p10, %p7672_p4 }
 0x138   : > { %p7668_p9 = pneg %p7667_p7 }
 0x13a   : > { %p7675_p12 = pnand %p7674_p11, %p7668_p9 }
 0x13c   : > { %7678 = shalt.err (!%p7675_p12)
}
 0x13d   : > { %s10502_s16 = sld [smem:[#allocation33_spill]]  ;;  %s10503_s30 = sld [smem:[#allocation34_spill]] }
 0x13e   : > { %6689 = dma.hbm_to_vmem [thread:$0]  (!%p7928_p6), %s10440_s12, 16, %s489_s29, [#allocation22]  }
 0x13f   : > { %s5701_s21 = sadd.s32 4294967294, %s7799_s28   ;;  %s8187_s18 = sadd.s32 1, %s7799_s28  }
 0x140   : > { %s39_s20 = ssub.s32 %s7799_s28, %s8187_s18  ;;  %s42_s25 = sadd.s32 1, %s7795_s27 }
 0x141   : > { %p40_p8 = scmp.eq.s32.totalorder %s39_s20, 0  ;;  %p49_p1 = scmp.ne.s32.totalorder %s7795_s27, %s7791_s26 }
 0x142   : > { %p50_p3 = scmp.eq.s32.totalorder %s7799_s28, 0  ;;  %p337_p7 = scmp.eq.s32.totalorder %s5701_s21, 1 }
 0x143   : > { %p55_p13 = scmp.ne.s32.totalorder %s7791_s26, %s10502_s16  ;;  %p10504_p2 = scmp.eq.s32.totalorder %s10503_s30, 0 }
 0x144   : > { %s8198_s14 = scalar_select %p40_p8, %s7795_s27, %s42_s25  }
 0x145   : > { %p51_p0 = por %p50_p3, %p49_p1  ;;  %p8202_p5 = por %p10504_p2, %p55_p13 }
 0x146   : > { %p331_p6 = scmp.eq.s32.totalorder %s10503_s30, 1  ;;  %p6710_p9 = scmp.lt.s32.totalorder %s7799_s28, 2 }
 0x147   : > { %s499_s29 = sand.u32 1, %s7795_s27   ;;  %p8213_p10 = por %p337_p7, %p55_p13 }
 0x148   : > { %p8209_p4 = por %p331_p6, %p49_p1  ;;  %s6598_s1 = smul.u32 204, %s499_s29 }
 0x149   : > { %s10507_s19 = scalar_select %p8213_p10, 1, 0 }
 0x14a   : > { %s10506_s24 = scalar_select %p8209_p4, 1, 0 }
 0x14b   : > { %s6599_s0 = smul.u32 3264, %s7799_s28  ;;  %p8218_p11 = pnand %p6710_p9, %p51_p0 }
 0x14c   : > { %s10509_s16 = sld [smem:[#allocation60_spill]]  ;;  %s503_s21 = scalar_lea.vmem [#allocation3], %s6598_s1 }
 0x14d   : > { %s510_s20 = sshll.u32 %s503_s21, 4  ;;  %s8229_s25 = scalar_lea.sflag [#allocation4], %s499_s29  ;;  %s8227_s20 = int_to_ptr.vmem [resolvable:$true] %s510_s20 }
 0x14e   : > { %p7681_p8 = pneg %p8218_p11 }
 0x152   : > { %s8225_s30 = scalar_lea.hbm %s10509_s16, %s6599_s0  ;;  %s7684_s3 = scalar_lea.hbm %s10509_s16, 6528 }
 0x153   : > { %s7679_s2 = scalar_lea.hbm %s8225_s30, 3264  ;;  %p7685_p13 = scmp.lt.u32.totalorder %s8225_s30, %s10509_s16 }
 0x154   : > { %p7680_p12 = scmp.ne.s32.totalorder %s8225_s30, %s7679_s2  ;;  %p7686_p0 = scmp.lt.u32.totalorder %s7684_s3, %s7679_s2 }
 0x155   : > { %p7688_p6 = scmp.lt.u32.totalorder %s7679_s2, %s8225_s30 }
 0x156   : > { %p7682_p1 = pnand %p7681_p8, %p7680_p12  ;;  %p7687_p2 = por %p7686_p0, %p7685_p13 }
 0x158   : > { %p7683_p3 = pneg %p7682_p1  ;;  %p7689_p7 = por %p7688_p6, %p7687_p2 }
 0x15a   : > { %p7690_p9 = pnand %p7689_p7, %p7683_p3 }
 0x15c   : > { %7693 = shalt.err (!%p7690_p9)
}
 0x15d   : > { %s7694_s29 = scalar_lea.vmem %s8227_s20, 3264  ;;  %s7817_s1 = smov [#allocation3]  }
 0x15e   : > { %p7695_p12 = scmp.ne.s32.totalorder %s8227_s20, %s7694_s29  ;;  %s7699_s21 = sshll.u32 %s7817_s1, 4  ;;  %s7700_s21 = int_to_ptr.vmem [resolvable:$false] %s7699_s21 }
 0x15f   : > { %s7701_s4 = scalar_lea.vmem %s7700_s21, 6528  ;;  %p7702_p4 = scmp.lt.s32.totalorder %s8227_s20, %s7700_s21 }
 0x160   : > { %p7697_p1 = pnand %p7695_p12, %p7681_p8  ;;  %p7703_p13 = scmp.lt.s32.totalorder %s7701_s4, %s7694_s29 }
 0x162   : > { %p7698_p10 = pneg %p7697_p1  ;;  %p7704_p0 = por %p7703_p13, %p7702_p4 }
 0x164   : > { %p7705_p2 = pnand %p7704_p0, %p7698_p10 }
 0x166   : > { %7708 = shalt.err (!%p7705_p2)
}
 0x167   : > { %6693 = dma.hbm_to_vmem [thread:$0]  (!%p8218_p11), %s8225_s30, 3264, %s8227_s20, %s8229_s25, %s10499_s13, %s10499_s13, %s10498_s22  }
 0x168   : > { %s10510_s2 = sld [smem:[#allocation35_spill]] }
 0x16e   : > { %p10511_p8 = scmp.ne.s32.totalorder %s10510_s2, 0 }
 0x170   : > { %522 = sbr.rel (%p10511_p8) target bundleno = 2154 (0x86a), region = 72 }
 0x177   : > { %s8263_s5 = sand.u32 1, %s7791_s26  }
 0x178   : > { %s6600_s0 = smul.u32 204, %s8263_s5  ;;  %s525_s23 = scalar_lea.sflag [#allocation4], %s8263_s5 }
 0x17a   : > { %s8267_s3 = scalar_lea.vmem [#allocation3], %s6600_s0 }
 0x17b   : > { %7754 = dma.done.wait (%p8202_p5), %s525_s23, 3264  }
 0x17c   : > { %7756 = vsyncadd (%p8202_p5), %s525_s23, 4294964032  ;;  %s10512_s17 = sld [smem:[#allocation34_spill]] }
 0x182   : > { %p10513_p4 = scmp.eq.s32.totalorder %s10512_s17, 0 }
 0x184   : > { %7758 = dma.done.wait (%p10513_p4), [#allocation7], 528   ;;  %p10514_p10 = pmov %p10513_p4 }
 0x185   : > { %p10515_p11 = pmov %p10513_p4 }
 0x186   : > { %7760 = vsyncadd (%p10514_p10), [#allocation7], 4294966768 }
 0x187   : > { %7762 = dma.done.wait (%p10515_p11), [#allocation10], 144   ;;  %p10516_p3 = pmov %p10513_p4 }
 0x189   : > { %7764 = vsyncadd (%p10516_p3), [#allocation10], 4294967152  ;;  %p10517_p6 = pmov %p10516_p3 }
 0x18a   : > { %p10518_p7 = pmov %p10516_p3 }
 0x18b   : > { %7766 = dma.done.wait (%p10517_p6), [#allocation13], 272  }
 0x18c   : > { %7768 = vsyncadd (%p10518_p7), [#allocation13], 4294967024  ;;  %p10519_p5 = pmov %p10516_p3 }
 0x18d   : > { %p10520_p9 = pmov %p10516_p3 }
 0x18e   : > { %7770 = dma.done.wait (%p10519_p5), [#allocation16], 528  }
 0x18f   : > { %7772 = vsyncadd (%p10520_p9), [#allocation16], 4294966768  ;;  %p10521_p12 = pmov %p10516_p3 }
 0x190   : > { %p10522_p1 = pmov %p10516_p3 }
 0x191   : > { %7774 = dma.done.wait (%p10521_p12), [#allocation19], 48  }
 0x192   : > { %7776 = vsyncadd (%p10522_p1), [#allocation19], 4294967248  ;;  %p10523_p13 = pmov %p10522_p1 }
 0x193   : > { %p10524_p0 = pmov %p10522_p1 }
 0x194   : > { %7778 = dma.done.wait (%p10523_p13), [#allocation22], 528  }
 0x195   : > { %7780 = vsyncadd (%p10524_p0), [#allocation22], 4294966768  ;;  %vm794_vm0 = vcmask 1045504   ;;  %vm745_vm1 = vcmask 97280   ;;  %vm1039_vm2 = vsmask.f32 3328 }
 0x196   : > { %vm1040_vm3 = vsmask.f32 7440  ;;  %v6774_v0 = vld [vmem:[#allocation6] sm:$0x3f]   ;;  %v6775_v1 = vld [vmem:[%s8267_s3] sm:$0xff]   ;;  %vm3078_vm5 = vcmask 130048  }
 0x197   : > { %6593 = vmatprep.subr.msk.bf16.mxu0 %vm794_vm0, %v6774_v0  ;;  %v796_v2 = vsel %vm794_vm0, %v6774_v0, 0  ;;  %v6776_v3 = vld [vmem:[%s8267_s3 + $0xc] sm:$0xff]   ;;  %6594 = vmatprep.subr.msk.bf16.mxu1 %vm794_vm0, %v6774_v0  ;;  %v6777_v4 = vld [vmem:[#allocation6 + $0x8] sm:$0x3f]   ;;  %v993_v7 = vld [vmem:[%s8267_s3 + $0x8] sm:$0x1] }
 0x198   : > { %6236 = vmatpush3.bf16.msra.mxu0 %v796_v2  ;;  %6237 = vmatprep.mubr.msk.bf16.mxu0 %vm745_vm1, %v6775_v1  ;;  %v991_v5 = vld [vmem:[%s8267_s3] sm:$0xf]  ;;  %v992_v6 = vld [vmem:[%s8267_s3 + $0x4] sm:$0xf]  ;;  %v1531_v8 = vsel %vm794_vm0, %v6777_v4, 0  ;;  %v1062_v14 = vshll.u32 %v993_v7, 16  ;;  %vm8314_vm4 = vmor %vm1039_vm2, %vm1040_vm3 }
 0x199   : > { %6464 = vmatpush3.bf16.msra.mxu1 %v796_v2  ;;  %6595 = vmatprep.subr.msk.bf16.mxu0 %vm794_vm0, %v6777_v4  ;;  %v1043_v9 = vshrl.u32 %v991_v5, 16  ;;  %v1046_v10 = vshll.u32 %v991_v5, 16  ;;  %v1052_v11 = vshll.u32 %v992_v6, 16  ;;  %v994_v12 = vld [vmem:[%s8267_s3 + $0xc] sm:$0xf]  ;;  %v1056_v13 = vshrl.u32 %v992_v6, 16 }
 0x19a   : > { %v995_v15 = vld [vmem:[%s8267_s3 + $0x10] sm:$0xf]  ;;  %v996_v16 = vld [vmem:[%s8267_s3 + $0x14] sm:$0x1]  ;;  %v1067_v20 = vshrl.u32 %v994_v12, 16  ;;  %v1064_v22 = vrot.slane %v1062_v14, 5 }
 0x19b   : > { %6238 = vmatmul.mubr.msk.bf16.vlgmr.msra.gmra.mrb[0].mxu0 %vm745_vm1, %v6776_v3  ;;  %v1045_v17 = vrot.slane %v1043_v9, 4  ;;  %v1048_v18 = vrot.slane %v1046_v10, 5  ;;  %v1054_v19 = vrot.slane %v1052_v11, 5  ;;  %v1058_v21 = vrot.slane %v1056_v13, 4  ;;  %v6778_v29 = vld [vmem:[#allocation6 + $0x10] sm:$0x3f]  }
 0x19c   : > { %6270 = vmatpush3.bf16.msra.mxu0 %v1531_v8  ;;  %v1070_v23 = vshll.u32 %v994_v12, 16  ;;  %v1076_v24 = vshll.u32 %v995_v15, 16  ;;  %v1069_v26 = vrot.slane %v1067_v20, 4  ;;  %v1080_v27 = vshrl.u32 %v995_v15, 16  ;;  %v997_v34 = vld [vmem:[%s8267_s3 + $0x18] sm:$0xf] }
 0x19d   : > { %v1049_v25 = vor.u32 %v1048_v18, %v1045_v17  ;;  %v1086_v28 = vshll.u32 %v996_v16, 16  ;;  %v1059_v31 = vor.u32 %v1058_v21, %v1054_v19  ;;  %v998_v35 = vld [vmem:[%s8267_s3 + $0x1c] sm:$0xf]  ;;  %6596 = vmatprep.subr.msk.bf16.mxu0 %vm794_vm0, %v6778_v29  ;;  %v1896_v39 = vsel %vm794_vm0, %v6778_v29, 0  ;;  %v999_v46 = vld [vmem:[%s8267_s3 + $0x20] sm:$0x1] }
 0x19e   : > { %v1072_v32 = vrot.slane %v1070_v23, 5  ;;  %v1078_v33 = vrot.slane %v1076_v24, 5  ;;  %v1082_v37 = vrot.slane %v1080_v27, 4  ;;  %v1091_v42 = vshrl.u32 %v997_v34, 16  ;;  %v1000_v49 = vld [vmem:[%s8267_s3 + $0x24] sm:$0xf] }
 0x19f   : > { %v1050_v36 = vrot.slane %v1049_v25, 4  ;;  %v1088_v38 = vrot.slane %v1086_v28, 5  ;;  %v1060_v40 = vrot.slane %v1059_v31, 4  ;;  %v1094_v43 = vshll.u32 %v997_v34, 16  ;;  %v1001_v54 = vld [vmem:[%s8267_s3 + $0x28] sm:$0xf] }
 0x1a0   : > { %v1073_v41 = vor.u32 %v1072_v32, %v1069_v26  ;;  %v1083_v45 = vor.u32 %v1082_v37, %v1078_v33  ;;  %v1100_v47 = vshll.u32 %v998_v35, 16  ;;  %v1104_v48 = vshrl.u32 %v998_v35, 16  ;;  %v1002_v1 = vld [vmem:[%s8267_s3 + $0x2c] sm:$0x1]  ;;  %v1003_v4 = vld [vmem:[%s8267_s3 + $0x30] sm:$0xf] }
 0x1a1   : > { %v1055_v44 = vsel %vm8314_vm4, %v1050_v36, %v1054_v19  ;;  %v1065_v50 = vsel %vm8314_vm4, %v1060_v40, %v1064_v22  ;;  %v1093_v52 = vrot.slane %v1091_v42, 4  ;;  %v1096_v53 = vrot.slane %v1094_v43, 5  ;;  %v1004_v9 = vld [vmem:[%s8267_s3 + $0x34] sm:$0xf]  ;;  %v1005_v21 = vld [vmem:[%s8267_s3 + $0x38] sm:$0x1] }
 0x1a2   : > { %v1074_v51 = vrot.slane %v1073_v41, 4  ;;  %v5764_v55 = vcombine.low %v1055_v44, %v1065_v50  ;;  %v1084_v56 = vrot.slane %v1083_v45, 4  ;;  %v1102_v57 = vrot.slane %v1100_v47, 5  ;;  %v1006_v23 = vld [vmem:[%s8267_s3 + $0x3c] sm:$0xf]  ;;  %s6120_s22 = sshll.u32 %s10512_s17, 4 }
 0x1a3   : > { %v1106_v58 = vrot.slane %v1104_v48, 4  ;;  %v1097_v60 = vor.u32 %v1096_v53, %v1093_v52  ;;  %v1110_v61 = vshll.u32 %v999_v46, 16  ;;  %v1115_v62 = vshrl.u32 %v1000_v49, 16  ;;  %v1007_v28 = vld [vmem:[%s8267_s3 + $0x40] sm:$0xf]  ;;  %s617_s13 = scalar_lea.vmem [#allocation24], %s8263_s5 }
 0x1a4   : > { %v1079_v59 = vsel %vm8314_vm4, %v1074_v51, %v1078_v33  ;;  %6271 = vmatprep.mubr.msk.bf16.mxu0 %vm745_vm1, %v5764_v55  ;;  %v1089_v63 = vsel %vm8314_vm4, %v1084_v56, %v1088_v38  ;;  %v1118_v2 = vshll.u32 %v1000_v49, 16  ;;  %v1124_v3 = vshll.u32 %v1001_v54, 16  ;;  %v1008_v41 = vld [vmem:[%s8267_s3 + $0x44] sm:$0x1]  ;;  %v1009_v47 = vld [vmem:[%s8267_s3 + $0x48] sm:$0xf] }
 0x1a5   : > { %v1107_v0 = vor.u32 %v1106_v58, %v1102_v57  ;;  %v5765_v5 = vcombine.low %v1079_v59, %v1089_v63  ;;  %v1098_v6 = vrot.slane %v1097_v60, 4  ;;  %v1112_v7 = vrot.slane %v1110_v61, 5  ;;  %v1010_v52 = vld [vmem:[%s8267_s3 + $0x4c] sm:$0xf]  ;;  %v1011_v59 = vld [vmem:[%s8267_s3 + $0x50] sm:$0x1] }
 0x1a6   : > { %v1117_v8 = vrot.slane %v1115_v62, 4  ;;  %v1120_v11 = vrot.slane %v1118_v2, 5  ;;  %v1126_v12 = vrot.slane %v1124_v3, 5  ;;  %v1128_v13 = vshrl.u32 %v1001_v54, 16  ;;  %v1012_v2 = vld [vmem:[%s8267_s3 + $0x54] sm:$0xf] }
 0x1a7   : > { %v1108_v10 = vrot.slane %v1107_v0, 4  ;;  %6272 = vmatmul.mubr.msk.bf16.vlgmr.msra.gmra.mrb[0].mxu0 %vm745_vm1, %v5765_v5  ;;  %v1103_v14 = vsel %vm8314_vm4, %v1098_v6, %v1102_v57  ;;  %v1134_v15 = vshll.u32 %v1002_v1, 16  ;;  %v1139_v16 = vshrl.u32 %v1003_v4, 16  ;;  %s5521_s15 = sshll.u32 %s617_s13, 4  ;;  %s10598_s25 = sld [smem:[#allocation66_spill]]  ;;  %s10386_s15 = int_to_ptr.vmem [resolvable:$true] %s5521_s15 }
 0x1a8   : > { %v1142_v17 = vshll.u32 %v1003_v4, 16  ;;  %6304 = vmatpush3.bf16.msra.mxu0 %v1896_v39  ;;  %v1121_v19 = vor.u32 %v1120_v11, %v1117_v8  ;;  %v1130_v20 = vrot.slane %v1128_v13, 4  ;;  %v1148_v22 = vshll.u32 %v1004_v9, 16  ;;  %s5509_s21 = scalar_lea.sflag [#allocation5], %s8263_s5  ;;  %s7709_s4 = scalar_lea.vmem %s10386_s15, 16 }
 0x1a9   : > { %v1113_v18 = vsel %vm8314_vm4, %v1108_v10, %v1112_v7  ;;  %v1136_v25 = vrot.slane %v1134_v15, 5  ;;  %v1141_v26 = vrot.slane %v1139_v16, 4  ;;  %v1152_v33 = vshrl.u32 %v1004_v9, 16  ;;  %v1013_v7 = vld [vmem:[%s8267_s3 + $0x58] sm:$0xf]  ;;  %p7710_p2 = scmp.ne.s32.totalorder %s10386_s15, %s7709_s4  ;;  %p10600_p8 = scmp.ne.s32.totalorder %s10506_s24, 0 }
 0x1aa   : > { %v5766_v24 = vcombine.low %v1103_v14, %v1113_v18  ;;  %v1144_v27 = vrot.slane %v1142_v17, 5  ;;  %v1122_v29 = vrot.slane %v1121_v19, 4  ;;  %v1131_v31 = vor.u32 %v1130_v20, %v1126_v12  ;;  %v1014_v15 = vld [vmem:[%s8267_s3 + $0x5c] sm:$0x1]  ;;  %s7820_s2 = smov [#allocation24]  }
 0x1ab   : > { %v1150_v32 = vrot.slane %v1148_v22, 5  ;;  %v1158_v35 = vshll.u32 %v1005_v21, 16  ;;  %v1163_v36 = vshrl.u32 %v1006_v23, 16  ;;  %v1166_v37 = vshll.u32 %v1006_v23, 16  ;;  %v1015_v21 = vld [vmem:[%s8267_s3 + $0x60] sm:$0xf]  ;;  %p7711_p4 = pnand %p7710_p2, %p10600_p8 }
 0x1ac   : > { %6275 = vmatprep.mubr.msk.bf16.mxu0 %vm745_vm1, %v5766_v24  ;;  %v1145_v34 = vor.u32 %v1144_v27, %v1141_v26  ;;  %v1127_v38 = vsel %vm8314_vm4, %v1122_v29, %v1126_v12  ;;  %v1132_v39 = vrot.slane %v1131_v31, 4  ;;  %v1154_v40 = vrot.slane %v1152_v33, 4  ;;  %v1016_v26 = vld [vmem:[%s8267_s3 + $0x64] sm:$0xf]  ;;  %s7713_s0 = sshll.u32 %s7820_s2, 4  ;;  %s7714_s0 = int_to_ptr.vmem [resolvable:$false] %s7713_s0 }
 0x1ad   : > { %v1172_v42 = vshll.u32 %v1007_v28, 16  ;;  %v1160_v44 = vrot.slane %v1158_v35, 5  ;;  %v1165_v45 = vrot.slane %v1163_v36, 4  ;;  %v1168_v46 = vrot.slane %v1166_v37, 5  ;;  %s10599_s29 = smov %s10598_s25  ;;  %s10384_s1 = scalar_lea.hbm %s10598_s25, %s6120_s22 }
 0x1ae   : > { %v1146_v43 = vrot.slane %v1145_v34, 4  ;;  %v1137_v48 = vsel %vm8314_vm4, %v1132_v39, %v1136_v25  ;;  %v1155_v49 = vor.u32 %v1154_v40, %v1150_v32  ;;  %v1176_v51 = vshrl.u32 %v1007_v28, 16  ;;  %p7712_p10 = pneg %p7711_p4  ;;  %s7715_s23 = scalar_lea.vmem %s7714_s0, 32 }
 0x1af   : > { %v1174_v50 = vrot.slane %v1172_v42, 5  ;;  %v5767_v53 = vcombine.low %v1127_v38, %v1137_v48  ;;  %v1169_v55 = vor.u32 %v1168_v46, %v1165_v45  ;;  %v1182_v56 = vshll.u32 %v1008_v41, 16  ;;  %v1017_v38 = vld [vmem:[%s8267_s3 + $0x68] sm:$0x1]  ;;  %v1018_v41 = vld [vmem:[%s8267_s3 + $0x6c] sm:$0xf]  ;;  %p7716_p11 = scmp.lt.s32.totalorder %s10386_s15, %s7714_s0  ;;  %p7717_p3 = scmp.lt.s32.totalorder %s7715_s23, %s7709_s4 }
 0x1b0   : > { %v1151_v54 = vsel %vm8314_vm4, %v1146_v43, %v1150_v32  ;;  %v1156_v57 = vrot.slane %v1155_v49, 4  ;;  %v1178_v58 = vrot.slane %v1176_v51, 4  ;;  %v1187_v60 = vshrl.u32 %v1009_v47, 16  ;;  %v1019_v46 = vld [vmem:[%s8267_s3 + $0x70] sm:$0xf] }
 0x1b1   : > { %v1190_v61 = vshll.u32 %v1009_v47, 16  ;;  %6276 = vmatmul.mubr.msk.bf16.gmra.mrb[4].mxu0 %vm745_vm1, %v5767_v53  ;;  %v1170_v62 = vrot.slane %v1169_v55, 4  ;;  %v1184_v63 = vrot.slane %v1182_v56, 5  ;;  %v1196_v0 = vshll.u32 %v1010_v52, 16  ;;  %v1020_v51 = vld [vmem:[%s8267_s3 + $0x74] sm:$0x1]  ;;  %p7718_p6 = por %p7717_p3, %p7716_p11 }
 0x1b2   : > { %v1200_v1 = vshrl.u32 %v1010_v52, 16  ;;  %v1161_v3 = vsel %vm8314_vm4, %v1156_v57, %v1160_v44  ;;  %v1179_v4 = vor.u32 %v1178_v58, %v1174_v50  ;;  %v1189_v5 = vrot.slane %v1187_v60, 4  ;;  %v1021_v52 = vld [vmem:[%s8267_s3 + $0x78] sm:$0xf]  ;;  %v1022_v57 = vld [vmem:[%s8267_s3 + $0x7c] sm:$0xf] }
 0x1b3   : > { %v1192_v6 = vrot.slane %v1190_v61, 5  ;;  %v5768_v8 = vcombine.low %v1151_v54, %v1161_v3  ;;  %v1175_v9 = vsel %vm8314_vm4, %v1170_v62, %v1174_v50  ;;  %v1198_v10 = vrot.slane %v1196_v0, 5  ;;  %p7719_p7 = pnand %p7718_p6, %p7712_p10 }
 0x1b4   : > { %v1202_v11 = vrot.slane %v1200_v1, 4  ;;  %v1180_v12 = vrot.slane %v1179_v4, 4  ;;  %v1206_v14 = vshll.u32 %v1011_v59, 16  ;;  %v1211_v16 = vshrl.u32 %v1012_v2, 16 }
 0x1b5   : > { %v1193_v13 = vor.u32 %v1192_v6, %v1189_v5  ;;  %6279 = vmatprep.mubr.msk.bf16.mxu0 %vm745_vm1, %v5768_v8  ;;  %v1214_v18 = vshll.u32 %v1012_v2, 16  ;;  %v1220_v19 = vshll.u32 %v1013_v7, 16  ;;  %v1224_v20 = vshrl.u32 %v1013_v7, 16  ;;  %v6796_v2 = vld [vmem:[%s8267_s3 + $0x18] sm:$0xff]   ;;  %v1023_v7 = vld [vmem:[%s8267_s3 + $0x80] sm:$0x1] }
 0x1b6   : > { %v1203_v17 = vor.u32 %v1202_v11, %v1198_v10  ;;  %v1185_v22 = vsel %vm8314_vm4, %v1180_v12, %v1184_v63  ;;  %v1208_v24 = vrot.slane %v1206_v14, 5  ;;  %v1213_v25 = vrot.slane %v1211_v16, 4  ;;  %v1024_v12 = vld [vmem:[%s8267_s3 + $0x84] sm:$0xf]  ;;  %6241 = vmatprep.mubr.msk.bf16.mxu1 %vm745_vm1, %v6796_v2 }
 0x1b7   : > { %v1194_v23 = vrot.slane %v1193_v13, 4  ;;  %v5769_v27 = vcombine.low %v1175_v9, %v1185_v22  ;;  %v1216_v29 = vrot.slane %v1214_v18, 5  ;;  %v1222_v31 = vrot.slane %v1220_v19, 5  ;;  %v8388_v13 = vld [vmem:[#allocation6 + $0x18] sm:$0x3f]  }
 0x1b8   : > { %v1204_v28 = vrot.slane %v1203_v17, 4  ;;  %v1226_v33 = vrot.slane %v1224_v20, 4  ;;  %v1230_v34 = vshll.u32 %v1014_v15, 16  ;;  %v1235_v35 = vshrl.u32 %v1015_v21, 16  ;;  %v6797_v14 = vld [vmem:[%s8267_s3 + $0x24] sm:$0xff]   ;;  %v6798_v20 = vld [vmem:[%s8267_s3 + $0x30] sm:$0xff]   ;;  %6597 = vmatprep.subr.msk.bf16.mxu0 %vm794_vm0, %v8388_v13 }
 0x1b9   : > { %v1199_v32 = vsel %vm8314_vm4, %v1194_v23, %v1198_v10  ;;  %6280 = vmatmul.mubr.msk.bf16.gmra.mrb[8].mxu0 %vm745_vm1, %v5769_v27  ;;  %v1217_v37 = vor.u32 %v1216_v29, %v1213_v25  ;;  %v1238_v39 = vshll.u32 %v1015_v21, 16  ;;  %v1244_v40 = vshll.u32 %v1016_v26, 16  ;;  %v1025_v19 = vld [vmem:[%s8267_s3 + $0x88] sm:$0xf]  ;;  %6242 = vmatmul.mubr.msk.bf16.vlgmr.msra.gmra.mrb[0].mxu1 %vm745_vm1, %v6797_v14  ;;  %v1026_v29 = vld [vmem:[%s8267_s3 + $0x8c] sm:$0x1] }
 0x1ba   : > { %v1209_v36 = vsel %vm8314_vm4, %v1204_v28, %v1208_v24  ;;  %v1227_v43 = vor.u32 %v1226_v33, %v1222_v31  ;;  %v1232_v44 = vrot.slane %v1230_v34, 5  ;;  %v1237_v45 = vrot.slane %v1235_v35, 4  ;;  %6245 = vmatprep.mubr.msk.bf16.mxu1 %vm745_vm1, %v6798_v20 }
 0x1bb   : > { %v5770_v42 = vcombine.low %v1199_v32, %v1209_v36  ;;  %v1218_v47 = vrot.slane %v1217_v37, 4  ;;  %v1240_v48 = vrot.slane %v1238_v39, 5  ;;  %v1246_v49 = vrot.slane %v1244_v40, 5  ;;  %v1027_v39 = vld [vmem:[%s8267_s3 + $0x90] sm:$0xf]  ;;  %v6799_v40 = vld [vmem:[%s8267_s3 + $0x3c] sm:$0xff]  }
 0x1bc   : > { %v1248_v50 = vshrl.u32 %v1016_v26, 16  ;;  %v1228_v53 = vrot.slane %v1227_v43, 4  ;;  %v1254_v54 = vshll.u32 %v1017_v38, 16  ;;  %v1259_v55 = vshrl.u32 %v1018_v41, 16 }
 0x1bd   : > { %6283 = vmatprep.mubr.msk.bf16.mxu0 %vm745_vm1, %v5770_v42  ;;  %v1262_v56 = vshll.u32 %v1018_v41, 16  ;;  %v1223_v58 = vsel %vm8314_vm4, %v1218_v47, %v1222_v31  ;;  %v1241_v59 = vor.u32 %v1240_v48, %v1237_v45  ;;  %v1268_v61 = vshll.u32 %v1019_v46, 16  ;;  %v1028_v45 = vld [vmem:[%s8267_s3 + $0x94] sm:$0xf] }
 0x1be   : > { %v1250_v60 = vrot.slane %v1248_v50, 4  ;;  %v1233_v62 = vsel %vm8314_vm4, %v1228_v53, %v1232_v44  ;;  %v1256_v63 = vrot.slane %v1254_v54, 5  ;;  %v1261_v0 = vrot.slane %v1259_v55, 4  ;;  %v6800_v50 = vld [vmem:[%s8267_s3 + $0x48] sm:$0xff]   ;;  %v1029_v55 = vld [vmem:[%s8267_s3 + $0x98] sm:$0x1] }
 0x1bf   : > { %v1264_v1 = vrot.slane %v1262_v56, 5  ;;  %v5771_v3 = vcombine.low %v1223_v58, %v1233_v62  ;;  %v1242_v4 = vrot.slane %v1241_v59, 4  ;;  %v1270_v6 = vrot.slane %v1268_v61, 5 }
 0x1c0   : > { %v1251_v5 = vor.u32 %v1250_v60, %v1246_v49  ;;  %v1272_v9 = vshrl.u32 %v1019_v46, 16  ;;  %v1278_v10 = vshll.u32 %v1020_v51, 16  ;;  %v1283_v11 = vshrl.u32 %v1021_v52, 16  ;;  %v1030_v60 = vld [vmem:[%s8267_s3 + $0x9c] sm:$0xf] }
 0x1c1   : > { %v1265_v8 = vor.u32 %v1264_v1, %v1261_v0  ;;  %6284 = vmatmul.mubr.msk.bf16.gmra.mrb[12].mxu0 %vm745_vm1, %v5771_v3  ;;  %v1247_v15 = vsel %vm8314_vm4, %v1242_v4, %v1246_v49  ;;  %v1286_v17 = vshll.u32 %v1021_v52, 16  ;;  %v1292_v18 = vshll.u32 %v1022_v57, 16  ;;  %v1031_v1 = vld [vmem:[%s8267_s3 + $0xa0] sm:$0xf]  ;;  %6246 = vmatmul.mubr.msk.bf16.gmra.mrb[4].mxu1 %vm745_vm1, %v6799_v40 }
 0x1c2   : > { %v1252_v16 = vrot.slane %v1251_v5, 4  ;;  %v1274_v22 = vrot.slane %v1272_v9, 4  ;;  %v1280_v23 = vrot.slane %v1278_v10, 5  ;;  %v1285_v24 = vrot.slane %v1283_v11, 4  ;;  %6249 = vmatprep.mubr.msk.bf16.mxu1 %vm745_vm1, %v6800_v50  ;;  %v1032_v10 = vld [vmem:[%s8267_s3 + $0xa4] sm:$0x1] }
 0x1c3   : > { %v1266_v21 = vrot.slane %v1265_v8, 4  ;;  %v1288_v26 = vrot.slane %v1286_v17, 5  ;;  %v1294_v27 = vrot.slane %v1292_v18, 5  ;;  %v1296_v28 = vshrl.u32 %v1022_v57, 16  ;;  %v1033_v11 = vld [vmem:[%s8267_s3 + $0xa8] sm:$0xf] }
 0x1c4   : > { %v1257_v25 = vsel %vm8314_vm4, %v1252_v16, %v1256_v63  ;;  %v1275_v33 = vor.u32 %v1274_v22, %v1270_v6  ;;  %v1302_v34 = vshll.u32 %v1023_v7, 16  ;;  %v1307_v37 = vshrl.u32 %v1024_v12, 16  ;;  %v6802_v18 = vld [vmem:[%s8267_s3 + $0x60] sm:$0xff]  }
 0x1c5   : > { %v5772_v31 = vcombine.low %v1247_v15, %v1257_v25  ;;  %v1271_v32 = vsel %vm8314_vm4, %v1266_v21, %v1270_v6  ;;  %v1289_v35 = vor.u32 %v1288_v26, %v1285_v24  ;;  %v1298_v36 = vrot.slane %v1296_v28, 4 }
 0x1c6   : > { %v1310_v38 = vshll.u32 %v1024_v12, 16  ;;  %v1276_v41 = vrot.slane %v1275_v33, 4  ;;  %v1304_v42 = vrot.slane %v1302_v34, 5  ;;  %v1316_v43 = vshll.u32 %v1025_v19, 16  ;;  %v6801_v12 = vld [vmem:[%s8267_s3 + $0x54] sm:$0xff]  }
 0x1c7   : > { %6287 = vmatprep.mubr.msk.bf16.mxu0 %vm745_vm1, %v5772_v31  ;;  %v1320_v44 = vshrl.u32 %v1025_v19, 16  ;;  %v1290_v46 = vrot.slane %v1289_v35, 4  ;;  %v1299_v47 = vor.u32 %v1298_v36, %v1294_v27  ;;  %v1309_v48 = vrot.slane %v1307_v37, 4  ;;  %v1035_v33 = vld [vmem:[%s8267_s3 + $0xb0] sm:$0x1] }
 0x1c8   : > { %v1312_v49 = vrot.slane %v1310_v38, 5  ;;  %v1281_v51 = vsel %vm8314_vm4, %v1276_v41, %v1280_v23  ;;  %v1318_v52 = vrot.slane %v1316_v43, 5  ;;  %v1326_v54 = vshll.u32 %v1026_v29, 16  ;;  %v1034_v23 = vld [vmem:[%s8267_s3 + $0xac] sm:$0xf] }
 0x1c9   : > { %v1322_v53 = vrot.slane %v1320_v44, 4  ;;  %v5773_v56 = vcombine.low %v1271_v32, %v1281_v51  ;;  %v1295_v57 = vsel %vm8314_vm4, %v1290_v46, %v1294_v27  ;;  %v1300_v58 = vrot.slane %v1299_v47, 4  ;;  %v1036_v34 = vld [vmem:[%s8267_s3 + $0xb4] sm:$0xf]  ;;  %v1037_v43 = vld [vmem:[%s8267_s3 + $0xb8] sm:$0xf]  ;;  %6250 = vmatmul.mubr.msk.bf16.gmra.mrb[8].mxu1 %vm745_vm1, %v6801_v12 }
 0x1ca   : > { %v1313_v59 = vor.u32 %v1312_v49, %v1309_v48  ;;  %v1328_v62 = vrot.slane %v1326_v54, 5  ;;  %v1331_v63 = vshrl.u32 %v1027_v39, 16  ;;  %v1334_v0 = vshll.u32 %v1027_v39, 16  ;;  %6253 = vmatprep.mubr.msk.bf16.mxu1 %vm745_vm1, %v6802_v18 }
 0x1cb   : > { %v1323_v61 = vor.u32 %v1322_v53, %v1318_v52  ;;  %6288 = vmatmul.mubr.msk.bf16.gmra.mrb[16].mxu0 %vm745_vm1, %v5773_v56  ;;  %v1305_v2 = vsel %vm8314_vm4, %v1300_v58, %v1304_v42  ;;  %v1340_v4 = vshll.u32 %v1028_v45, 16  ;;  %v1344_v5 = vshrl.u32 %v1028_v45, 16 }
 0x1cc   : > { %v1314_v3 = vrot.slane %v1313_v59, 4  ;;  %v5774_v6 = vcombine.low %v1295_v57, %v1305_v2  ;;  %v1333_v8 = vrot.slane %v1331_v63, 4  ;;  %v1336_v9 = vrot.slane %v1334_v0, 5  ;;  %v6804_v2 = vld [vmem:[%s8267_s3 + $0x78] sm:$0xff]  }
 0x1cd   : > { %v1324_v7 = vrot.slane %v1323_v61, 4  ;;  %v1342_v15 = vrot.slane %v1340_v4, 5  ;;  %v1346_v16 = vrot.slane %v1344_v5, 4  ;;  %v1350_v17 = vshll.u32 %v1029_v55, 16  ;;  %v6803_v61 = vld [vmem:[%s8267_s3 + $0x6c] sm:$0xff]  }
 0x1ce   : > { %v1319_v14 = vsel %vm8314_vm4, %v1314_v3, %v1318_v52  ;;  %6291 = vmatprep.mubr.msk.bf16.mxu0 %vm745_vm1, %v5774_v6  ;;  %v1337_v20 = vor.u32 %v1336_v9, %v1333_v8  ;;  %v1355_v21 = vshrl.u32 %v1030_v60, 16  ;;  %v1358_v22 = vshll.u32 %v1030_v60, 16  ;;  %v1038_v52 = vld [vmem:[%s8267_s3 + $0xbc] sm:$0x1] }
 0x1cf   : > { %v1329_v19 = vsel %vm8314_vm4, %v1324_v7, %v1328_v62  ;;  %v1347_v25 = vor.u32 %v1346_v16, %v1342_v15  ;;  %v1352_v26 = vrot.slane %v1350_v17, 5  ;;  %v1364_v27 = vshll.u32 %v1031_v1, 16 }
 0x1d0   : > { %v5775_v24 = vcombine.low %v1319_v14, %v1329_v19  ;;  %v1338_v28 = vrot.slane %v1337_v20, 4  ;;  %v1357_v29 = vrot.slane %v1355_v21, 4  ;;  %v1360_v31 = vrot.slane %v1358_v22, 5 }
 0x1d1   : > { %v1368_v32 = vshrl.u32 %v1031_v1, 16  ;;  %v1348_v35 = vrot.slane %v1347_v25, 4  ;;  %v1366_v36 = vrot.slane %v1364_v27, 5  ;;  %v1374_v37 = vshll.u32 %v1032_v10, 16  ;;  %6254 = vmatmul.mubr.msk.bf16.gmra.mrb[12].mxu1 %vm745_vm1, %v6803_v61 }
 0x1d2   : > { %v1379_v38 = vshrl.u32 %v1033_v11, 16  ;;  %v1343_v39 = vsel %vm8314_vm4, %v1338_v28, %v1342_v15  ;;  %v1361_v40 = vor.u32 %v1360_v31, %v1357_v29  ;;  %v1382_v42 = vshll.u32 %v1033_v11, 16  ;;  %6257 = vmatprep.mubr.msk.bf16.mxu1 %vm745_vm1, %v6804_v2  ;;  %v6810_v28 = vld [vmem:[#allocation9] sm:$0xff]  }
 0x1d3   : > { %v1370_v41 = vrot.slane %v1368_v32, 4  ;;  %6292 = vmatmul.mubr.msk.bf16.gmra.mrb[20].mxu0 %vm745_vm1, %v5775_v24  ;;  %v1353_v44 = vsel %vm8314_vm4, %v1348_v35, %v1352_v26  ;;  %v1376_v45 = vrot.slane %v1374_v37, 5  ;;  %v1388_v47 = vshll.u32 %v1034_v23, 16  ;;  %v6806_v24 = vld [vmem:[%s8267_s3 + $0x90] sm:$0xff]   ;;  %6371 = vmatprep.subr.bf16.mxu1 %v6810_v28  ;;  %v6807_v29 = vld [vmem:[%s8267_s3 + $0x9c] sm:$0xff]   ;;  %v6808_v32 = vld [vmem:[%s8267_s3 + $0xa8] sm:$0xff]  }
 0x1d4   : > { %v1381_v46 = vrot.slane %v1379_v38, 4  ;;  %v5776_v48 = vcombine.low %v1343_v39, %v1353_v44  ;;  %v1362_v49 = vrot.slane %v1361_v40, 4  ;;  %v1384_v51 = vrot.slane %v1382_v42, 5  ;;  %v6779_v26 = vld [vmem:[%s8267_s3 + $0xc] sm:$0xff]   ;;  %6372 = vmatpush3.bf16.msra.mxu1 %v6810_v28  ;;  %v6780_v31 = vld [vmem:[%s8267_s3 + $0x18] sm:$0xff]   ;;  %v6787_v39 = vld [vmem:[%s8267_s3 + $0x60] sm:$0xff]  }
 0x1d5   : > { %v1371_v50 = vor.u32 %v1370_v41, %v1366_v36  ;;  %v1390_v53 = vrot.slane %v1388_v47, 5  ;;  %v1392_v54 = vshrl.u32 %v1034_v23, 16  ;;  %v1398_v55 = vshll.u32 %v1035_v33, 16  ;;  %v6805_v23 = vld [vmem:[%s8267_s3 + $0x84] sm:$0xff]   ;;  %v6809_v35 = vld [vmem:[%s8267_s3 + $0xb4] sm:$0xff]   ;;  %v6784_v37 = vld [vmem:[%s8267_s3 + $0x3c] sm:$0xff]  }
 0x1d6   : > { %v1403_v56 = vshrl.u32 %v1036_v34, 16  ;;  %6295 = vmatprep.mubr.msk.bf16.mxu0 %vm745_vm1, %v5776_v48  ;;  %v1367_v57 = vsel %vm8314_vm4, %v1362_v49, %v1366_v36  ;;  %v1385_v59 = vor.u32 %v1384_v51, %v1381_v46  ;;  %v1406_v60 = vshll.u32 %v1036_v34, 16  ;;  %v6782_v33 = vld [vmem:[%s8267_s3 + $0x24] sm:$0xff]   ;;  %v6783_v36 = vld [vmem:[%s8267_s3 + $0x30] sm:$0xff]   ;;  %v5862_v41 = vld [vmem:[%s8267_s3 + $0xc] sm:$0xf] }
 0x1d7   : > { %v1372_v58 = vrot.slane %v1371_v50, 4  ;;  %v1394_v62 = vrot.slane %v1392_v54, 4  ;;  %v1400_v63 = vrot.slane %v1398_v55, 5  ;;  %v1412_v1 = vshll.u32 %v1037_v43, 16  ;;  %v6786_v38 = vld [vmem:[%s8267_s3 + $0x54] sm:$0xff]   ;;  %v6788_v40 = vld [vmem:[%s8267_s3 + $0x6c] sm:$0xff]  }
 0x1d8   : > { %v1405_v0 = vrot.slane %v1403_v56, 4  ;;  %v1386_v4 = vrot.slane %v1385_v59, 4  ;;  %v1408_v5 = vrot.slane %v1406_v60, 5  ;;  %v1416_v6 = vshrl.u32 %v1037_v43, 16  ;;  %v5863_v42 = vld [vmem:[%s8267_s3 + $0x10] sm:$0xf] }
 0x1d9   : > { %v1377_v3 = vsel %vm8314_vm4, %v1372_v58, %v1376_v45  ;;  %v1395_v8 = vor.u32 %v1394_v62, %v1390_v53  ;;  %v1414_v9 = vrot.slane %v1412_v1, 5  ;;  %v1422_v10 = vshll.u32 %v1038_v52, 16  ;;  %6258 = vmatmul.mubr.msk.bf16.gmra.mrb[16].mxu1 %vm745_vm1, %v6805_v23  ;;  %v6789_v47 = vld [vmem:[%s8267_s3 + $0x78] sm:$0xff]   ;;  %v6790_v48 = vld [vmem:[%s8267_s3 + $0x84] sm:$0xff]   ;;  %v5864_v49 = vld [vmem:[%s8267_s3 + $0x14] sm:$0x1] }
 0x1da   : > { %v5777_v7 = vcombine.low %v1367_v57, %v1377_v3  ;;  %v1409_v11 = vor.u32 %v1408_v5, %v1405_v0  ;;  %v1418_v12 = vrot.slane %v1416_v6, 4  ;;  %v1391_v14 = vsel %vm8314_vm4, %v1386_v4, %v1390_v53  ;;  %6261 = vmatprep.mubr.msk.bf16.mxu1 %vm745_vm1, %v6806_v24  ;;  %v5865_v50 = vld [vmem:[%s8267_s3 + $0x18] sm:$0xf]  ;;  %v5866_v53 = vld [vmem:[%s8267_s3 + $0x1c] sm:$0xf]  ;;  %v6791_v3 = vld [vmem:[%s8267_s3 + $0x90] sm:$0xff]  }
 0x1db   : > { %v1396_v15 = vrot.slane %v1395_v8, 4  ;;  %v1424_v18 = vrot.slane %v1422_v10, 5  ;;  %v2628_v34 = vsel %vm794_vm0, %v8388_v13, 0  ;;  %v6785_v13 = vld [vmem:[%s8267_s3 + $0x48] sm:$0xff]   ;;  %v2140_v43 = vshrl.u32 %v5862_v41, 16 }
 0x1dc   : > { %6296 = vmatmul.mubr.msk.bf16.gmra.mrb[24].mxu0 %vm745_vm1, %v5777_v7  ;;  %v1410_v16 = vrot.slane %v1409_v11, 4  ;;  %v1419_v17 = vor.u32 %v1418_v12, %v1414_v9  ;;  %v2143_v44 = vshll.u32 %v5862_v41, 16  ;;  %v2149_v45 = vshll.u32 %v5863_v42, 16  ;;  %v5868_v54 = vld [vmem:[%s8267_s3 + $0x24] sm:$0xf] }
 0x1dd   : > { %v1401_v19 = vsel %vm8314_vm4, %v1396_v15, %v1400_v63  ;;  %v2153_v46 = vshrl.u32 %v5863_v42, 16  ;;  %v2142_v51 = vrot.slane %v2140_v43, 4  ;;  %v5869_v57 = vld [vmem:[%s8267_s3 + $0x28] sm:$0xf]  ;;  %v2164_v58 = vshrl.u32 %v5865_v50, 16 }
 0x1de   : > { %v5778_v20 = vcombine.low %v1391_v14, %v1401_v19  ;;  %v1415_v21 = vsel %vm8314_vm4, %v1410_v16, %v1414_v9  ;;  %v1420_v22 = vrot.slane %v1419_v17, 4  ;;  %v2145_v52 = vrot.slane %v2143_v44, 5  ;;  %v5867_v8 = vld [vmem:[%s8267_s3 + $0x20] sm:$0x1]  ;;  %v5870_v16 = vld [vmem:[%s8267_s3 + $0x2c] sm:$0x1] }
 0x1df   : > { %v8502_v55 = vrot.slane %v2149_v45, 5  ;;  %v2155_v56 = vrot.slane %v2153_v46, 4  ;;  %v2167_v59 = vshll.u32 %v5865_v50, 16  ;;  %v2173_v60 = vshll.u32 %v5866_v53, 16  ;;  %v6792_v14 = vld [vmem:[%s8267_s3 + $0x9c] sm:$0xff]  }
 0x1e0   : > { %6299 = vmatprep.mubr.msk.bf16.mxu0 %vm745_vm1, %v5778_v20  ;;  %v1425_v25 = vsel %vm8314_vm4, %v1420_v22, %v1424_v18  ;;  %v2177_v61 = vshrl.u32 %v5866_v53, 16  ;;  %v2188_v62 = vshrl.u32 %v5868_v54, 16  ;;  %v2191_v63 = vshll.u32 %v5868_v54, 16  ;;  %v5871_v17 = vld [vmem:[%s8267_s3 + $0x30] sm:$0xf] }
 0x1e1   : > { %v5779_v27 = vcombine.low %v1415_v21, %v1425_v25  ;;  %6262 = vmatmul.mubr.msk.bf16.gmra.mrb[20].mxu1 %vm745_vm1, %v6807_v29  ;;  %v2159_v0 = vshll.u32 %v5864_v49, 16  ;;  %v2146_v1 = vor.u32 %v2145_v52, %v2142_v51  ;;  %v2156_v2 = vor.u32 %v2155_v56, %v8502_v55  ;;  %v5875_v28 = vld [vmem:[%s8267_s3 + $0x40] sm:$0xf]  ;;  %v6793_v29 = vld [vmem:[%s8267_s3 + $0xa8] sm:$0xff]   ;;  %v5876_v56 = vld [vmem:[%s8267_s3 + $0x44] sm:$0x1] }
 0x1e2   : > { %6265 = vmatprep.mubr.msk.bf16.mxu1 %vm745_vm1, %v6808_v32  ;;  %v2166_v4 = vrot.slane %v2164_v58, 4  ;;  %v2169_v5 = vrot.slane %v2167_v59, 5  ;;  %v2197_v6 = vshll.u32 %v5869_v57, 16  ;;  %v2201_v7 = vshrl.u32 %v5869_v57, 16  ;;  %v5877_v54 = vld [vmem:[%s8267_s3 + $0x48] sm:$0xf] }
 0x1e3   : > { %v8510_v9 = vrot.slane %v2173_v60, 5  ;;  %v2179_v10 = vrot.slane %v2177_v61, 4  ;;  %v2190_v11 = vrot.slane %v2188_v62, 4  ;;  %v2193_v12 = vrot.slane %v2191_v63, 5  ;;  %v5878_v57 = vld [vmem:[%s8267_s3 + $0x4c] sm:$0xf] }
 0x1e4   : > { %6300 = vmatmul.mubr.msk.bf16.gmra.mrb[28].mxu0 %vm745_vm1, %v5779_v27  ;;  %v2161_v15 = vrot.slane %v2159_v0, 5  ;;  %v2147_v18 = vrot.slane %v2146_v1, 4  ;;  %v2183_v19 = vshll.u32 %v5867_v8, 16  ;;  %v8515_v20 = vrot.slane %v2197_v6, 5  ;;  %v5874_v27 = vld [vmem:[%s8267_s3 + $0x3c] sm:$0xf] }
 0x1e5   : > { %6305 = vmatprep.mubr.msk.bf16.mxu0 %vm745_vm1, %v6779_v26  ;;  %v2203_v21 = vrot.slane %v2201_v7, 4  ;;  %v2157_v22 = vrot.slane %v2156_v2, 4  ;;  %v2170_v23 = vor.u32 %v2169_v5, %v2166_v4  ;;  %v2180_v24 = vor.u32 %v2179_v10, %v8510_v9  ;;  %v5872_v26 = vld [vmem:[%s8267_s3 + $0x34] sm:$0xf]  ;;  %v5881_v6 = vld [vmem:[%s8267_s3 + $0x58] sm:$0xf] }
 0x1e6   : > { %v2194_v25 = vor.u32 %v2193_v12, %v2190_v11  ;;  %v2212_v32 = vshrl.u32 %v5871_v17, 16  ;;  %v2152_v42 = vsel %vm8314_vm4, %v2147_v18, %v8502_v55  ;;  %v2236_v44 = vshrl.u32 %v5874_v27, 16  ;;  %v5880_v61 = vld [vmem:[%s8267_s3 + $0x54] sm:$0xf]  ;;  %v6795_v7 = vld [vmem:[%s8267_s3 + $0xc0] sm:$0xff]  }
 0x1e7   : > { %v2162_v43 = vsel %vm8314_vm4, %v2157_v22, %v2161_v15  ;;  %v2239_v45 = vshll.u32 %v5874_v27, 16  ;;  %v2249_v49 = vshrl.u32 %v5875_v28, 16  ;;  %v2260_v8 = vshrl.u32 %v5877_v54, 16 }
 0x1e8   : > { %v2195_v41 = vrot.slane %v2194_v25, 4  ;;  %v5910_v58 = vcombine.low %v2152_v42, %v2162_v43  ;;  %v2238_v59 = vrot.slane %v2236_v44, 4  ;;  %v2269_v10 = vshll.u32 %v5878_v57, 16 }
 0x1e9   : > { %6266 = vmatmul.mubr.msk.bf16.gmra.mrb[24].mxu1 %vm745_vm1, %v6809_v35  ;;  %v2204_v35 = vor.u32 %v2203_v21, %v8515_v20  ;;  %v2241_v60 = vrot.slane %v2239_v45, 5  ;;  %v2251_v1 = vrot.slane %v2249_v49, 4  ;;  %v2273_v11 = vshrl.u32 %v5878_v57, 16 }
 0x1ea   : > { %v2200_v2 = vsel %vm8314_vm4, %v2195_v41, %v8515_v20  ;;  %v2284_v15 = vshrl.u32 %v5880_v61, 16  ;;  %v5879_v20 = vld [vmem:[%s8267_s3 + $0x50] sm:$0x1]  ;;  %v2293_v21 = vshll.u32 %v5881_v6, 16  ;;  %v2297_v25 = vshrl.u32 %v5881_v6, 16 }
 0x1eb   : > { %v2205_v50 = vrot.slane %v2204_v35, 4  ;;  %v2242_v12 = vor.u32 %v2241_v60, %v2238_v59  ;;  %v2262_v27 = vrot.slane %v2260_v8, 4  ;;  %v5882_v35 = vld [vmem:[%s8267_s3 + $0x5c] sm:$0x1]  ;;  %v5886_v41 = vld [vmem:[%s8267_s3 + $0x6c] sm:$0xf] }
 0x1ec   : > { %6306 = vmatmul.mubr.msk.bf16.vlgmr.msra.gmra.mrb[0].mxu0 %vm745_vm1, %v6780_v31  ;;  %v2207_v31 = vshll.u32 %v5870_v16, 16  ;;  %v2287_v16 = vshll.u32 %v5880_v61, 16  ;;  %v2299_v42 = vrot.slane %v2297_v25, 4  ;;  %v5889_v59 = vld [vmem:[%s8267_s3 + $0x78] sm:$0xf]  ;;  %vm3512_vm6 = vcmask 523264  }
 0x1ed   : > { %6338 = vmatpush3.bf16.msra.mxu0 %v2628_v34  ;;  %6309 = vmatprep.mubr.msk.bf16.mxu0 %vm745_vm1, %v6782_v33  ;;  %v2215_v33 = vshll.u32 %v5871_v17, 16  ;;  %v6794_v34 = vld [vmem:[%s8267_s3 + $0xb4] sm:$0xff]   ;;  %vm7819_vm7 = vmmov 0   ;;  %vm4895_vm8 = vcmask 1041408   ;;  %vm4891_vm9 = vcmask 31744  }
 0x1ee   : > { %v2209_v46 = vrot.slane %v2207_v31, 5  ;;  %v2275_v31 = vrot.slane %v2273_v11, 4  ;;  %v2359_v11 = vshll.u32 %v5889_v59, 16 }
 0x1ef   : > { %v2217_v51 = vrot.slane %v2215_v33, 5  ;;  %v2243_v33 = vrot.slane %v2242_v12, 4 }
 0x1f4   : > { %6310 = vmatmul.mubr.msk.bf16.gmra.mrb[4].mxu0 %vm745_vm1, %v6783_v36  ;;  %v5873_v36 = vld [vmem:[%s8267_s3 + $0x38] sm:$0x1] }
 0x1f5   : > { %6313 = vmatprep.mubr.msk.bf16.mxu0 %vm745_vm1, %v6784_v37  ;;  %v2221_v37 = vshll.u32 %v5872_v26, 16  ;;  %v2231_v55 = vshll.u32 %v5873_v36, 16  ;;  %v2286_v36 = vrot.slane %v2284_v15, 4 }
 0x1f7   : > { %v8532_v52 = vrot.slane %v2221_v37, 5  ;;  %v8555_v18 = vrot.slane %v2231_v55, 5  ;;  %v2289_v37 = vrot.slane %v2287_v16, 5  ;;  %v2335_v55 = vshll.u32 %v5886_v41, 16 }
 0x1fc   : > { %6314 = vmatmul.mubr.msk.bf16.gmra.mrb[8].mxu0 %vm745_vm1, %v6785_v13  ;;  %v2225_v13 = vshrl.u32 %v5872_v26, 16  ;;  %v5883_v26 = vld [vmem:[%s8267_s3 + $0x60] sm:$0xf] }
 0x1fd   : > { %6317 = vmatprep.mubr.msk.bf16.mxu0 %vm745_vm1, %v6786_v38  ;;  %v2171_v38 = vrot.slane %v2170_v23, 4  ;;  %v2311_v43 = vshll.u32 %v5883_v26, 16 }
 0x1fe   : > { %v2227_v53 = vrot.slane %v2225_v13, 4 }
 0x1ff   : > { %v2176_v62 = vsel %vm8314_vm4, %v2171_v38, %v8510_v9  ;;  %v2263_v9 = vshll.u32 %v5877_v54, 16  ;;  %v2279_v38 = vshll.u32 %v5879_v20, 16  ;;  %v2332_v54 = vshrl.u32 %v5886_v41, 16 }
 0x200   : > { %v2228_v5 = vor.u32 %v2227_v53, %v8532_v52  ;;  %v5887_v53 = vld [vmem:[%s8267_s3 + $0x70] sm:$0xf]  ;;  %v2313_v61 = vrot.slane %v2311_v43, 5 }
 0x201   : > { %v2281_v57 = vrot.slane %v2279_v38, 5  ;;  %v2334_v8 = vrot.slane %v2332_v54, 4  ;;  %v5891_v38 = vld [vmem:[%s8267_s3 + $0x80] sm:$0x1] }
 0x204   : > { %6318 = vmatmul.mubr.msk.bf16.gmra.mrb[12].mxu0 %vm745_vm1, %v6787_v39  ;;  %v2181_v39 = vrot.slane %v2180_v24, 4  ;;  %v8561_v24 = vrot.slane %v2228_v5, 4  ;;  %v2341_v5 = vshll.u32 %v5887_v53, 16 }
 0x205   : > { %6321 = vmatprep.mubr.msk.bf16.mxu0 %vm745_vm1, %v6788_v40  ;;  %v2185_v40 = vrot.slane %v2183_v19, 5 }
 0x207   : > { %v2186_v63 = vsel %vm8314_vm4, %v2181_v39, %v2185_v40  ;;  %v8570_v39 = vrot.slane %v2293_v21, 5  ;;  %v2308_v40 = vshrl.u32 %v5883_v26, 16  ;;  %v8597_v21 = vrot.slane %v2341_v5, 5  ;;  %v5888_v26 = vld [vmem:[%s8267_s3 + $0x74] sm:$0x1] }
 0x208   : > { %v5911_v17 = vcombine.low %v2176_v62, %v2186_v63 }
 0x209   : > { %v2300_v60 = vor.u32 %v2299_v42, %v8570_v39 }
 0x20b   : > { %v2301_v15 = vrot.slane %v2300_v60, 4 }
 0x20c   : > { %6322 = vmatmul.mubr.msk.bf16.gmra.mrb[16].mxu0 %vm745_vm1, %v6789_v47  ;;  %v2214_v47 = vrot.slane %v2212_v32, 4  ;;  %v5884_v32 = vld [vmem:[%s8267_s3 + $0x64] sm:$0xf] }
 0x20d   : > { %6325 = vmatprep.mubr.msk.bf16.mxu0 %vm745_vm1, %v6790_v48  ;;  %v2245_v48 = vshll.u32 %v5875_v28, 16  ;;  %v2265_v28 = vrot.slane %v2263_v9, 5  ;;  %v2317_v44 = vshll.u32 %v5884_v32, 16  ;;  %v2321_v45 = vshrl.u32 %v5884_v32, 16 }
 0x20e   : > { %v2218_v4 = vor.u32 %v2217_v51, %v2214_v47  ;;  %v2234_v47 = vsel %vm8314_vm4, %v8561_v24, %v8555_v18  ;;  %v2303_v51 = vshll.u32 %v5882_v35, 16  ;;  %v2337_v9 = vrot.slane %v2335_v55, 5  ;;  %v5893_v35 = vld [vmem:[%s8267_s3 + $0x88] sm:$0xf]  ;;  %v5896_v55 = vld [vmem:[%s8267_s3 + $0x94] sm:$0xf] }
 0x20f   : > { %v8545_v0 = vrot.slane %v2245_v48, 5  ;;  %v2266_v48 = vor.u32 %v2265_v28, %v2262_v27  ;;  %v8590_v62 = vrot.slane %v2317_v44, 5  ;;  %v2323_v63 = vrot.slane %v2321_v45, 4  ;;  %v5892_v28 = vld [vmem:[%s8267_s3 + $0x84] sm:$0xf] }
 0x210   : > { %v8559_v23 = vrot.slane %v2218_v4, 4  ;;  %v5885_v4 = vld [vmem:[%s8267_s3 + $0x68] sm:$0x1]  ;;  %v2338_v27 = vor.u32 %v2337_v9, %v2334_v8  ;;  %v2361_v32 = vrot.slane %v2359_v11, 5  ;;  %v2380_v41 = vshrl.u32 %v5892_v28, 16 }
 0x211   : > { %v2252_v19 = vor.u32 %v2251_v1, %v8545_v0  ;;  %v5890_v1 = vld [vmem:[%s8267_s3 + $0x7c] sm:$0xf]  ;;  %v2327_v18 = vshll.u32 %v5885_v4, 16  ;;  %v2383_v42 = vshll.u32 %v5892_v28, 16  ;;  %v2389_v43 = vshll.u32 %v5893_v35, 16 }
 0x212   : > { %v2365_v12 = vshll.u32 %v5890_v1, 16  ;;  %v2393_v44 = vshrl.u32 %v5893_v35, 16  ;;  %v2339_v45 = vrot.slane %v2338_v27, 4  ;;  %v5901_v35 = vld [vmem:[%s8267_s3 + $0xa8] sm:$0xf] }
 0x213   : > { %v2253_v13 = vrot.slane %v2252_v19, 4  ;;  %v8627_v60 = vrot.slane %v2389_v43, 5  ;;  %v5904_v43 = vld [vmem:[%s8267_s3 + $0xb4] sm:$0xf] }
 0x214   : > { %6326 = vmatmul.mubr.msk.bf16.gmra.mrb[20].mxu0 %vm745_vm1, %v6791_v3  ;;  %v2210_v3 = vsel %vm8314_vm4, %v2205_v50, %v2209_v46  ;;  %v2224_v46 = vsel %vm8314_vm4, %v8559_v23, %v8532_v52  ;;  %v2290_v50 = vor.u32 %v2289_v37, %v2286_v36 }
 0x215   : > { %6329 = vmatprep.mubr.msk.bf16.mxu0 %vm745_vm1, %v6792_v14  ;;  %v2255_v14 = vshll.u32 %v5876_v56, 16  ;;  %v5912_v22 = vcombine.low %v2200_v2, %v2210_v3  ;;  %v2248_v56 = vsel %vm8314_vm4, %v2243_v33, %v8545_v0  ;;  %v2267_v2 = vrot.slane %v2266_v48, 4 }
 0x216   : > { %v2345_v0 = vshrl.u32 %v5887_v53, 16  ;;  %v2291_v6 = vrot.slane %v2290_v50, 4  ;;  %v5913_v19 = vcombine.low %v2224_v46, %v2234_v47  ;;  %v8609_v33 = vrot.slane %v2365_v12, 5 }
 0x217   : > { %v2375_v48 = vshll.u32 %v5891_v38, 16 }
 0x218   : > { %v2296_v25 = vsel %vm8314_vm4, %v2291_v6, %v8570_v39  ;;  %v2413_v6 = vshll.u32 %v5896_v55, 16 }
 0x219   : > { %v2377_v5 = vrot.slane %v2375_v48, 5 }
 0x21c   : > { %6330 = vmatmul.mubr.msk.bf16.gmra.mrb[24].mxu0 %vm745_vm1, %v6793_v29  ;;  %v8565_v29 = vrot.slane %v2269_v10, 5  ;;  %v2356_v10 = vshrl.u32 %v5889_v59, 16  ;;  %v5898_v59 = vld [vmem:[%s8267_s3 + $0x9c] sm:$0xf] }
 0x21d   : > { %6333 = vmatprep.mubr.msk.bf16.mxu0 %vm745_vm1, %v6794_v34  ;;  %v2257_v34 = vrot.slane %v2255_v14, 5  ;;  %v2369_v14 = vshrl.u32 %v5890_v1, 16  ;;  %v2428_v8 = vshrl.u32 %v5898_v59, 16  ;;  %v2431_v9 = vshll.u32 %v5898_v59, 16 }
 0x21e   : > { %v2276_v49 = vor.u32 %v2275_v31, %v8565_v29  ;;  %v2272_v23 = vsel %vm8314_vm4, %v2267_v2, %v8565_v29  ;;  %v2358_v31 = vrot.slane %v2356_v10, 4  ;;  %v5899_v2 = vld [vmem:[%s8267_s3 + $0xa0] sm:$0xf] }
 0x21f   : > { %v2258_v52 = vsel %vm8314_vm4, %v2253_v13, %v2257_v34  ;;  %v2371_v34 = vrot.slane %v2369_v14, 4  ;;  %v2329_v13 = vrot.slane %v2327_v18, 5  ;;  %v2437_v12 = vshll.u32 %v5899_v2, 16 }
 0x220   : > { %v2277_v3 = vrot.slane %v2276_v49, 4  ;;  %v5914_v20 = vcombine.low %v2248_v56, %v2258_v52  ;;  %v2362_v46 = vor.u32 %v2361_v32, %v2358_v31  ;;  %v5895_v49 = vld [vmem:[%s8267_s3 + $0x90] sm:$0xf]  ;;  %v2441_v14 = vshrl.u32 %v5899_v2, 16 }
 0x221   : > { %v2372_v47 = vor.u32 %v2371_v34, %v8609_v33  ;;  %v2407_v1 = vshll.u32 %v5895_v49, 16  ;;  %v2433_v27 = vrot.slane %v2431_v9, 5  ;;  %v8648_v32 = vrot.slane %v2437_v12, 5  ;;  %v5906_v12 = vld [vmem:[%s8267_s3 + $0xbc] sm:$0x1] }
 0x222   : > { %v2282_v24 = vsel %vm8314_vm4, %v2277_v3, %v2281_v57  ;;  %v2382_v57 = vrot.slane %v2380_v41, 4  ;;  %v2363_v3 = vrot.slane %v2362_v46, 4  ;;  %v2443_v34 = vrot.slane %v2441_v14, 4 }
 0x223   : > { %v5915_v50 = vcombine.low %v2272_v23, %v2282_v24  ;;  %v2373_v4 = vrot.slane %v2372_v47, 4  ;;  %v2409_v18 = vrot.slane %v2407_v1, 5  ;;  %v8645_v23 = vrot.slane %v2413_v6, 5  ;;  %v5903_v1 = vld [vmem:[%s8267_s3 + $0xb0] sm:$0x1] }
 0x224   : > { %6334 = vmatmul.mubr.msk.bf16.gmra.mrb[28].mxu0 %vm745_vm1, %v6795_v7  ;;  %v2305_v7 = vrot.slane %v2303_v51, 5  ;;  %v2455_v46 = vshll.u32 %v5901_v35, 16 }
 0x225   : > { %6339 = vmatprep.mubr.msk.bf16.mxu0 %vm745_vm1, %v5910_v58  ;;  %v2310_v58 = vrot.slane %v2308_v40, 4  ;;  %v2351_v40 = vshll.u32 %v5888_v26, 16  ;;  %v2430_v26 = vrot.slane %v2428_v8, 4  ;;  %v5908_v8 = vld [vmem:[%s8267_s3 + $0xc4] sm:$0xf] }
 0x226   : > { %v2306_v36 = vsel %vm8314_vm4, %v2301_v15, %v2305_v7  ;;  %v2417_v7 = vshrl.u32 %v5896_v55, 16  ;;  %v2479_v55 = vshll.u32 %v5904_v43, 16  ;;  %v2457_v2 = vrot.slane %v2455_v46, 5 }
 0x227   : > { %v2314_v16 = vor.u32 %v2313_v61, %v2310_v58  ;;  %v5916_v51 = vcombine.low %v2296_v25, %v2306_v36  ;;  %v2353_v52 = vrot.slane %v2351_v40, 5  ;;  %v2385_v58 = vrot.slane %v2383_v42, 5  ;;  %v5900_v25 = vld [vmem:[%s8267_s3 + $0xa4] sm:$0x1] }
 0x228   : > { %v2395_v61 = vrot.slane %v2393_v44, 4  ;;  %v2419_v24 = vrot.slane %v2417_v7, 4  ;;  %v2434_v40 = vor.u32 %v2433_v27, %v2430_v26  ;;  %v2447_v41 = vshll.u32 %v5900_v25, 16  ;;  %v5905_v44 = vld [vmem:[%s8267_s3 + $0xb8] sm:$0xf] }
 0x229   : > { %v2315_v29 = vrot.slane %v2314_v16, 4  ;;  %v2386_v11 = vor.u32 %v2385_v58, %v2382_v57  ;;  %v2452_v42 = vshrl.u32 %v5901_v35, 16 }
 0x22a   : > { %v2396_v15 = vor.u32 %v2395_v61, %v8627_v60  ;;  %v2435_v58 = vrot.slane %v2434_v40, 4  ;;  %v2449_v59 = vrot.slane %v2447_v41, 5 }
 0x22b   : > { %v2320_v53 = vsel %vm8314_vm4, %v2315_v29, %v8590_v62  ;;  %v2387_v31 = vrot.slane %v2386_v11, 4  ;;  %v2454_v61 = vrot.slane %v2452_v42, 4  ;;  %v2471_v11 = vshll.u32 %v5903_v1, 16 }
 0x22c   : > { %6340 = vmatmul.mubr.msk.bf16.vlgmr.msra.gmra.mrb[0].mxu0 %vm745_vm1, %v5911_v17  ;;  %v2324_v17 = vor.u32 %v2323_v63, %v8590_v62  ;;  %v2404_v63 = vshrl.u32 %v5895_v49, 16  ;;  %v2344_v62 = vsel %vm8314_vm4, %v2339_v45, %v8597_v21  ;;  %v2444_v45 = vor.u32 %v2443_v34, %v8648_v32 }
 0x22d   : > { %6343 = vmatprep.mubr.msk.bf16.mxu0 %vm745_vm1, %v5912_v22  ;;  %v2347_v22 = vrot.slane %v2345_v0, 4  ;;  %v5894_v0 = vld [vmem:[%s8267_s3 + $0x8c] sm:$0x1]  ;;  %v2392_v49 = vsel %vm8314_vm4, %v2387_v31, %v8627_v60  ;;  %v2440_v14 = vsel %vm8314_vm4, %v2435_v58, %v8648_v32  ;;  %v2473_v31 = vrot.slane %v2471_v11, 5 }
 0x22e   : > { %v2325_v37 = vrot.slane %v2324_v17, 4  ;;  %v2399_v16 = vshll.u32 %v5894_v0, 16  ;;  %v2406_v17 = vrot.slane %v2404_v63, 4  ;;  %v2445_v63 = vrot.slane %v2444_v45, 4 }
 0x22f   : > { %v2348_v39 = vor.u32 %v2347_v22, %v8597_v21  ;;  %v2378_v21 = vsel %vm8314_vm4, %v2373_v4, %v2377_v5  ;;  %v5897_v22 = vld [vmem:[%s8267_s3 + $0x98] sm:$0x1]  ;;  %v5907_v4 = vld [vmem:[%s8267_s3 + $0xc0] sm:$0xf]  ;;  %v2481_v0 = vrot.slane %v2479_v55, 5 }
 0x230   : > { %v2330_v54 = vsel %vm8314_vm4, %v2325_v37, %v2329_v13  ;;  %v2401_v36 = vrot.slane %v2399_v16, 5  ;;  %v2410_v29 = vor.u32 %v2409_v18, %v2406_v17  ;;  %v2423_v37 = vshll.u32 %v5897_v22, 16  ;;  %v5902_v13 = vld [vmem:[%s8267_s3 + $0xac] sm:$0xf] }
 0x231   : > { %v2349_v56 = vrot.slane %v2348_v39, 4  ;;  %v2420_v39 = vor.u32 %v2419_v24, %v8645_v23  ;;  %v2461_v47 = vshll.u32 %v5902_v13, 16  ;;  %v2465_v48 = vshrl.u32 %v5902_v13, 16  ;;  %v5909_v13 = vld [vmem:[%s8267_s3 + $0xc8] sm:$0x1] }
 0x232   : > { %v2458_v16 = vor.u32 %v2457_v2, %v2454_v61  ;;  %v2500_v18 = vshrl.u32 %v5907_v4, 16  ;;  %v2495_v24 = vshll.u32 %v5906_v12, 16  ;;  %v2519_v42 = vshll.u32 %v5909_v13, 16 }
 0x233   : > { %v2354_v10 = vsel %vm8314_vm4, %v2349_v56, %v2353_v52  ;;  %v2485_v56 = vshll.u32 %v5905_v44, 16  ;;  %v2489_v52 = vshrl.u32 %v5905_v44, 16  ;;  %v2421_v57 = vrot.slane %v2420_v39, 4 }
 0x234   : > { %6344 = vmatmul.mubr.msk.bf16.gmra.mrb[4].mxu0 %vm745_vm1, %v5913_v19  ;;  %v5917_v19 = vcombine.low %v2320_v53, %v2330_v54  ;;  %v5918_v28 = vcombine.low %v2344_v62, %v2354_v10  ;;  %v2425_v53 = vrot.slane %v2423_v37, 5  ;;  %v2476_v54 = vshrl.u32 %v5904_v43, 16 }
 0x235   : > { %6347 = vmatprep.mubr.msk.bf16.mxu0 %vm745_vm1, %v5914_v20  ;;  %v2368_v20 = vsel %vm8314_vm4, %v2363_v3, %v8609_v33  ;;  %v2397_v33 = vrot.slane %v2396_v15, 4  ;;  %v2463_v60 = vrot.slane %v2461_v47, 5  ;;  %v2467_v62 = vrot.slane %v2465_v48, 4 }
 0x236   : > { %v5919_v38 = vcombine.low %v2368_v20, %v2378_v21  ;;  %v2478_v5 = vrot.slane %v2476_v54, 4  ;;  %v2487_v6 = vrot.slane %v2485_v56, 5  ;;  %v2491_v7 = vrot.slane %v2489_v52, 4 }
 0x237   : > { %v2426_v10 = vsel %vm8314_vm4, %v2421_v57, %v2425_v53  ;;  %v2450_v15 = vsel %vm8314_vm4, %v2445_v63, %v2449_v59  ;;  %v2468_v17 = vor.u32 %v2467_v62, %v2463_v60  ;;  %v2509_v20 = vshll.u32 %v5908_v8, 16 }
 0x238   : > { %v2513_v21 = vshrl.u32 %v5908_v8, 16  ;;  %v2482_v22 = vor.u32 %v2481_v0, %v2478_v5  ;;  %v5922_v26 = vcombine.low %v2440_v14, %v2450_v15  ;;  %v2459_v27 = vrot.slane %v2458_v16, 4 }
 0x239   : > { %v2502_v32 = vrot.slane %v2500_v18, 4  ;;  %v2511_v35 = vrot.slane %v2509_v20, 5  ;;  %v2497_v37 = vrot.slane %v2495_v24, 5 }
 0x23c   : > { %6348 = vmatmul.mubr.msk.bf16.gmra.mrb[8].mxu0 %vm745_vm1, %v5915_v50  ;;  %v2402_v50 = vsel %vm8314_vm4, %v2397_v33, %v2401_v36  ;;  %v2515_v33 = vrot.slane %v2513_v21, 4  ;;  %v2483_v36 = vrot.slane %v2482_v22, 4 }
 0x23d   : > { %6351 = vmatprep.mubr.msk.bf16.mxu0 %vm745_vm1, %v5916_v51  ;;  %v2411_v51 = vrot.slane %v2410_v29, 4  ;;  %v5920_v3 = vcombine.low %v2392_v49, %v2402_v50  ;;  %v2521_v49 = vrot.slane %v2519_v42, 5 }
 0x23e   : > { %v2516_v41 = vor.u32 %v2515_v33, %v2511_v35  ;;  %v2488_v43 = vsel %vm8314_vm4, %v2483_v36, %v2487_v6 }
 0x23f   : > { %v2416_v9 = vsel %vm8314_vm4, %v2411_v51, %v8645_v23  ;;  %v2492_v23 = vor.u32 %v2491_v7, %v2487_v6 }
 0x240   : > { %v5921_v25 = vcombine.low %v2416_v9, %v2426_v10  ;;  %v2517_v48 = vrot.slane %v2516_v41, 4 }
 0x241   : > { %v2493_v29 = vrot.slane %v2492_v23, 4 }
 0x242   : > { %v2522_v51 = vsel %vm8314_vm4, %v2517_v48, %v2521_v49 }
 0x243   : > { %v2498_v44 = vsel %vm8314_vm4, %v2493_v29, %v2497_v37 }
 0x244   : > { %6352 = vmatmul.mubr.msk.bf16.gmra.mrb[12].mxu0 %vm745_vm1, %v5917_v19  ;;  %v2503_v19 = vshll.u32 %v5907_v4, 16  ;;  %v5924_v46 = vcombine.low %v2488_v43, %v2498_v44 }
 0x245   : > { %6355 = vmatprep.mubr.msk.bf16.mxu0 %vm745_vm1, %v5918_v28  ;;  %v2469_v28 = vrot.slane %v2468_v17, 4  ;;  %v8741_v17 = vld [vmem:[#allocation8] ss:$0 sm:$0xff] }
 0x246   : > { %v2505_v34 = vrot.slane %v2503_v19, 5 }
 0x247   : > { %v2474_v39 = vsel %vm8314_vm4, %v2469_v28, %v2473_v31 }
 0x248   : > { %v2506_v40 = vor.u32 %v2505_v34, %v2502_v32 }
 0x24a   : > { %v2507_v47 = vrot.slane %v2506_v40, 4 }
 0x24c   : > { %6356 = vmatmul.mubr.msk.bf16.gmra.mrb[16].mxu0 %vm745_vm1, %v5919_v38  ;;  %v2464_v38 = vsel %vm8314_vm4, %v2459_v27, %v2463_v60  ;;  %v2512_v50 = vsel %vm8314_vm4, %v2507_v47, %v2511_v35 }
 0x24d   : > { %6359 = vmatprep.mubr.msk.bf16.mxu0 %vm745_vm1, %v5920_v3  ;;  %v5923_v45 = vcombine.low %v2464_v38, %v2474_v39  ;;  %v5925_v53 = vcombine.low %v2512_v50, %v2522_v51 }
 0x254   : > { %6360 = vmatmul.mubr.msk.bf16.gmra.mrb[20].mxu0 %vm745_vm1, %v5921_v25 }
 0x255   : > { %6363 = vmatprep.mubr.msk.bf16.mxu0 %vm745_vm1, %v5922_v26 }
 0x25c   : > { %6364 = vmatmul.mubr.msk.bf16.gmra.mrb[24].mxu0 %vm745_vm1, %v5923_v45 }
 0x25d   : > { %6367 = vmatprep.mubr.msk.bf16.mxu0 %vm745_vm1, %v5924_v46 }
 0x264   : > { %6368 = vmatmul.mubr.msk.bf16.gmra.mrb[28].mxu0 %vm745_vm1, %v5925_v53 }
 0x28c   : > { %v6243_v54 = vpop.f32.mrb[0].mxu1 }
 0x28d   : > { %v848_v55 = vpop.f32.mrb[1].mxu1  ;;  %v965_v31 = vadd.f32 %v6243_v54, %v8741_v17 }
 0x28e   : > { %v6244_v56 = vpop.f32.mrb[2].mxu1  ;;  %v963_v34 = vadd.f32 %v8741_v17, %v848_v55 }
 0x28f   : > { %v851_v52 = vpop.f32.mrb[3].mxu1  ;;  %v966_v33 = vadd.f32 %v6244_v56, %v8741_v17 }
 0x290   : > { %v964_v37 = vadd.f32 %v8741_v17, %v851_v52 }
 0x294   : > { %v6247_v57 = vpop.f32.mrb[4].mxu1 }
 0x295   : > { %v864_v58 = vpop.f32.mrb[5].mxu1  ;;  %v969_v45 = vadd.f32 %v6247_v57, %v8741_v17 }
 0x296   : > { %v8697_v59 = vpop.f32.mrb[6].mxu1  ;;  %v967_v47 = vadd.f32 %v8741_v17, %v864_v58 }
 0x297   : > { %v8699_v61 = vpop.f32.mrb[7].mxu1  ;;  %v970_v55 = vadd.f32 %v8697_v59, %v8741_v17 }
 0x298   : > { %v968_v58 = vadd.f32 %v8741_v17, %v8699_v61 }
 0x29c   : > { %v8701_v63 = vpop.f32.mrb[8].mxu1 }
 0x29d   : > { %v8703_v1 = vpop.f32.mrb[9].mxu1  ;;  %v973_v61 = vadd.f32 %v8701_v63, %v8741_v17 }
 0x29e   : > { %v8705_v2 = vpop.f32.mrb[10].mxu1 }
 0x29f   : > { %v8707_v30 = vpop.f32.mrb[11].mxu1 }
 0x2a4   : > { %v8709_v60 = vpop.f32.mrb[12].mxu1 }
 0x2a5   : > { %v8711_v62 = vpop.f32.mrb[13].mxu1 }
 0x2a6   : > { %v8713_v3 = vpop.f32.mrb[14].mxu1 }
 0x2a7   : > { %v8715_v4 = vpop.f32.mrb[15].mxu1 }
 0x2ac   : > { %v8717_v5 = vpop.f32.mrb[16].mxu1 }
 0x2ad   : > { %v8719_v0 = vpop.f32.mrb[17].mxu1 }
 0x2ae   : > { %v8721_v6 = vpop.f32.mrb[18].mxu1 }
 0x2af   : > { %v8723_v7 = vpop.f32.mrb[19].mxu1 }
 0x2b4   : > { %v8725_v8 = vpop.f32.mrb[20].mxu1 }
 0x2b5   : > { %v8727_v9 = vpop.f32.mrb[21].mxu1 }
 0x2b6   : > { %v8729_v10 = vpop.f32.mrb[22].mxu1 }
 0x2b7   : > { %v8731_v11 = vpop.f32.mrb[23].mxu1 }
 0x2bc   : > { %v8733_v12 = vpop.f32.mrb[24].mxu1 }
 0x2bd   : > { %v8735_v14 = vpop.f32.mrb[25].mxu1 }
 0x2be   : > { %v8737_v15 = vpop.f32.mrb[26].mxu1 }
 0x2bf   : > { %v8739_v16 = vpop.f32.mrb[27].mxu1 }
 0x2ff   : > { %v6341_v18 = vpop.f32.mrb[0].mxu0 }
 0x300   : > { %v8744_v19 = vadd.f32 %v6341_v18, %v8741_v17  ;;  %v2664_v20 = vpop.f32.mrb[1].mxu0 }
 0x301   : > { %v8747_v21 = vadd.f32 %v8741_v17, %v2664_v20  ;;  %v6342_v22 = vpop.f32.mrb[2].mxu0 }
 0x302   : > { %v5945_v23 = vmul.f32 -1.442695, %v8744_v19  ;;  %v8751_v24 = vadd.f32 %v6342_v22, %v8741_v17  ;;  %v2667_v25 = vpop.f32.mrb[3].mxu0 }
 0x303   : > { %v5943_v26 = vmul.f32 -1.442695, %v8747_v21  ;;  %v8755_v27 = vadd.f32 %v8741_v17, %v2667_v25 }
 0x304   : > { %6819 = vpow2.f32 %v5945_v23  ;;  %v5946_v28 = vmul.f32 -1.442695, %v8751_v24 }
 0x305   : > { %6821 = vpow2.f32 %v5943_v26  ;;  %v5944_v32 = vmul.f32 -1.442695, %v8755_v27 }
 0x306   : > { %6823 = vpow2.f32 %v5946_v28 }
 0x307   : > { %6825 = vpow2.f32 %v5944_v32  ;;  %v6345_v35 = vpop.f32.mrb[4].mxu0 }
 0x308   : > { %v8762_v36 = vadd.f32 %v6345_v35, %v965_v31  ;;  %v2680_v29 = vpop.f32.mrb[5].mxu0  ;;  %v971_v35 = vadd.f32 %v8741_v17, %v8703_v1  ;;  %v972_v1 = vadd.f32 %v8741_v17, %v8707_v30 }
 0x309   : > { %v8765_v13 = vadd.f32 %v2680_v29, %v963_v34  ;;  %v6346_v38 = vpop.f32.mrb[6].mxu0 }
 0x30a   : > { %v5949_v39 = vmul.f32 -1.442695, %v8762_v36  ;;  %v8768_v40 = vadd.f32 %v6346_v38, %v966_v33  ;;  %v2683_v41 = vpop.f32.mrb[7].mxu0 }
 0x30b   : > { %v5947_v42 = vmul.f32 -1.442695, %v8765_v13  ;;  %v8771_v43 = vadd.f32 %v2683_v41, %v964_v37 }
 0x30c   : > { %6827 = vpow2.f32 %v5949_v39  ;;  %v5950_v44 = vmul.f32 -1.442695, %v8768_v40 }
 0x30d   : > { %6829 = vpow2.f32 %v5947_v42  ;;  %v5948_v46 = vmul.f32 -1.442695, %v8771_v43  ;;  %v974_v42 = vadd.f32 %v8705_v2, %v8741_v17 }
 0x30e   : > { %v6820_v48 = vpop.eup %6819  ;;  %6831 = vpow2.f32 %v5950_v44 }
 0x30f   : > { %v6822_v49 = vpop.eup %6821  ;;  %v2921_v50 = vadd.f32 1.0, %v6820_v48  ;;  %6833 = vpow2.f32 %v5948_v46  ;;  %v6349_v51 = vpop.f32.mrb[8].mxu0 }
 0x310   : > { %v6824_v53 = vpop.eup %6823  ;;  %v2919_v54 = vadd.f32 1.0, %v6822_v49  ;;  %v8779_v56 = vadd.f32 %v6349_v51, %v969_v45  ;;  %v2696_v52 = vpop.f32.mrb[9].mxu0 }
 0x311   : > { %v6826_v57 = vpop.eup %6825  ;;  %6835 = vrcp.f32 %v2921_v50  ;;  %v2922_v18 = vadd.f32 1.0, %v6824_v53  ;;  %v8783_v20 = vadd.f32 %v2696_v52, %v967_v47  ;;  %v6350_v22 = vpop.f32.mrb[10].mxu0 }
 0x312   : > { %6837 = vrcp.f32 %v2919_v54  ;;  %v2920_v23 = vadd.f32 1.0, %v6826_v57  ;;  %v5953_v25 = vmul.f32 -1.442695, %v8779_v56  ;;  %v8786_v26 = vadd.f32 %v6350_v22, %v970_v55  ;;  %v2699_v28 = vpop.f32.mrb[11].mxu0 }
 0x313   : > { %6839 = vrcp.f32 %v2922_v18  ;;  %v5951_v59 = vmul.f32 -1.442695, %v8783_v20  ;;  %v8789_v31 = vadd.f32 %v2699_v28, %v968_v58  ;;  %v977_v57 = vadd.f32 %v8709_v60, %v8741_v17 }
 0x314   : > { %6841 = vrcp.f32 %v2920_v23  ;;  %v5954_v32 = vmul.f32 -1.442695, %v8786_v26  ;;  %v975_v22 = vadd.f32 %v8741_v17, %v8711_v62  ;;  %v978_v60 = vadd.f32 %v8713_v3, %v8741_v17 }
 0x315   : > { %6843 = vpow2.f32 %v5953_v25  ;;  %v5952_v34 = vmul.f32 -1.442695, %v8789_v31 }
 0x316   : > { %v6828_v33 = vpop.eup %6827  ;;  %6845 = vpow2.f32 %v5951_v59 }
 0x317   : > { %v6830_v29 = vpop.eup %6829  ;;  %v2925_v37 = vadd.f32 1.0, %v6828_v33  ;;  %6847 = vpow2.f32 %v5954_v32  ;;  %v6353_v38 = vpop.f32.mrb[12].mxu0 }
 0x318   : > { %v6832_v39 = vpop.eup %6831  ;;  %v2923_v41 = vadd.f32 1.0, %v6830_v29  ;;  %6849 = vpow2.f32 %v5952_v34  ;;  %v8799_v44 = vadd.f32 %v6353_v38, %v973_v61  ;;  %v2712_v63 = vpop.f32.mrb[13].mxu0 }
 0x319   : > { %v6834_v45 = vpop.eup %6833  ;;  %6851 = vrcp.f32 %v2925_v37  ;;  %v2926_v46 = vadd.f32 1.0, %v6832_v39  ;;  %v8803_v47 = vadd.f32 %v2712_v63, %v971_v35  ;;  %v6354_v48 = vpop.f32.mrb[14].mxu0 }
 0x31a   : > { %6853 = vrcp.f32 %v2923_v41  ;;  %v2924_v49 = vadd.f32 1.0, %v6834_v45  ;;  %v5957_v50 = vmul.f32 -1.442695, %v8799_v44  ;;  %v8806_v51 = vadd.f32 %v6354_v48, %v974_v42  ;;  %v2715_v53 = vpop.f32.mrb[15].mxu0 }
 0x31b   : > { %v6836_v2 = vpop.eup %6835  ;;  %6855 = vrcp.f32 %v2926_v46  ;;  %v5955_v54 = vmul.f32 -1.442695, %v8803_v47  ;;  %v8809_v55 = vadd.f32 %v2715_v53, %v972_v1  ;;  %v981_v53 = vadd.f32 %v8717_v5, %v8741_v17 }
 0x31c   : > { %v6838_v52 = vpop.eup %6837  ;;  %6857 = vrcp.f32 %v2924_v49  ;;  %v5958_v30 = vmul.f32 -1.442695, %v8806_v51  ;;  %v3017_v25 = vmul.f32 %v6836_v2, %v8744_v19 }
 0x31d   : > { %v6840_v18 = vpop.eup %6839  ;;  %6859 = vpow2.f32 %v5957_v50  ;;  %v5956_v58 = vmul.f32 -1.442695, %v8809_v55  ;;  %v3015_v32 = vmul.f32 %v6838_v52, %v8747_v21  ;;  %v976_v21 = vadd.f32 %v8741_v17, %v8715_v4 }
 0x31e   : > { %v6842_v23 = vpop.eup %6841  ;;  %v3018_v28 = vmul.f32 %v6840_v18, %v8751_v24  ;;  %6861 = vpow2.f32 %v5955_v54  ;;  %v979_v52 = vadd.f32 %v8741_v17, %v8719_v0 }
 0x31f   : > { %v6844_v59 = vpop.eup %6843  ;;  %v3016_v61 = vmul.f32 %v6842_v23, %v8755_v27  ;;  %6863 = vpow2.f32 %v5958_v30  ;;  %v6357_v34 = vpop.f32.mrb[16].mxu0 }
 0x320   : > { %v6846_v35 = vpop.eup %6845  ;;  %v3048_v33 = vpack.c.bf16 %v3018_v28, %v3017_v25  ;;  %v2929_v62 = vadd.f32 1.0, %v6844_v59  ;;  %6865 = vpow2.f32 %v5956_v58  ;;  %v8823_v29 = vadd.f32 %v6357_v34, %v977_v57  ;;  %v2728_v19 = vpop.f32.mrb[17].mxu0 }
 0x321   : > { %v6848_v24 = vpop.eup %6847  ;;  %v3047_v37 = vpack.c.bf16 %v3016_v61, %v3015_v32  ;;  %v2927_v38 = vadd.f32 1.0, %v6846_v35  ;;  %v8827_v39 = vadd.f32 %v2728_v19, %v975_v22  ;;  %v6358_v27 = vpop.f32.mrb[18].mxu0  ;;  %v982_v58 = vadd.f32 %v8721_v6, %v8741_v17 }
 0x322   : > { %v6850_v41 = vpop.eup %6849  ;;  %6867 = vrcp.f32 %v2929_v62  ;;  %v2930_v3 = vadd.f32 1.0, %v6848_v24  ;;  %v5961_v42 = vmul.f32 -1.442695, %v8823_v29  ;;  %v8830_v63 = vadd.f32 %v6358_v27, %v978_v60  ;;  %v2731_v45 = vpop.f32.mrb[19].mxu0 }
 0x323   : > { %v6852_v46 = vpop.eup %6851  ;;  %6869 = vrcp.f32 %v2927_v38  ;;  %v2928_v1 = vadd.f32 1.0, %v6850_v41  ;;  %v5959_v48 = vmul.f32 -1.442695, %v8827_v39  ;;  %v8833_v49 = vadd.f32 %v2731_v45, %v976_v21  ;;  %6373 = vmatprep.mubr.msk.bf16.mxu1 %vm3078_vm5, %v3047_v37 }
 0x324   : > { %v6854_v4 = vpop.eup %6853  ;;  %6871 = vrcp.f32 %v2930_v3  ;;  %v5962_v50 = vmul.f32 -1.442695, %v8830_v63  ;;  %6374 = vmatmul.mubr.msk.bf16.vlgmr.msra.gmra.mrb[28].mxu1 %vm3078_vm5, %v3048_v33  ;;  %v3021_v57 = vmul.f32 %v6852_v46, %v8762_v36  ;;  %v980_v25 = vadd.f32 %v8741_v17, %v8723_v7 }
 0x325   : > { %v6856_v2 = vpop.eup %6855  ;;  %6873 = vrcp.f32 %v2928_v1  ;;  %v5960_v54 = vmul.f32 -1.442695, %v8833_v49  ;;  %v3019_v5 = vmul.f32 %v6854_v4, %v8765_v13  ;;  %v985_v27 = vadd.f32 %v8725_v8, %v8741_v17 }
 0x326   : > { %v6858_v30 = vpop.eup %6857  ;;  %v3022_v18 = vmul.f32 %v6856_v2, %v8768_v40  ;;  %6875 = vpow2.f32 %v5961_v42  ;;  %v983_v42 = vadd.f32 %v8741_v17, %v8727_v9  ;;  %v986_v46 = vadd.f32 %v8729_v10, %v8741_v17 }
 0x327   : > { %v6860_v22 = vpop.eup %6859  ;;  %v3020_v23 = vmul.f32 %v6858_v30, %v8771_v43  ;;  %6877 = vpow2.f32 %v5959_v48  ;;  %v6361_v28 = vpop.f32.mrb[20].mxu0  ;;  %v984_v8 = vadd.f32 %v8741_v17, %v8731_v11 }
 0x328   : > { %v6862_v0 = vpop.eup %6861  ;;  %v3050_v59 = vpack.c.bf16 %v3022_v18, %v3021_v57  ;;  %v2933_v32 = vadd.f32 1.0, %v6860_v22  ;;  %6879 = vpow2.f32 %v5962_v50  ;;  %v8851_v36 = vadd.f32 %v6361_v28, %v981_v53  ;;  %v2744_v40 = vpop.f32.mrb[21].mxu0 }
 0x329   : > { %v6864_v61 = vpop.eup %6863  ;;  %v3049_v60 = vpack.c.bf16 %v3020_v23, %v3019_v5  ;;  %v2931_v6 = vadd.f32 1.0, %v6862_v0  ;;  %6881 = vpow2.f32 %v5960_v54  ;;  %v8853_v34 = vadd.f32 %v2744_v40, %v979_v52  ;;  %v6362_v13 = vpop.f32.mrb[22].mxu0 }
 0x32a   : > { %v6866_v43 = vpop.eup %6865  ;;  %6883 = vrcp.f32 %v2933_v32  ;;  %v2934_v35 = vadd.f32 1.0, %v6864_v61  ;;  %v5965_v7 = vmul.f32 -1.442695, %v8851_v36  ;;  %v8856_v33 = vadd.f32 %v6362_v13, %v982_v58  ;;  %v2747_v62 = vpop.f32.mrb[23].mxu0 }
 0x32b   : > { %6885 = vrcp.f32 %v2931_v6  ;;  %v2932_v19 = vadd.f32 1.0, %v6866_v43  ;;  %v5963_v24 = vmul.f32 -1.442695, %v8853_v34  ;;  %v8859_v37 = vadd.f32 %v2747_v62, %v980_v25  ;;  %6377 = vmatprep.mubr.msk.bf16.mxu1 %vm3078_vm5, %v3049_v60 }
 0x32c   : > { %v6868_v38 = vpop.eup %6867  ;;  %6887 = vrcp.f32 %v2934_v35  ;;  %v5966_v21 = vmul.f32 -1.442695, %v8856_v33  ;;  %6378 = vmatmul.mubr.msk.bf16.gmra.mrb[32].mxu1 %vm3078_vm5, %v3050_v59  ;;  %v989_v32 = vadd.f32 %v8733_v12, %v8741_v17  ;;  %v987_v60 = vadd.f32 %v8741_v17, %v8735_v14 }
 0x32d   : > { %v6870_v41 = vpop.eup %6869  ;;  %6889 = vrcp.f32 %v2932_v19  ;;  %v5964_v3 = vmul.f32 -1.442695, %v8859_v37  ;;  %v3025_v48 = vmul.f32 %v6868_v38, %v8779_v56 }
 0x32e   : > { %v6872_v45 = vpop.eup %6871  ;;  %6891 = vpow2.f32 %v5965_v7  ;;  %v3023_v2 = vmul.f32 %v6870_v41, %v8783_v20  ;;  %v990_v7 = vadd.f32 %v8737_v15, %v8741_v17 }
 0x32f   : > { %v6874_v1 = vpop.eup %6873  ;;  %v3026_v4 = vmul.f32 %v6872_v45, %v8786_v26  ;;  %6893 = vpow2.f32 %v5963_v24  ;;  %v6365_v50 = vpop.f32.mrb[24].mxu0 }
 0x330   : > { %v6876_v53 = vpop.eup %6875  ;;  %v3024_v9 = vmul.f32 %v6874_v1, %v8789_v31  ;;  %6895 = vpow2.f32 %v5966_v21  ;;  %v8877_v54 = vadd.f32 %v6365_v50, %v985_v27  ;;  %v2760_v52 = vpop.f32.mrb[25].mxu0 }
 0x331   : > { %v6878_v10 = vpop.eup %6877  ;;  %v3052_v30 = vpack.c.bf16 %v3026_v4, %v3025_v48  ;;  %v2937_v57 = vadd.f32 1.0, %v6876_v53  ;;  %6897 = vpow2.f32 %v5964_v3  ;;  %v8879_v56 = vadd.f32 %v2760_v52, %v983_v42  ;;  %v6366_v26 = vpop.f32.mrb[26].mxu0 }
 0x332   : > { %v6880_v18 = vpop.eup %6879  ;;  %v3051_v58 = vpack.c.bf16 %v3024_v9, %v3023_v2  ;;  %v2935_v11 = vadd.f32 1.0, %v6878_v10  ;;  %v8881_v22 = vadd.f32 %v6366_v26, %v986_v46  ;;  %v2763_v5 = vpop.f32.mrb[27].mxu0  ;;  %v5969_v23 = vmul.f32 -1.442695, %v8877_v54 }
 0x333   : > { %v6882_v20 = vpop.eup %6881  ;;  %6899 = vrcp.f32 %v2937_v57  ;;  %v2938_v31 = vadd.f32 1.0, %v6880_v18  ;;  %v8884_v25 = vadd.f32 %v2763_v5, %v984_v8  ;;  %v5967_v59 = vmul.f32 -1.442695, %v8879_v56 }
 0x334   : > { %v6884_v28 = vpop.eup %6883  ;;  %6901 = vrcp.f32 %v2935_v11  ;;  %v2936_v0 = vadd.f32 1.0, %v6882_v20  ;;  %6381 = vmatprep.mubr.msk.bf16.mxu1 %vm3078_vm5, %v3051_v58  ;;  %v5970_v61 = vmul.f32 -1.442695, %v8881_v22 }
 0x335   : > { %v6886_v40 = vpop.eup %6885  ;;  %6903 = vrcp.f32 %v2938_v31  ;;  %6382 = vmatmul.mubr.msk.bf16.gmra.mrb[36].mxu1 %vm3078_vm5, %v3052_v30  ;;  %v5968_v13 = vmul.f32 -1.442695, %v8884_v25  ;;  %v3029_v35 = vmul.f32 %v6884_v28, %v8799_v44 }
 0x336   : > { %v6888_v6 = vpop.eup %6887  ;;  %6905 = vrcp.f32 %v2936_v0  ;;  %v3027_v24 = vmul.f32 %v6886_v40, %v8803_v47  ;;  %v988_v47 = vadd.f32 %v8741_v17, %v8739_v16 }
 0x337   : > { %v6890_v43 = vpop.eup %6889  ;;  %v3030_v12 = vmul.f32 %v6888_v6, %v8806_v51  ;;  %6907 = vpow2.f32 %v5969_v23  ;;  %v6369_v62 = vpop.f32.mrb[28].mxu0 }
 0x338   : > { %v6892_v19 = vpop.eup %6891  ;;  %v3028_v14 = vmul.f32 %v6890_v43, %v8809_v55  ;;  %6909 = vpow2.f32 %v5967_v59  ;;  %v8901_v38 = vadd.f32 %v6369_v62, %v989_v32  ;;  %v2776_v21 = vpop.f32.mrb[29].mxu0 }
 0x339   : > { %v6894_v27 = vpop.eup %6893  ;;  %v3054_v41 = vpack.c.bf16 %v3030_v12, %v3029_v35  ;;  %v2941_v3 = vadd.f32 1.0, %v6892_v19  ;;  %6911 = vpow2.f32 %v5970_v61  ;;  %v8903_v44 = vadd.f32 %v2776_v21, %v987_v60  ;;  %v6370_v51 = vpop.f32.mrb[30].mxu0 }
 0x33a   : > { %v6896_v42 = vpop.eup %6895  ;;  %v3053_v45 = vpack.c.bf16 %v3028_v14, %v3027_v24  ;;  %v2939_v15 = vadd.f32 1.0, %v6894_v27  ;;  %6913 = vpow2.f32 %v5968_v13  ;;  %v2779_v46 = vpop.f32.mrb[31].mxu0  ;;  %v5973_v48 = vmul.f32 -1.442695, %v8901_v38 }
 0x33b   : > { %v6898_v55 = vpop.eup %6897  ;;  %6915 = vrcp.f32 %v2941_v3  ;;  %v2942_v1 = vadd.f32 1.0, %v6896_v42  ;;  %v8908_v4 = vadd.f32 %v6370_v51, %v990_v7  ;;  %v5971_v50 = vmul.f32 -1.442695, %v8903_v44 }
 0x33c   : > { %6917 = vrcp.f32 %v2939_v15  ;;  %v2940_v8 = vadd.f32 1.0, %v6898_v55  ;;  %v8911_v53 = vadd.f32 %v2779_v46, %v988_v47  ;;  %6385 = vmatprep.mubr.msk.bf16.mxu1 %vm3078_vm5, %v3053_v45 }
 0x33d   : > { %v6900_v2 = vpop.eup %6899  ;;  %6919 = vrcp.f32 %v2942_v1  ;;  %v5974_v16 = vmul.f32 -1.442695, %v8908_v4  ;;  %6386 = vmatmul.mubr.msk.bf16.gmra.mrb[40].mxu1 %vm3078_vm5, %v3054_v41 }
 0x33e   : > { %v6902_v17 = vpop.eup %6901  ;;  %6921 = vrcp.f32 %v2940_v8  ;;  %v5972_v9 = vmul.f32 -1.442695, %v8911_v53  ;;  %v3033_v30 = vmul.f32 %v6900_v2, %v8823_v29  ;;  %v10456_v8 = vmov 0.0  }
 0x33f   : > { %v6904_v52 = vpop.eup %6903  ;;  %6923 = vpow2.f32 %v5973_v48  ;;  %v3031_v18 = vmul.f32 %v6902_v17, %v8827_v39  ;;  %3519 = vst.msk [vmem:[#allocation2 + $0x30] sm:$0xff] %vm3512_vm6, %v10456_v8  ;;  %3520 = vst.msk [vmem:[#allocation2 + $0x38] sm:$0xff] %vm3512_vm6, %v10456_v8  ;;  %6405 = vmatprep.subr.bf16.mxu1 %v10456_v8 }
 0x340   : > { %v6906_v10 = vpop.eup %6905  ;;  %v3034_v57 = vmul.f32 %v6904_v52, %v8830_v63  ;;  %6925 = vpow2.f32 %v5971_v50  ;;  %3513 = vst.msk [vmem:[#allocation2] sm:$0xff] %vm3512_vm6, %v10456_v8  ;;  %3514 = vst.msk [vmem:[#allocation2 + $0x8] sm:$0xff] %vm3512_vm6, %v10456_v8 }
 0x341   : > { %v6908_v26 = vpop.eup %6907  ;;  %v3032_v58 = vmul.f32 %v6906_v10, %v8833_v49  ;;  %6927 = vpow2.f32 %v5974_v16  ;;  %3515 = vst.msk [vmem:[#allocation2 + $0x10] sm:$0xff] %vm3512_vm6, %v10456_v8  ;;  %3516 = vst.msk [vmem:[#allocation2 + $0x18] sm:$0xff] %vm3512_vm6, %v10456_v8 }
 0x342   : > { %v6910_v11 = vpop.eup %6909  ;;  %v3056_v5 = vpack.c.bf16 %v3034_v57, %v3033_v30  ;;  %v2945_v20 = vadd.f32 1.0, %v6908_v26  ;;  %6929 = vpow2.f32 %v5972_v9  ;;  %3517 = vst.msk [vmem:[#allocation2 + $0x20] sm:$0xff] %vm3512_vm6, %v10456_v8  ;;  %3518 = vst.msk [vmem:[#allocation2 + $0x28] sm:$0xff] %vm3512_vm6, %v10456_v8 }
 0x343   : > { %v6912_v31 = vpop.eup %6911  ;;  %v3055_v23 = vpack.c.bf16 %v3032_v58, %v3031_v18  ;;  %v2943_v28 = vadd.f32 1.0, %v6910_v11  ;;  %3521 = vst.msk [vmem:[#allocation2 + $0x40] sm:$0xff] %vm3512_vm6, %v10456_v8  ;;  %3522 = vst.msk [vmem:[#allocation2 + $0x48] sm:$0xff] %vm3512_vm6, %v10456_v8 }
 0x344   : > { %v6914_v0 = vpop.eup %6913  ;;  %6931 = vrcp.f32 %v2945_v20  ;;  %v2946_v59 = vadd.f32 1.0, %v6912_v31  ;;  %3523 = vst.msk [vmem:[#allocation2 + $0x50] sm:$0xff] %vm3512_vm6, %v10456_v8  ;;  %3524 = vst.msk [vmem:[#allocation2 + $0x58] sm:$0xff] %vm3512_vm6, %v10456_v8 }
 0x345   : > { %v6916_v29 = vpop.eup %6915  ;;  %6933 = vrcp.f32 %v2943_v28  ;;  %v2944_v63 = vadd.f32 1.0, %v6914_v0  ;;  %6389 = vmatprep.mubr.msk.bf16.mxu1 %vm3078_vm5, %v3055_v23  ;;  %3525 = vst.msk [vmem:[#allocation2 + $0x60] sm:$0xff] %vm3512_vm6, %v10456_v8  ;;  %3526 = vst.msk [vmem:[#allocation2 + $0x68] sm:$0xff] %vm3512_vm6, %v10456_v8 }
 0x346   : > { %v6918_v32 = vpop.eup %6917  ;;  %6935 = vrcp.f32 %v2946_v59  ;;  %6390 = vmatmul.mubr.msk.bf16.gmra.mrb[44].mxu1 %vm3078_vm5, %v3056_v5  ;;  %v3037_v40 = vmul.f32 %v6916_v29, %v8851_v36  ;;  %3527 = vst.msk [vmem:[#allocation2 + $0x70] sm:$0xff] %vm3512_vm6, %v10456_v8  ;;  %3528 = vst.msk [vmem:[#allocation2 + $0x78] sm:$0xff] %vm3512_vm6, %v10456_v8 }
 0x347   : > { %v6920_v39 = vpop.eup %6919  ;;  %6937 = vrcp.f32 %v2944_v63  ;;  %v3035_v6 = vmul.f32 %v6918_v32, %v8853_v34  ;;  %3529 = vst.msk [vmem:[#allocation2 + $0x80] sm:$0xff] %vm3512_vm6, %v10456_v8  ;;  %3530 = vst.msk [vmem:[#allocation2 + $0x88] sm:$0xff] %vm3512_vm6, %v10456_v8 }
 0x348   : > { %v6922_v49 = vpop.eup %6921  ;;  %v3038_v61 = vmul.f32 %v6920_v39, %v8856_v33  ;;  %3531 = vst.msk [vmem:[#allocation2 + $0x90] sm:$0xff] %vm3512_vm6, %v10456_v8  ;;  %3532 = vst.msk [vmem:[#allocation2 + $0x98] sm:$0xff] %vm3512_vm6, %v10456_v8 }
 0x349   : > { %v6924_v60 = vpop.eup %6923  ;;  %v3036_v13 = vmul.f32 %v6922_v49, %v8859_v37  ;;  %3533 = vst.msk [vmem:[#allocation2 + $0xa0] sm:$0xff] %vm3512_vm6, %v10456_v8  ;;  %3534 = vst.msk [vmem:[#allocation2 + $0xa8] sm:$0xff] %vm3512_vm6, %v10456_v8 }
 0x34a   : > { %v6926_v43 = vpop.eup %6925  ;;  %v3058_v35 = vpack.c.bf16 %v3038_v61, %v3037_v40  ;;  %v2949_v12 = vadd.f32 1.0, %v6924_v60  ;;  %3535 = vst.msk [vmem:[#allocation2 + $0xb0] sm:$0xff] %vm3512_vm6, %v10456_v8  ;;  %3536 = vst.msk [vmem:[#allocation2 + $0xb8] sm:$0xff] %vm3512_vm6, %v10456_v8 }
 0x34b   : > { %v6928_v7 = vpop.eup %6927  ;;  %v3057_v62 = vpack.c.bf16 %v3036_v13, %v3035_v6  ;;  %v2947_v19 = vadd.f32 1.0, %v6926_v43  ;;  %3537 = vst.msk [vmem:[#allocation2 + $0xc0] sm:$0xff] %vm3512_vm6, %v10456_v8  ;;  %3538 = vst.msk [vmem:[#allocation2 + $0xc8] sm:$0xff] %vm3512_vm6, %v10456_v8 }
 0x34c   : > { %v6930_v24 = vpop.eup %6929  ;;  %6939 = vrcp.f32 %v2949_v12  ;;  %v2950_v14 = vadd.f32 1.0, %v6928_v7  ;;  %3539 = vst.msk [vmem:[#allocation2 + $0xd0] sm:$0xff] %vm3512_vm6, %v10456_v8  ;;  %3540 = vst.msk [vmem:[#allocation2 + $0xd8] sm:$0xff] %vm3512_vm6, %v10456_v8 }
 0x34d   : > { %6941 = vrcp.f32 %v2947_v19  ;;  %v2948_v21 = vadd.f32 1.0, %v6930_v24  ;;  %6393 = vmatprep.mubr.msk.bf16.mxu1 %vm3078_vm5, %v3057_v62  ;;  %3541 = vst.msk [vmem:[#allocation2 + $0xe0] sm:$0xff] %vm3512_vm6, %v10456_v8  ;;  %3542 = vst.msk [vmem:[#allocation2 + $0xe8] sm:$0xff] %vm3512_vm6, %v10456_v8 }
 0x34e   : > { %v6932_v36 = vpop.eup %6931  ;;  %6943 = vrcp.f32 %v2950_v14  ;;  %6394 = vmatmul.mubr.msk.bf16.gmra.mrb[48].mxu1 %vm3078_vm5, %v3058_v35  ;;  %3543 = vst.msk [vmem:[#allocation2 + $0xf0] sm:$0xff] %vm3512_vm6, %v10456_v8  ;;  %3544 = vst.msk [vmem:[#allocation2 + $0xf8] sm:$0xff] %vm3512_vm6, %v10456_v8  ;;  %v3641_v14 = vlaneseq }
 0x34f   : > { %v6934_v34 = vpop.eup %6933  ;;  %6945 = vrcp.f32 %v2948_v21  ;;  %v3041_v27 = vmul.f32 %v6932_v36, %v8877_v54  ;;  %3545 = vst.msk [vmem:[#allocation2 + $0x100] sm:$0xff] %vm3512_vm6, %v10456_v8  ;;  %3546 = vst.msk [vmem:[#allocation2 + $0x108] sm:$0xff] %vm3512_vm6, %v10456_v8 }
 0x350   : > { %v6936_v33 = vpop.eup %6935  ;;  %v3039_v3 = vmul.f32 %v6934_v34, %v8879_v56  ;;  %3547 = vst.msk [vmem:[#allocation2 + $0x110] sm:$0xff] %vm3512_vm6, %v10456_v8  ;;  %3548 = vst.msk [vmem:[#allocation2 + $0x118] sm:$0xff] %vm3512_vm6, %v10456_v8 }
 0x351   : > { %v6938_v37 = vpop.eup %6937  ;;  %v3042_v41 = vmul.f32 %v6936_v33, %v8881_v22  ;;  %3549 = vst.msk [vmem:[#allocation2 + $0x120] sm:$0xff] %vm3512_vm6, %v10456_v8  ;;  %3550 = vst.msk [vmem:[#allocation2 + $0x128] sm:$0xff] %vm3512_vm6, %v10456_v8 }
 0x352   : > { %v3040_v51 = vmul.f32 %v6938_v37, %v8884_v25  ;;  %3551 = vst.msk [vmem:[#allocation2 + $0x130] sm:$0xff] %vm3512_vm6, %v10456_v8  ;;  %3552 = vst.msk [vmem:[#allocation2 + $0x138] sm:$0xff] %vm3512_vm6, %v10456_v8 }
 0x353   : > { %v3060_v42 = vpack.c.bf16 %v3042_v41, %v3041_v27  ;;  %3553 = vst.msk [vmem:[#allocation2 + $0x140] sm:$0xff] %vm3512_vm6, %v10456_v8  ;;  %3554 = vst.msk [vmem:[#allocation2 + $0x148] sm:$0xff] %vm3512_vm6, %v10456_v8  ;;  %v9099_v41 = vshrl.u32 %v3641_v14, 7 }
 0x354   : > { %v3059_v45 = vpack.c.bf16 %v3040_v51, %v3039_v3  ;;  %3555 = vst.msk [vmem:[#allocation2 + $0x150] sm:$0xff] %vm3512_vm6, %v10456_v8  ;;  %3556 = vst.msk [vmem:[#allocation2 + $0x158] sm:$0xff] %vm3512_vm6, %v10456_v8 }
 0x355   : > { %3557 = vst.msk [vmem:[#allocation2 + $0x160] sm:$0xff] %vm3512_vm6, %v10456_v8  ;;  %3558 = vst.msk [vmem:[#allocation2 + $0x168] sm:$0xff] %vm3512_vm6, %v10456_v8 }
 0x356   : > { %v6940_v15 = vpop.eup %6939  ;;  %6397 = vmatprep.mubr.msk.bf16.mxu1 %vm3078_vm5, %v3059_v45  ;;  %3559 = vst.msk [vmem:[#allocation2 + $0x170] sm:$0xff] %vm3512_vm6, %v10456_v8  ;;  %3560 = vst.msk [vmem:[#allocation2 + $0x178] sm:$0xff] %vm3512_vm6, %v10456_v8 }
 0x357   : > { %v6942_v47 = vpop.eup %6941  ;;  %6398 = vmatmul.mubr.msk.bf16.gmra.mrb[52].mxu1 %vm3078_vm5, %v3060_v42  ;;  %v3045_v1 = vmul.f32 %v6940_v15, %v8901_v38  ;;  %3561 = vst.msk [vmem:[#allocation2 + $0x180] sm:$0xff] %vm3512_vm6, %v10456_v8  ;;  %3562 = vst.msk [vmem:[#allocation2 + $0x188] sm:$0xff] %vm3512_vm6, %v10456_v8  ;;  %v9050_v38 = vld [vmem:[#allocation11] ss:$0 sm:$0xff] }
 0x358   : > { %v6944_v46 = vpop.eup %6943  ;;  %v3043_v22 = vmul.f32 %v6942_v47, %v8903_v44  ;;  %3563 = vst.msk [vmem:[#allocation2 + $0x190] sm:$0xff] %vm3512_vm6, %v10456_v8  ;;  %3564 = vst.msk [vmem:[#allocation2 + $0x198] sm:$0xff] %vm3512_vm6, %v10456_v8 }
 0x359   : > { %v6946_v55 = vpop.eup %6945  ;;  %v3046_v54 = vmul.f32 %v6944_v46, %v8908_v4  ;;  %3565 = vst.msk [vmem:[#allocation2 + $0x1a0] sm:$0xff] %vm3512_vm6, %v10456_v8  ;;  %3566 = vst.msk [vmem:[#allocation2 + $0x1a8] sm:$0xff] %vm3512_vm6, %v10456_v8 }
 0x35a   : > { %v3044_v56 = vmul.f32 %v6946_v55, %v8911_v53  ;;  %10527 = vst [vmem:[#allocation36_spill] sm:$0xff] %v9099_v41 }
 0x35b   : > { %v3062_v48 = vpack.c.bf16 %v3046_v54, %v3045_v1  ;;  %v10455_v54 = vsub.s32 0, %v9099_v41 }
 0x35c   : > { %v3061_v25 = vpack.c.bf16 %v3044_v56, %v3043_v22  ;;  %v9112_v56 = vld [vmem:[#allocation12] sm:$0xff] }
 0x35e   : > { %6401 = vmatprep.mubr.msk.bf16.mxu1 %vm3078_vm5, %v3061_v25 }
 0x35f   : > { %6402 = vmatmul.mubr.msk.bf16.gmra.mrb[56].mxu1 %vm3078_vm5, %v3062_v48 }
 0x3f7   : > { %v6375_v44 = vpop.f32.mrb[28].mxu1 }
 0x3f8   : > { %v9053_v4 = vadd.f32 %v6375_v44, %v9050_v38  ;;  %v3161_v50 = vpop.f32.mrb[29].mxu1 }
 0x3f9   : > { %v9056_v53 = vadd.f32 %v9050_v38, %v3161_v50  ;;  %v6376_v2 = vpop.f32.mrb[30].mxu1 }
 0x3fa   : > { %v5995_v16 = vmul.f32 -1.442695, %v9053_v4  ;;  %v9060_v17 = vadd.f32 %v6376_v2, %v9050_v38  ;;  %v3164_v9 = vpop.f32.mrb[31].mxu1 }
 0x3fb   : > { %v5993_v52 = vmul.f32 -1.442695, %v9056_v53  ;;  %v9064_v10 = vadd.f32 %v9050_v38, %v3164_v9 }
 0x3fc   : > { %6947 = vpow2.f32 %v5995_v16  ;;  %v5996_v30 = vmul.f32 -1.442695, %v9060_v17 }
 0x3fd   : > { %6949 = vpow2.f32 %v5993_v52  ;;  %v5994_v57 = vmul.f32 -1.442695, %v9064_v10  ;;  %v3609_v52 = vld [vmem:[#allocation2] sm:$0xff] }
 0x3fe   : > { %6951 = vpow2.f32 %v5996_v30 }
 0x3ff   : > { %6953 = vpow2.f32 %v5994_v57  ;;  %v6379_v26 = vpop.f32.mrb[32].mxu1 }
 0x400   : > { %v9069_v18 = vadd.f32 %v6379_v26, %v9050_v38  ;;  %v3177_v58 = vpop.f32.mrb[33].mxu1 }
 0x401   : > { %v9072_v11 = vadd.f32 %v9050_v38, %v3177_v58  ;;  %v6380_v5 = vpop.f32.mrb[34].mxu1 }
 0x402   : > { %v5999_v20 = vmul.f32 -1.442695, %v9069_v18  ;;  %v3180_v31 = vpop.f32.mrb[35].mxu1  ;;  %v9077_v28 = vadd.f32 %v6380_v5, %v9050_v38 }
 0x403   : > { %v5997_v23 = vmul.f32 -1.442695, %v9072_v11  ;;  %v9080_v59 = vadd.f32 %v9050_v38, %v3180_v31 }
 0x404   : > { %6955 = vpow2.f32 %v5999_v20  ;;  %v6000_v60 = vmul.f32 -1.442695, %v9077_v28 }
 0x405   : > { %6957 = vpow2.f32 %v5997_v23  ;;  %v5998_v35 = vmul.f32 -1.442695, %v9080_v59 }
 0x406   : > { %v6948_v0 = vpop.eup %6947 }
 0x407   : > { %v6950_v29 = vpop.eup %6949  ;;  %v3386_v63 = vadd.f32 1.0, %v6948_v0 }
 0x408   : > { %v6952_v32 = vpop.eup %6951  ;;  %v3384_v39 = vadd.f32 1.0, %v6950_v29  ;;  %v6383_v49 = vpop.f32.mrb[36].mxu1  ;;  %v9137_v29 = vld [vmem:[#allocation14] ss:$0 sm:$0xff] }
 0x409   : > { %v6954_v40 = vpop.eup %6953  ;;  %6959 = vrcp.f32 %v3386_v63  ;;  %v3387_v61 = vadd.f32 1.0, %v6952_v32  ;;  %v9084_v6 = vadd.f32 %v6383_v49, %v9050_v38  ;;  %v3193_v13 = vpop.f32.mrb[37].mxu1  ;;  %v3843_v32 = vsub.s32 2, %v9099_v41 }
 0x40a   : > { %6961 = vrcp.f32 %v3384_v39  ;;  %v3385_v43 = vadd.f32 1.0, %v6954_v40  ;;  %v9088_v12 = vadd.f32 %v9050_v38, %v3193_v13  ;;  %v6384_v7 = vpop.f32.mrb[38].mxu1 }
 0x40b   : > { %6963 = vrcp.f32 %v3387_v61  ;;  %v6003_v62 = vmul.f32 -1.442695, %v9084_v6  ;;  %v9092_v19 = vadd.f32 %v6384_v7, %v9050_v38  ;;  %v3196_v24 = vpop.f32.mrb[39].mxu1  ;;  %v3709_v61 = vld [vmem:[#allocation2 + $0x1] sm:$0xff] }
 0x40c   : > { %6965 = vrcp.f32 %v3385_v43  ;;  %v6001_v21 = vmul.f32 -1.442695, %v9088_v12  ;;  %v9096_v36 = vadd.f32 %v9050_v38, %v3196_v24  ;;  %v3943_v43 = vsub.s32 3, %v9099_v41 }
 0x40d   : > { %6967 = vpow2.f32 %v6000_v60  ;;  %v6004_v27 = vmul.f32 -1.442695, %v9092_v19 }
 0x40e   : > { %v6956_v34 = vpop.eup %6955  ;;  %6969 = vpow2.f32 %v5998_v35  ;;  %v6002_v51 = vmul.f32 -1.442695, %v9096_v36 }
 0x40f   : > { %v6958_v33 = vpop.eup %6957  ;;  %v3390_v37 = vadd.f32 1.0, %v6956_v34  ;;  %6971 = vpow2.f32 %v6003_v62 }
 0x410   : > { %v3388_v3 = vadd.f32 1.0, %v6958_v33  ;;  %6973 = vpow2.f32 %v6001_v21  ;;  %v9102_v42 = vpop.f32.mrb[40].mxu1  ;;  %v3809_v21 = vld [vmem:[#allocation2 + $0x2] sm:$0xff] }
 0x411   : > { %6975 = vrcp.f32 %v3390_v37  ;;  %v9104_v45 = vpop.f32.mrb[41].mxu1  ;;  %v3710_v37 = vld [vmem:[#allocation2 + $0x9] sm:$0xff] }
 0x412   : > { %6977 = vrcp.f32 %v3388_v3  ;;  %v9106_v15 = vpop.f32.mrb[42].mxu1 }
 0x413   : > { %v6960_v47 = vpop.eup %6959  ;;  %6979 = vpow2.f32 %v6004_v27  ;;  %v9108_v46 = vpop.f32.mrb[43].mxu1 }
 0x414   : > { %v6962_v55 = vpop.eup %6961  ;;  %v3482_v1 = vmul.f32 %v6960_v47, %v9053_v4  ;;  %6981 = vpow2.f32 %v6002_v51  ;;  %v9122_v4 = vrot.slane %v9112_v56, %v10455_v54  ;;  %v9162_v51 = vrot.slane %v9112_v56, %v3943_v43 }
 0x415   : > { %v6964_v22 = vpop.eup %6963  ;;  %v3480_v48 = vmul.f32 %v6962_v55, %v9056_v53  ;;  %v3743_v53 = vsub.s32 1, %v9099_v41 }
 0x416   : > { %v6966_v25 = vpop.eup %6965  ;;  %3570 = vst.msk [vmem:[#allocation2 + $0x31] sm:$0xff] %vm3512_vm6, %v3482_v1  ;;  %v3483_v44 = vmul.f32 %v6964_v22, %v9060_v17  ;;  %v3645_v5 = vmul.f32 %v9122_v4, %v3609_v52 }
 0x417   : > { %v6968_v50 = vpop.eup %6967  ;;  %3568 = vst.msk [vmem:[#allocation2 + $0x19] sm:$0xff] %vm3512_vm6, %v3480_v48  ;;  %v3481_v2 = vmul.f32 %v6966_v25, %v9064_v10  ;;  %v9140_v63 = vrot.slane %v9112_v56, %v3743_v53  ;;  %v4043_v25 = vsub.s32 4, %v9099_v41  ;;  %v4143_v53 = vsub.s32 5, %v9099_v41 }
 0x418   : > { %v6970_v16 = vpop.eup %6969  ;;  %3571 = vst.msk [vmem:[#allocation2 + $0x39] sm:$0xff] %vm3512_vm6, %v3483_v44  ;;  %v3391_v31 = vadd.f32 1.0, %v6968_v50  ;;  %v3677_v35 = vadd.f32 %v9137_v29, %v3645_v5  ;;  %v3810_v44 = vld [vmem:[#allocation2 + $0xa] sm:$0xff] }
 0x419   : > { %v6972_v9 = vpop.eup %6971  ;;  %3569 = vst.msk [vmem:[#allocation2 + $0x21] sm:$0xff] %vm3512_vm6, %v3481_v2  ;;  %v9127_v17 = vpop.f32.mrb[44].mxu1  ;;  %v3389_v49 = vadd.f32 1.0, %v6970_v16  ;;  %v3745_v62 = vmul.f32 %v9140_v63, %v3709_v61  ;;  %v3746_v48 = vmul.f32 %v9140_v63, %v3710_v37  ;;  %v9175_v5 = vrot.slane %v9112_v56, %v4043_v25 }
 0x41a   : > { %v6974_v30 = vpop.eup %6973  ;;  %v9129_v57 = vpop.f32.mrb[45].mxu1  ;;  %v3394_v60 = vadd.f32 1.0, %v6972_v9  ;;  %6983 = vrcp.f32 %v3391_v31 }
 0x41b   : > { %v6976_v10 = vpop.eup %6975  ;;  %v9131_v26 = vpop.f32.mrb[46].mxu1  ;;  %v3392_v13 = vadd.f32 1.0, %v6974_v30  ;;  %6985 = vrcp.f32 %v3389_v49  ;;  %v3777_v47 = vadd.f32 %v3745_v62, %v3677_v35 }
 0x41c   : > { %v6978_v58 = vpop.eup %6977  ;;  %v3486_v20 = vmul.f32 %v6976_v10, %v9069_v18  ;;  %v9135_v23 = vpop.f32.mrb[47].mxu1  ;;  %v3610_v18 = vld [vmem:[#allocation2 + $0x8] sm:$0xff]  ;;  %6987 = vrcp.f32 %v3394_v60  ;;  %v9186_v60 = vadd.f32 %v9050_v38, %v9104_v45 }
 0x41d   : > { %v6980_v0 = vpop.eup %6979  ;;  %v3484_v39 = vmul.f32 %v6978_v58, %v9072_v11  ;;  %v9150_v11 = vrot.slane %v9112_v56, %v3843_v32  ;;  %v3646_v34 = vmul.f32 %v9122_v4, %v3610_v18  ;;  %6989 = vrcp.f32 %v3392_v13  ;;  %v3613_v37 = vld [vmem:[#allocation2 + $0x30] sm:$0xff] }
 0x41e   : > { %v6982_v40 = vpop.eup %6981  ;;  %3574 = vst.msk [vmem:[#allocation2 + $0x61] sm:$0xff] %vm3512_vm6, %v3486_v20  ;;  %v3395_v7 = vadd.f32 1.0, %v6980_v0  ;;  %v3611_v1 = vld [vmem:[#allocation2 + $0x18] sm:$0xff]  ;;  %v9179_v20 = vadd.f32 %v9102_v42, %v9050_v38  ;;  %v4344_v13 = vsub.s32 7, %v9099_v41  ;;  %v9191_v42 = vrot.slane %v9112_v56, %v4143_v53 }
 0x41f   : > { %3572 = vst.msk [vmem:[#allocation2 + $0x49] sm:$0xff] %vm3512_vm6, %v3484_v39  ;;  %v3393_v24 = vadd.f32 1.0, %v6982_v40  ;;  %v3845_v55 = vmul.f32 %v9150_v11, %v3809_v21  ;;  %v3678_v22 = vadd.f32 %v9137_v29, %v3646_v34  ;;  %v3945_v2 = vmul.f32 %v9162_v51, %v3611_v1  ;;  %v3711_v32 = vld [vmem:[#allocation2 + $0x19] sm:$0xff] }
 0x420   : > { %6991 = vrcp.f32 %v3395_v7  ;;  %v3647_v9 = vmul.f32 %v9122_v4, %v3611_v1  ;;  %v3846_v30 = vmul.f32 %v9150_v11, %v3810_v44  ;;  %v3612_v39 = vld [vmem:[#allocation2 + $0x20] sm:$0xff]  ;;  %v4244_v40 = vsub.s32 6, %v9099_v41 }
 0x421   : > { %v9152_v14 = vpop.f32.mrb[48].mxu1  ;;  %6993 = vrcp.f32 %v3393_v24  ;;  %v3877_v50 = vadd.f32 %v3845_v55, %v3777_v47  ;;  %v3778_v52 = vadd.f32 %v3746_v48, %v3678_v22  ;;  %v4045_v62 = vmul.f32 %v9175_v5, %v3711_v32  ;;  %v3811_v1 = vld [vmem:[#allocation2 + $0x1a] sm:$0xff] }
 0x422   : > { %v9155_v33 = vpop.f32.mrb[49].mxu1  ;;  %v3679_v43 = vadd.f32 %v9137_v29, %v3647_v9  ;;  %v3946_v24 = vmul.f32 %v9162_v51, %v3612_v39  ;;  %v6007_v34 = vmul.f32 -1.442695, %v9179_v20  ;;  %v3747_v47 = vmul.f32 %v9140_v63, %v3711_v32  ;;  %v3712_v9 = vld [vmem:[#allocation2 + $0x21] sm:$0xff] }
 0x423   : > { %v9157_v27 = vpop.f32.mrb[50].mxu1  ;;  %v3977_v61 = vadd.f32 %v3945_v2, %v3877_v50  ;;  %v3878_v35 = vadd.f32 %v3846_v30, %v3778_v52  ;;  %v3648_v55 = vmul.f32 %v9122_v4, %v3612_v39  ;;  %v9204_v48 = vadd.f32 %v9106_v15, %v9050_v38 }
 0x424   : > { %v9159_v3 = vpop.f32.mrb[51].mxu1  ;;  %v6984_v16 = vpop.eup %6983  ;;  %v6005_v44 = vmul.f32 -1.442695, %v9186_v60  ;;  %v9211_v50 = vadd.f32 %v9050_v38, %v9108_v46  ;;  %v9221_v52 = vrot.slane %v9112_v56, %v4244_v40  ;;  %v4145_v46 = vmul.f32 %v9191_v42, %v3811_v1 }
 0x425   : > { %v6986_v58 = vpop.eup %6985  ;;  %v3487_v21 = vmul.f32 %v6984_v16, %v9077_v28  ;;  %v4077_v25 = vadd.f32 %v4045_v62, %v3977_v61  ;;  %v3779_v16 = vadd.f32 %v3747_v47, %v3679_v43  ;;  %v3978_v30 = vadd.f32 %v3946_v24, %v3878_v35  ;;  %v3812_v61 = vld [vmem:[#allocation2 + $0x22] sm:$0xff] }
 0x426   : > { %v6988_v0 = vpop.eup %6987  ;;  %v3485_v22 = vmul.f32 %v6986_v58, %v9080_v59  ;;  %10529 = vst [vmem:[#allocation38_spill] sm:$0xff] %v9211_v50  ;;  %v9226_v58 = vrot.slane %v9112_v56, %v4344_v13  ;;  %v4046_v32 = vmul.f32 %v9175_v5, %v3712_v9  ;;  %6995 = vpow2.f32 %v6007_v34 }
 0x427   : > { %v6990_v49 = vpop.eup %6989  ;;  %3575 = vst.msk [vmem:[#allocation2 + $0x69] sm:$0xff] %vm3512_vm6, %v3487_v21  ;;  %v3490_v28 = vmul.f32 %v6988_v0, %v9084_v6  ;;  %v3649_v6 = vmul.f32 %v9122_v4, %v3613_v37  ;;  %v3614_v0 = vld [vmem:[#allocation2 + $0x38] sm:$0xff]  ;;  %v4177_v39 = vadd.f32 %v4145_v46, %v4077_v25  ;;  %v6006_v56 = vmul.f32 -1.442695, %v9211_v50 }
 0x428   : > { %3573 = vst.msk [vmem:[#allocation2 + $0x51] sm:$0xff] %vm3512_vm6, %v3485_v22  ;;  %v3488_v59 = vmul.f32 %v6990_v49, %v9088_v12  ;;  %v3680_v12 = vadd.f32 %v9137_v29, %v3648_v55  ;;  %v3713_v49 = vld [vmem:[#allocation2 + $0x31] sm:$0xff]  ;;  %v3748_v40 = vmul.f32 %v9140_v63, %v3712_v9  ;;  %6997 = vpow2.f32 %v6005_v44  ;;  %v3714_v55 = vld [vmem:[#allocation2 + $0x39] sm:$0xff]  ;;  %v3615_v44 = vld [vmem:[#allocation2 + $0x48] sm:$0xff] }
 0x429   : > { %3578 = vst.msk [vmem:[#allocation2 + $0x91] sm:$0xff] %vm3512_vm6, %v3490_v28  ;;  %v9239_v13 = vadd.f32 %v9127_v17, %v9050_v38  ;;  %v3681_v43 = vadd.f32 %v9137_v29, %v3649_v6  ;;  %v4246_v35 = vmul.f32 %v9221_v52, %v3613_v37  ;;  %v4078_v62 = vadd.f32 %v4046_v32, %v3978_v30  ;;  %v3813_v22 = vld [vmem:[#allocation2 + $0x32] sm:$0xff]  ;;  %v9264_v30 = vld [vmem:[#allocation12 + $0x8] ss:$0 sm:$0xff] }
 0x42a   : > { %v9172_v10 = vpop.f32.mrb[52].mxu1  ;;  %v6992_v18 = vpop.eup %6991  ;;  %3576 = vst.msk [vmem:[#allocation2 + $0x79] sm:$0xff] %vm3512_vm6, %v3488_v59  ;;  %v3947_v24 = vmul.f32 %v9162_v51, %v3613_v37  ;;  %v3780_v21 = vadd.f32 %v3748_v40, %v3680_v12  ;;  %v9247_v34 = vadd.f32 %v9050_v38, %v9129_v57  ;;  %v3749_v47 = vmul.f32 %v9140_v63, %v3713_v49 }
 0x42b   : > { %v9181_v31 = vpop.f32.mrb[53].mxu1  ;;  %v6994_v7 = vpop.eup %6993  ;;  %v3491_v15 = vmul.f32 %v6992_v18, %v9092_v19  ;;  %v3847_v19 = vmul.f32 %v9150_v11, %v3811_v1  ;;  %10531 = vst [vmem:[#allocation40_spill] sm:$0xff] %v9239_v13  ;;  %v4146_v17 = vmul.f32 %v9191_v42, %v3812_v61  ;;  %v4278_v1 = vadd.f32 %v4246_v35, %v4177_v39 }
 0x42c   : > { %v9197_v45 = vpop.f32.mrb[54].mxu1  ;;  %v3489_v53 = vmul.f32 %v6994_v7, %v9096_v36  ;;  %v6008_v36 = vmul.f32 -1.442695, %v9204_v48  ;;  %v3650_v7 = vmul.f32 %v9122_v4, %v3614_v0  ;;  %10532 = vst [vmem:[#allocation41_spill] sm:$0xff] %v9247_v34  ;;  %v3848_v25 = vmul.f32 %v9150_v11, %v3812_v61 }
 0x42d   : > { %10528 = vst [vmem:[#allocation37_spill] sm:$0xff] %v9197_v45  ;;  %v9213_v2 = vpop.f32.mrb[55].mxu1  ;;  %3579 = vst.msk [vmem:[#allocation2 + $0x99] sm:$0xff] %vm3512_vm6, %v3491_v15  ;;  %v3879_v18 = vadd.f32 %v3847_v19, %v3779_v16  ;;  %v9253_v37 = vmul.f32 -1.442695, %v9239_v13  ;;  %v9257_v16 = vadd.f32 %v9131_v26, %v9050_v38  ;;  %v3781_v9 = vadd.f32 %v3749_v47, %v3681_v43  ;;  %v3814_v26 = vld [vmem:[#allocation2 + $0x3a] sm:$0xff] }
 0x42e   : > { %10530 = vst [vmem:[#allocation39_spill] sm:$0xff] %v9213_v2  ;;  %3577 = vst.msk [vmem:[#allocation2 + $0x81] sm:$0xff] %vm3512_vm6, %v3489_v53  ;;  %6999 = vpow2.f32 %v6008_v36  ;;  %v4346_v59 = vmul.f32 %v9226_v58, %v3713_v49  ;;  %v3682_v15 = vadd.f32 %v9137_v29, %v3650_v7  ;;  %v4178_v53 = vadd.f32 %v4146_v17, %v4078_v62 }
 0x42f   : > { %7001 = vpow2.f32 %v6006_v56  ;;  %v3979_v28 = vadd.f32 %v3947_v24, %v3879_v18  ;;  %v4047_v6 = vmul.f32 %v9175_v5, %v3713_v49  ;;  %v3750_v46 = vmul.f32 %v9140_v63, %v3714_v55  ;;  %v3616_v47 = vld [vmem:[#allocation2 + $0x50] sm:$0xff] }
 0x430   : > { %v3880_v12 = vadd.f32 %v3848_v25, %v3780_v21  ;;  %v9268_v19 = vmul.f32 -1.442695, %v9247_v34  ;;  %v3849_v36 = vmul.f32 %v9150_v11, %v3813_v22  ;;  %v4247_v32 = vmul.f32 %v9221_v52, %v3614_v0  ;;  %v6996_v43 = vpop.eup %6995  ;;  %v3617_v21 = vld [vmem:[#allocation2 + $0x60] sm:$0xff] }
 0x431   : > { %v4378_v39 = vadd.f32 %v4346_v59, %v4278_v1  ;;  %v3949_v56 = vmul.f32 %v9162_v51, %v3615_v44  ;;  %v3948_v40 = vmul.f32 %v9162_v51, %v3614_v0  ;;  %v3651_v49 = vmul.f32 %v9122_v4, %v3615_v44  ;;  %v3715_v59 = vld [vmem:[#allocation2 + $0x49] sm:$0xff] }
 0x432   : > { %v9259_v57 = vpop.f32.mrb[56].mxu1  ;;  %v4079_v61 = vadd.f32 %v4047_v6, %v3979_v28  ;;  %v9277_v18 = vadd.f32 %v9050_v38, %v9135_v23  ;;  %v3782_v35 = vadd.f32 %v3750_v46, %v3682_v15  ;;  %v3881_v7 = vadd.f32 %v3849_v36, %v3781_v9  ;;  %v6998_v17 = vpop.eup %6997 }
 0x433   : > { %10533 = vst [vmem:[#allocation42_spill] sm:$0xff] %v9259_v57  ;;  %v4446_v62 = vmul.f32 %v9264_v30, %v3813_v22  ;;  %v4279_v24 = vadd.f32 %v4247_v32, %v4178_v53  ;;  %v3850_v1 = vmul.f32 %v9150_v11, %v3814_v26  ;;  %v4048_v0 = vmul.f32 %v9175_v5, %v3714_v55  ;;  %v9283_v6 = vpop.f32.mrb[57].mxu1  ;;  %v3717_v53 = vld [vmem:[#allocation2 + $0x61] sm:$0xff] }
 0x434   : > { %v4147_v25 = vmul.f32 %v9191_v42, %v3813_v22  ;;  %v3980_v28 = vadd.f32 %v3948_v40, %v3880_v12  ;;  %10534 = vst [vmem:[#allocation43_spill] sm:$0xff] %v9283_v6  ;;  %v4148_v23 = vmul.f32 %v9191_v42, %v3814_v26  ;;  %v4347_v9 = vmul.f32 %v9226_v58, %v3714_v55  ;;  %v9289_v36 = vpop.f32.mrb[58].mxu1 }
 0x435   : > { %v9287_v15 = vadd.f32 %v4446_v62, %v4378_v39  ;;  %v3981_v46 = vadd.f32 %v3949_v56, %v3881_v7  ;;  %10536 = vst [vmem:[#allocation45_spill] sm:$0xff] %v9289_v36  ;;  %v3653_v54 = vmul.f32 %v9122_v4, %v3617_v21  ;;  %v3683_v8 = vadd.f32 %v9137_v29, %v3651_v49  ;;  %v3815_v62 = vld [vmem:[#allocation2 + $0x4a] sm:$0xff] }
 0x436   : > { %v4179_v22 = vadd.f32 %v4147_v25, %v4079_v61  ;;  %v3950_v12 = vmul.f32 %v9162_v51, %v3616_v47  ;;  %v3882_v41 = vadd.f32 %v3850_v1, %v3782_v35  ;;  %v4447_v6 = vmul.f32 %v9264_v30, %v3814_v26  ;;  %v3716_v1 = vld [vmem:[#allocation2 + $0x51] sm:$0xff] }
 0x437   : > { %10535 = vst [vmem:[#allocation44_spill] sm:$0xff] %v9287_v15  ;;  %v4379_v57 = vadd.f32 %v4347_v9, %v4279_v24  ;;  %v4049_v55 = vmul.f32 %v9175_v5, %v3715_v59  ;;  %v3753_v39 = vmul.f32 %v9140_v63, %v3717_v53  ;;  %v3751_v56 = vmul.f32 %v9140_v63, %v3715_v59 }
 0x438   : > { %v7000_v32 = vpop.eup %6999  ;;  %v4248_v7 = vmul.f32 %v9221_v52, %v3615_v44  ;;  %v4080_v36 = vadd.f32 %v4048_v0, %v3980_v28  ;;  %v6027_v49 = vmul.f32 -1.442695, %v9287_v15  ;;  %v3951_v61 = vmul.f32 %v9162_v51, %v3617_v21 }
 0x439   : > { %v7002_v40 = vpop.eup %7001  ;;  %v4081_v25 = vadd.f32 %v4049_v55, %v3981_v46  ;;  %v3652_v35 = vmul.f32 %v9122_v4, %v3616_v47  ;;  %v3685_v26 = vadd.f32 %v9137_v29, %v3653_v54  ;;  %v3783_v24 = vadd.f32 %v3751_v56, %v3683_v8  ;;  %v3816_v8 = vld [vmem:[#allocation2 + $0x52] sm:$0xff] }
 0x43a   : > { %v4280_v9 = vadd.f32 %v4248_v7, %v4179_v22  ;;  %v3982_v34 = vadd.f32 %v3950_v12, %v3882_v41  ;;  %v9303_v13 = vadd.f32 %v4447_v6, %v4379_v57  ;;  %v4051_v50 = vmul.f32 %v9175_v5, %v3717_v53 }
 0x43b   : > { %v4348_v44 = vmul.f32 %v9226_v58, %v3715_v59  ;;  %v4149_v0 = vmul.f32 %v9191_v42, %v3815_v62  ;;  %v3851_v28 = vmul.f32 %v9150_v11, %v3815_v62  ;;  %v4050_v46 = vmul.f32 %v9175_v5, %v3716_v1 }
 0x43c   : > { %v4180_v55 = vadd.f32 %v4148_v23, %v4080_v36  ;;  %v3398_v2 = vadd.f32 1.0, %v6996_v43  ;;  %7003 = vpow2.f32 %v6027_v49  ;;  %v3684_v54 = vadd.f32 %v9137_v29, %v3652_v35  ;;  %v3618_v23 = vld [vmem:[#allocation2 + $0x68] sm:$0xff] }
 0x43d   : > { %v4181_v22 = vadd.f32 %v4149_v0, %v4081_v25  ;;  %v3396_v41 = vadd.f32 1.0, %v6998_v17  ;;  %v4380_v57 = vadd.f32 %v4348_v44, %v4280_v9  ;;  %v3883_v6 = vadd.f32 %v3851_v28, %v3783_v24  ;;  %v9321_v9 = vpop.f32.mrb[59].mxu1  ;;  %v9326_v0 = vld [vmem:[#allocation2 + $0x78] sm:$0xff] }
 0x43e   : > { %v4082_v12 = vadd.f32 %v4050_v46, %v3982_v34  ;;  %v4249_v56 = vmul.f32 %v9221_v52, %v3616_v47  ;;  %v6028_v59 = vmul.f32 -1.442695, %v9303_v13  ;;  %v4250_v7 = vmul.f32 %v9221_v52, %v3617_v21 }
 0x43f   : > { %v3752_v45 = vmul.f32 %v9140_v63, %v3716_v1  ;;  %v3399_v15 = vadd.f32 1.0, %v7000_v32  ;;  %v4150_v43 = vmul.f32 %v9191_v42, %v3816_v8  ;;  %v4448_v49 = vmul.f32 %v9264_v30, %v3815_v62 }
 0x440   : > { %v4281_v36 = vadd.f32 %v4249_v56, %v4180_v55  ;;  %7005 = vrcp.f32 %v3398_v2  ;;  %v4350_v17 = vmul.f32 %v9226_v58, %v3717_v53  ;;  %v4282_v34 = vadd.f32 %v4250_v7, %v4181_v22  ;;  %v3817_v2 = vld [vmem:[#allocation2 + $0x62] sm:$0xff] }
 0x441   : > { %v3784_v25 = vadd.f32 %v3752_v45, %v3684_v54  ;;  %7007 = vrcp.f32 %v3396_v41  ;;  %v3983_v47 = vadd.f32 %v3951_v61, %v3883_v6  ;;  %v4182_v35 = vadd.f32 %v4150_v43, %v4082_v12  ;;  %v3818_v43 = vld [vmem:[#allocation2 + $0x6a] sm:$0xff] }
 0x442   : > { %v4349_v24 = vmul.f32 %v9226_v58, %v3716_v1  ;;  %v9319_v21 = vadd.f32 %v4448_v49, %v4380_v57  ;;  %7009 = vpow2.f32 %v6028_v59  ;;  %v3785_v32 = vadd.f32 %v3753_v39, %v3685_v26  ;;  %v3718_v1 = vld [vmem:[#allocation2 + $0x69] sm:$0xff] }
 0x443   : > { %v3654_v44 = vmul.f32 %v9122_v4, %v3618_v23  ;;  %v3852_v62 = vmul.f32 %v9150_v11, %v3816_v8  ;;  %v4251_v53 = vmul.f32 %v9221_v52, %v3618_v23  ;;  %7011 = vrcp.f32 %v3399_v15 }
 0x444   : > { %v4381_v45 = vadd.f32 %v4349_v24, %v4281_v36  ;;  %v9328_v61 = vadd.f32 1.0, %v7002_v40  ;;  %v4382_v46 = vadd.f32 %v4350_v17, %v4282_v34  ;;  %v9331_v55 = vmul.f32 -1.442695, %v9257_v16 }
 0x445   : > { %v3884_v28 = vadd.f32 %v3852_v62, %v3784_v25  ;;  %v9334_v39 = vmul.f32 -1.442695, %v9277_v18  ;;  %v4283_v26 = vadd.f32 %v4251_v53, %v4182_v35  ;;  %v4449_v54 = vmul.f32 %v9264_v30, %v3816_v8  ;;  %v3620_v53 = vld [vmem:[#allocation2 + $0x80] sm:$0xff] }
 0x446   : > { %v6029_v22 = vmul.f32 -1.442695, %v9319_v21  ;;  %v4083_v41 = vadd.f32 %v4051_v50, %v3983_v47  ;;  %v7004_v57 = vpop.eup %7003  ;;  %v3686_v15 = vadd.f32 %v9137_v29, %v3654_v44  ;;  %v3853_v40 = vmul.f32 %v9150_v11, %v3817_v2 }
 0x447   : > { %v4450_v6 = vmul.f32 %v9264_v30, %v3817_v2  ;;  %v3953_v12 = vmul.f32 %v9162_v51, %v9326_v0  ;;  %v3952_v56 = vmul.f32 %v9162_v51, %v3618_v23  ;;  %v4151_v59 = vmul.f32 %v9191_v42, %v3817_v2  ;;  %v9355_v23 = vld [vmem:[#allocation2 + $0x79] sm:$0xff] }
 0x448   : > { %v4351_v7 = vmul.f32 %v9226_v58, %v3718_v1  ;;  %v9346_v8 = vadd.f32 %v4449_v54, %v4381_v45  ;;  %v3754_v50 = vmul.f32 %v9140_v63, %v3718_v1  ;;  %v3885_v36 = vadd.f32 %v3853_v40, %v3785_v32  ;;  %v9373_v40 = vld [vmem:[#allocation2 + $0x7a] sm:$0xff] }
 0x449   : > { %v9349_v49 = vadd.f32 %v4450_v6, %v4382_v46  ;;  %v9353_v17 = vadd.f32 %v9152_v14, %v9050_v38  ;;  %v3984_v34 = vadd.f32 %v3952_v56, %v3884_v28  ;;  %7013 = vpow2.f32 %v6029_v22 }
 0x44a   : > { %v7006_v25 = vpop.eup %7005  ;;  %v4383_v47 = vadd.f32 %v4351_v7, %v4283_v26  ;;  %v4183_v35 = vadd.f32 %v4151_v59, %v4083_v41  ;;  %v4606_v44 = vadd.f32 1.0, %v7004_v57  ;;  %v3786_v62 = vadd.f32 %v3754_v50, %v3686_v15 }
 0x44b   : > { %v7008_v24 = vpop.eup %7007  ;;  %v3985_v2 = vadd.f32 %v3953_v12, %v3885_v36  ;;  %v9359_v32 = vadd.f32 %v9050_v38, %v9155_v33  ;;  %v4052_v45 = vmul.f32 %v9175_v5, %v3718_v1  ;;  %v4451_v14 = vmul.f32 %v9264_v30, %v3818_v43 }
 0x44c   : > { %v6030_v28 = vmul.f32 -1.442695, %v9346_v8  ;;  %v4252_v46 = vmul.f32 %v9221_v52, %v9326_v0  ;;  %v7010_v26 = vpop.eup %7009  ;;  %v3854_v54 = vmul.f32 %v9150_v11, %v3818_v43  ;;  %v4152_v22 = vmul.f32 %v9191_v42, %v3818_v43 }
 0x44d   : > { %v6031_v41 = vmul.f32 -1.442695, %v9349_v49  ;;  %v4053_v33 = vmul.f32 %v9175_v5, %v9355_v23  ;;  %v7012_v57 = vpop.eup %7011  ;;  %v9371_v15 = vadd.f32 %v4451_v14, %v4383_v47  ;;  %v3954_v6 = vmul.f32 %v9162_v51, %v3620_v53  ;;  %v3621_v47 = vld [vmem:[#allocation2 + $0x90] sm:$0xff]  ;;  %v3720_v14 = vld [vmem:[#allocation2 + $0x81] sm:$0xff] }
 0x44e   : > { %v4284_v1 = vadd.f32 %v4252_v46, %v4183_v35  ;;  %v4084_v12 = vadd.f32 %v4052_v45, %v3984_v34  ;;  %7015 = vrcp.f32 %v4606_v44  ;;  %v3886_v56 = vadd.f32 %v3854_v54, %v3786_v62 }
 0x44f   : > { %v4085_v59 = vadd.f32 %v4053_v33, %v3985_v2  ;;  %v3494_v7 = vmul.f32 %v7006_v25, %v9179_v20  ;;  %v4607_v50 = vadd.f32 1.0, %v7010_v26  ;;  %7017 = vpow2.f32 %v6030_v28 }
 0x450   : > { %v4352_v43 = vmul.f32 %v9226_v58, %v9355_v23  ;;  %v3492_v36 = vmul.f32 %v7008_v24, %v9186_v60  ;;  %7019 = vpow2.f32 %v6031_v41  ;;  %v3655_v35 = vmul.f32 %v9122_v4, %v9326_v0  ;;  %v3820_v41 = vld [vmem:[#allocation2 + $0x82] sm:$0xff] }
 0x451   : > { %v4153_v34 = vmul.f32 %v9191_v42, %v9373_v40  ;;  %3582 = vst.msk [vmem:[#allocation2 + $0xc1] sm:$0xff] %vm3512_vm6, %v3494_v7  ;;  %v3495_v20 = vmul.f32 %v7012_v57, %v9204_v48  ;;  %v6032_v25 = vmul.f32 -1.442695, %v9371_v15  ;;  %v3986_v62 = vadd.f32 %v3954_v6, %v3886_v56 }
 0x452   : > { %v4384_v44 = vadd.f32 %v4352_v43, %v4284_v1  ;;  %v4184_v2 = vadd.f32 %v4152_v22, %v4084_v12  ;;  %3580 = vst.msk [vmem:[#allocation2 + $0xa9] sm:$0xff] %vm3512_vm6, %v3492_v36  ;;  %v9391_v0 = vadd.f32 %v9157_v27, %v9050_v38  ;;  %v9395_v24 = vadd.f32 %v9050_v38, %v9159_v3 }
 0x453   : > { %v4185_v60 = vadd.f32 %v4153_v34, %v4085_v59  ;;  %3583 = vst.msk [vmem:[#allocation2 + $0xc9] sm:$0xff] %vm3512_vm6, %v3495_v20  ;;  %v9399_v48 = vadd.f32 %v9172_v10, %v9050_v38  ;;  %v7014_v45 = vpop.eup %7013  ;;  %v3657_v28 = vmul.f32 %v9122_v4, %v3621_v47  ;;  %v4054_v46 = vmul.f32 %v9175_v5, %v3720_v14  ;;  %v3721_v10 = vld [vmem:[#allocation2 + $0x91] sm:$0xff] }
 0x454   : > { %10537 = vst [vmem:[#allocation46_spill] sm:$0xff] %v9395_v24  ;;  %v4253_v26 = vmul.f32 %v9221_v52, %v3620_v53  ;;  %v4452_v54 = vmul.f32 %v9264_v30, %v9373_v40  ;;  %7021 = vrcp.f32 %v4607_v50  ;;  %v4254_v27 = vmul.f32 %v9221_v52, %v3621_v47  ;;  %v9425_v20 = vld [vmem:[#allocation2 + $0x92] sm:$0xff] }
 0x455   : > { %10538 = vst [vmem:[#allocation47_spill] sm:$0xff] %v9399_v48  ;;  %v3687_v3 = vadd.f32 %v9137_v29, %v3655_v35  ;;  %v3656_v22 = vmul.f32 %v9122_v4, %v3620_v53  ;;  %7023 = vpow2.f32 %v6032_v25  ;;  %v4086_v33 = vadd.f32 %v4054_v46, %v3986_v62  ;;  %v3622_v35 = vld [vmem:[#allocation2 + $0x98] sm:$0xff] }
 0x456   : > { %v4285_v57 = vadd.f32 %v4253_v26, %v4184_v2  ;;  %v9409_v1 = vadd.f32 %v4452_v54, %v4384_v44  ;;  %v4608_v6 = vadd.f32 1.0, %v7014_v45  ;;  %v3755_v12 = vmul.f32 %v9140_v63, %v9355_v23  ;;  %v10540_v26 = vld [vmem:[#allocation44_spill] sm:$0xff] }
 0x457   : > { %v4286_v56 = vadd.f32 %v4254_v27, %v4185_v60  ;;  %7025 = vrcp.f32 %v9328_v61  ;;  %v4154_v59 = vmul.f32 %v9191_v42, %v3820_v41  ;;  %v4353_v7 = vmul.f32 %v9226_v58, %v3720_v14  ;;  %v3722_v27 = vld [vmem:[#allocation2 + $0x99] sm:$0xff] }
 0x458   : > { %7027 = vpow2.f32 %v9253_v37  ;;  %v9419_v53 = vadd.f32 %v9050_v38, %v9181_v31  ;;  %v7016_v50 = vpop.eup %7015  ;;  %v4354_v43 = vmul.f32 %v9226_v58, %v3721_v10  ;;  %v3787_v36 = vadd.f32 %v3755_v12, %v3687_v3 }
 0x459   : > { %v3688_v23 = vadd.f32 %v9137_v29, %v3656_v22  ;;  %7029 = vpow2.f32 %v9268_v19  ;;  %v7018_v61 = vpop.eup %7017  ;;  %v3689_v34 = vadd.f32 %v9137_v29, %v3657_v28  ;;  %v4186_v25 = vadd.f32 %v4154_v59, %v4086_v33 }
 0x45a   : > { %10539 = vst [vmem:[#allocation48_spill] sm:$0xff] %v9419_v53  ;;  %v4385_v37 = vadd.f32 %v4353_v7, %v4285_v57  ;;  %v6033_v44 = vmul.f32 -1.442695, %v9409_v1  ;;  %v7020_v31 = vpop.eup %7019  ;;  %7031 = vrcp.f32 %v4608_v6  ;;  %v3756_v62 = vmul.f32 %v9140_v63, %v3720_v14 }
 0x45b   : > { %v3855_v2 = vmul.f32 %v9150_v11, %v9373_v40  ;;  %v4386_v60 = vadd.f32 %v4354_v43, %v4286_v56  ;;  %v3757_v45 = vmul.f32 %v9140_v63, %v3721_v10  ;;  %v3955_v19 = vmul.f32 %v9162_v51, %v3621_v47 }
 0x45c   : > { %v4255_v28 = vmul.f32 %v9221_v52, %v3622_v35  ;;  %v4453_v46 = vmul.f32 %v9264_v30, %v3820_v41  ;;  %v9436_v54 = vmul.f32 %v7016_v50, %v10540_v26  ;;  %v4454_v3 = vmul.f32 %v9264_v30, %v9425_v20 }
 0x45d   : > { %v3788_v14 = vadd.f32 %v3756_v62, %v3688_v23  ;;  %v3887_v22 = vadd.f32 %v3855_v2, %v3787_v36  ;;  %v4609_v33 = vadd.f32 1.0, %v7018_v61  ;;  %7033 = vpow2.f32 %v6033_v44  ;;  %v10542_v36 = vld [vmem:[#allocation37_spill] sm:$0xff]  ;;  %v10543_v61 = vld [vmem:[#allocation39_spill] sm:$0xff] }
 0x45e   : > { %10541 = vst [vmem:[#allocation44_spill] sm:$0xff] %v9436_v54  ;;  %v4287_v40 = vadd.f32 %v4255_v28, %v4186_v25  ;;  %v9440_v57 = vadd.f32 %v4453_v46, %v4385_v37  ;;  %v7022_v6 = vpop.eup %7021  ;;  %v4610_v47 = vadd.f32 1.0, %v7020_v31  ;;  %v3658_v12 = vmul.f32 %v9122_v4, %v3622_v35  ;;  %v3822_v31 = vld [vmem:[#allocation2 + $0x9a] sm:$0xff] }
 0x45f   : > { %v3856_v56 = vmul.f32 %v9150_v11, %v3820_v41  ;;  %v9444_v59 = vadd.f32 %v4454_v3, %v4386_v60  ;;  %v7024_v7 = vpop.eup %7023  ;;  %v4355_v50 = vmul.f32 %v9226_v58, %v3722_v27  ;;  %v9448_v43 = vmul.f32 -1.442695, %v9353_v17 }
 0x460   : > { %v9452_v23 = vadd.f32 %v10542_v36, %v9050_v38  ;;  %v9456_v25 = vadd.f32 %v9050_v38, %v10543_v61  ;;  %v3789_v44 = vadd.f32 %v3757_v45, %v3689_v34  ;;  %v4055_v41 = vmul.f32 %v9175_v5, %v3721_v10 }
 0x461   : > { %v7026_v37 = vpop.eup %7025  ;;  %v3888_v62 = vadd.f32 %v3856_v56, %v3788_v14  ;;  %v3987_v2 = vadd.f32 %v3955_v19, %v3887_v22  ;;  %7035 = vrcp.f32 %v4609_v33  ;;  %v4734_v28 = vsel %vm3512_vm6, %v9436_v54, 0.0  ;;  %v9556_v54 = vld [vmem:[#allocation2 + $0xc1] sm:$0xff] }
 0x462   : > { %v7028_v60 = vpop.eup %7027  ;;  %v4387_v46 = vadd.f32 %v4355_v50, %v4287_v40  ;;  %v6034_v26 = vmul.f32 -1.442695, %v9440_v57  ;;  %7037 = vrcp.f32 %v4610_v47  ;;  %v3690_v38 = vadd.f32 %v9137_v29, %v3658_v12  ;;  %v9470_v40 = vld [vmem:[#allocation2 + $0xa8] sm:$0xff]  ;;  %v10545_v47 = vld [vmem:[#allocation38_spill] sm:$0xff] }
 0x463   : > { %v7030_v3 = vpop.eup %7029  ;;  %v3956_v36 = vmul.f32 %v9162_v51, %v3622_v35  ;;  %v6035_v34 = vmul.f32 -1.442695, %v9444_v59  ;;  %v9466_v10 = vmul.f32 %v7022_v6, %v9303_v13  ;;  %v4611_v45 = vadd.f32 1.0, %v7024_v7 }
 0x464   : > { %v3758_v19 = vmul.f32 %v9140_v63, %v3722_v27  ;;  %v4455_v14 = vmul.f32 %v9264_v30, %v3822_v31  ;;  %v7032_v22 = vpop.eup %7031  ;;  %v4087_v56 = vadd.f32 %v4055_v41, %v3987_v2  ;;  %v3493_v50 = vmul.f32 %v7026_v37, %v10545_v47  ;;  %v6811_v2 = vld [vmem:[#allocation15] sm:$0xff]  }
 0x465   : > { %10544 = vst [vmem:[#allocation37_spill] sm:$0xff] %v9466_v10  ;;  %v3988_v33 = vadd.f32 %v3956_v36, %v3888_v62  ;;  %v3402_v29 = vadd.f32 1.0, %v7028_v60  ;;  %v3857_v35 = vmul.f32 %v9150_v11, %v9425_v20  ;;  %7039 = vpow2.f32 %v6034_v26  ;;  %6406 = vmatpush3.bf16.msra.mxu1 %v6811_v2 }
 0x466   : > { %v9475_v12 = vadd.f32 %v4455_v14, %v4387_v46  ;;  %v3400_v13 = vadd.f32 1.0, %v7030_v3  ;;  %v3790_v6 = vadd.f32 %v3758_v19, %v3690_v38  ;;  %v4056_v7 = vmul.f32 %v9175_v5, %v3722_v27  ;;  %3581 = vst.msk [vmem:[#allocation2 + $0xb1] sm:$0xff] %vm3512_vm6, %v3493_v50  ;;  %v6812_v38 = vld [vmem:[#allocation15 + $0x8] sm:$0xff]  }
 0x467   : > { %v4155_v61 = vmul.f32 %v9191_v42, %v9425_v20  ;;  %7041 = vpow2.f32 %v6035_v34  ;;  %v7034_v41 = vpop.eup %7033  ;;  %v9482_v37 = vmul.f32 %v7032_v22, %v9319_v21  ;;  %v3957_v62 = vmul.f32 %v9162_v51, %v9470_v40 }
 0x468   : > { %7043 = vrcp.f32 %v3402_v29  ;;  %v4735_v60 = vsel %vm3512_vm6, %v9466_v10, 0.0  ;;  %v4088_v46 = vadd.f32 %v4056_v7, %v3988_v33  ;;  %v10547_v20 = vmov 0.0   ;;  %v6813_v7 = vld [vmem:[#allocation15 + $0x10] sm:$0xff]  }
 0x469   : > { %10546 = vst [vmem:[#allocation39_spill] sm:$0xff] %v9482_v37  ;;  %7045 = vrcp.f32 %v4611_v45  ;;  %v4187_v27 = vadd.f32 %v4155_v61, %v4087_v56  ;;  %6413 = vmatprep.mubr.msk.bf16.mxu1 %vm7819_vm7, %v10547_v20  ;;  %v3858_v26 = vmul.f32 %v9150_v11, %v3822_v31  ;;  %v3889_v3 = vadd.f32 %v3857_v35, %v3789_v44  ;;  %v9493_v45 = vld [vmem:[#allocation2 + $0xa9] sm:$0xff] }
 0x46a   : > { %v6036_v21 = vmul.f32 -1.442695, %v9475_v12  ;;  %7047 = vrcp.f32 %v3400_v13  ;;  %v4156_v36 = vmul.f32 %v9191_v42, %v3822_v31  ;;  %v4612_v34 = vadd.f32 1.0, %v7034_v41  ;;  %6407 = vmatprep.subr.bf16.mxu1 %v10547_v20 }
 0x46b   : > { %v4256_v19 = vmul.f32 %v9221_v52, %v9470_v40  ;;  %7049 = vpow2.f32 %v9331_v55  ;;  %v7036_v14 = vpop.eup %7035  ;;  %v4736_v22 = vadd.f32 %v4735_v60, %v4734_v28  ;;  %v4737_v44 = vsel %vm3512_vm6, %v9482_v37, 0.0  ;;  %6408 = vmatpush3.bf16.msra.mxu1 %v6812_v38 }
 0x46c   : > { %v3989_v33 = vadd.f32 %v3957_v62, %v3889_v3  ;;  %7051 = vpow2.f32 %v9334_v39  ;;  %v7038_v56 = vpop.eup %7037  ;;  %v3890_v31 = vadd.f32 %v3858_v26, %v3790_v6  ;;  %v4188_v50 = vadd.f32 %v4156_v36, %v4088_v46  ;;  %6409 = vmatprep.subr.bf16.mxu1 %v10547_v20 }
 0x46d   : > { %v4288_v47 = vadd.f32 %v4256_v19, %v4187_v27  ;;  %v6013_v29 = vmul.f32 -1.442695, %v9359_v32  ;;  %7053 = vpow2.f32 %v6036_v21  ;;  %v4057_v55 = vmul.f32 %v9175_v5, %v9493_v45  ;;  %v9505_v35 = vld [vmem:[#allocation2 + $0xb0] sm:$0xff] }
 0x46e   : > { %v6016_v28 = vmul.f32 -1.442695, %v9391_v0  ;;  %v9509_v13 = vmul.f32 -1.442695, %v9395_v24  ;;  %v9512_v39 = vmul.f32 %v7036_v14, %v9346_v8  ;;  %v9514_v6 = vadd.f32 %v4737_v44, %v4736_v22  ;;  %v9518_v41 = vld [vmem:[#allocation2 + $0xb1] sm:$0xff]  ;;  %v6814_v22 = vld [vmem:[#allocation15 + $0x18] sm:$0xff]  }
 0x46f   : > { %7055 = vrcp.f32 %v4612_v34  ;;  %v4356_v61 = vmul.f32 %v9226_v58, %v9493_v45  ;;  %v9520_v62 = vld [vmem:[#allocation2 + $0xaa] sm:$0xff]  ;;  %v7040_v2 = vpop.eup %7039  ;;  %v9524_v60 = vmul.f32 %v7038_v56, %v9349_v49  ;;  %v4089_v27 = vadd.f32 %v4057_v55, %v3989_v33  ;;  %v9526_v46 = vld [vmem:[#allocation2 + $0xb2] sm:$0xff]  ;;  %v9537_v49 = vld [vmem:[#allocation2 + $0xc0] sm:$0xff]  ;;  %6410 = vmatpush3.bf16.msra.mxu1 %v6813_v7 }
 0x470   : > { %10548 = vst [vmem:[#allocation38_spill] sm:$0xff] %v9512_v39  ;;  %v3958_v8 = vmul.f32 %v9162_v51, %v9505_v35  ;;  %7057 = vpow2.f32 %v9448_v43  ;;  %v9532_v21 = vmul.f32 -1.442695, %v9399_v48  ;;  %v9535_v38 = vmul.f32 -1.442695, %v9419_v53  ;;  %v9545_v56 = vld [vmem:[#allocation2 + $0xc8] sm:$0xff]  ;;  %6411 = vmatprep.subr.bf16.mxu1 %v10547_v20 }
 0x471   : > { %10549 = vst [vmem:[#allocation49_spill] sm:$0xff] %v9524_v60  ;;  %v7042_v26 = vpop.eup %7041  ;;  %v4388_v3 = vadd.f32 %v4356_v61, %v4288_v47  ;;  %7059 = vpow2.f32 %v6013_v29  ;;  %v4058_v19 = vmul.f32 %v9175_v5, %v9518_v41  ;;  %v4157_v14 = vmul.f32 %v9191_v42, %v9520_v62 }
 0x472   : > { %v7044_v36 = vpop.eup %7043  ;;  %v3990_v34 = vadd.f32 %v3958_v8, %v3890_v31  ;;  %v4257_v43 = vmul.f32 %v9221_v52, %v9505_v35  ;;  %v4613_v33 = vadd.f32 1.0, %v7040_v2  ;;  %v4158_v47 = vmul.f32 %v9191_v42, %v9526_v46 }
 0x473   : > { %v7046_v44 = vpop.eup %7045  ;;  %v4357_v31 = vmul.f32 %v9226_v58, %v9518_v41  ;;  %7061 = vpow2.f32 %v6016_v28  ;;  %v4189_v61 = vadd.f32 %v4157_v14, %v4089_v27  ;;  %v4456_v7 = vmul.f32 %v9264_v30, %v9520_v62  ;;  %v10550_v28 = vld [vmem:[#allocation40_spill] sm:$0xff]  ;;  %6412 = vmatpush3.bf16.msra.mxu1 %v6814_v22 }
 0x474   : > { %v7048_v29 = vpop.eup %7047  ;;  %v4090_v55 = vadd.f32 %v4058_v19, %v3990_v34  ;;  %v4289_v8 = vadd.f32 %v4257_v43, %v4188_v50  ;;  %v4739_v2 = vsel %vm3512_vm6, %v9512_v39, 0.0  ;;  %v4614_v10 = vadd.f32 1.0, %v7042_v26  ;;  %v9565_v14 = vld [vmem:[#allocation2 + $0xc9] sm:$0xff]  ;;  %v10551_v39 = vld [vmem:[#allocation41_spill] sm:$0xff]  ;;  %6417 = vmatprep.subr.bf16.mxu1 %v10547_v20 }
 0x475   : > { %v7050_v37 = vpop.eup %7049  ;;  %v4258_v53 = vmul.f32 %v9221_v52, %v9537_v49  ;;  %v3498_v48 = vmul.f32 %v7044_v36, %v10550_v28  ;;  %v4259_v27 = vmul.f32 %v9221_v52, %v9545_v56  ;;  %v9563_v19 = vadd.f32 %v4456_v7, %v4388_v3 }
 0x476   : > { %v7052_v24 = vpop.eup %7051  ;;  %v4190_v50 = vadd.f32 %v4158_v47, %v4090_v55  ;;  %v4389_v34 = vadd.f32 %v4357_v31, %v4289_v8  ;;  %7063 = vrcp.f32 %v4613_v33  ;;  %v4457_v43 = vmul.f32 %v9264_v30, %v9526_v46 }
 0x477   : > { %v4290_v26 = vadd.f32 %v4258_v53, %v4189_v61  ;;  %3586 = vst.msk [vmem:[#allocation2 + $0xf1] sm:$0xff] %vm3512_vm6, %v3498_v48  ;;  %v3496_v36 = vmul.f32 %v7048_v29, %v10551_v39  ;;  %v7054_v28 = vpop.eup %7053  ;;  %v9573_v47 = vmul.f32 %v7046_v44, %v9371_v15  ;;  %v4358_v3 = vmul.f32 %v9226_v58, %v9556_v54  ;;  %v9586_v61 = vld [vmem:[#allocation2 + $0xc2] sm:$0xff] }
 0x478   : > { %v4291_v22 = vadd.f32 %v4259_v27, %v4190_v50  ;;  %v6037_v33 = vmul.f32 -1.442695, %v9563_v19  ;;  %v3659_v31 = vmul.f32 %v9122_v4, %v9470_v40  ;;  %v9580_v55 = vadd.f32 %v4457_v43, %v4389_v34  ;;  %v9590_v27 = vld [vmem:[#allocation2 + $0xca] sm:$0xff]  ;;  %v9598_v34 = vld [vmem:[#allocation14] ss:$0 sm:$0xff] }
 0x479   : > { %10552 = vst [vmem:[#allocation40_spill] sm:$0xff] %v9573_v47  ;;  %v7056_v53 = vpop.eup %7055  ;;  %3584 = vst.msk [vmem:[#allocation2 + $0xd9] sm:$0xff] %vm3512_vm6, %v3496_v36  ;;  %v3403_v48 = vadd.f32 1.0, %v7050_v37  ;;  %v3401_v39 = vadd.f32 1.0, %v7052_v24  ;;  %v4740_v15 = vadd.f32 %v4739_v2, %v9514_v6  ;;  %v4741_v44 = vsel %vm3512_vm6, %v9524_v60, 0.0 }
 0x47a   : > { %v7058_v29 = vpop.eup %7057  ;;  %7065 = vrcp.f32 %v4614_v10  ;;  %v4359_v8 = vmul.f32 %v9226_v58, %v9565_v14  ;;  %v4615_v40 = vadd.f32 1.0, %v7054_v28  ;;  %v3660_v37 = vmul.f32 %v9122_v4, %v9505_v35 }
 0x47b   : > { %v7060_v7 = vpop.eup %7059  ;;  %v4390_v24 = vadd.f32 %v4358_v3, %v4290_v26  ;;  %7067 = vrcp.f32 %v3403_v48  ;;  %v3661_v6 = vmul.f32 %v9122_v4, %v9537_v49  ;;  %v3761_v10 = vmul.f32 %v9140_v63, %v9556_v54 }
 0x47c   : > { %v4391_v2 = vadd.f32 %v4359_v8, %v4291_v22  ;;  %7069 = vpow2.f32 %v6037_v33  ;;  %v3691_v43 = vadd.f32 %v9598_v34, %v3659_v31  ;;  %v4458_v36 = vmul.f32 %v9264_v30, %v9586_v61 }
 0x47d   : > { %v7062_v50 = vpop.eup %7061  ;;  %v6038_v35 = vmul.f32 -1.442695, %v9580_v55  ;;  %7071 = vrcp.f32 %v3401_v39  ;;  %v4742_v26 = vadd.f32 %v4741_v44, %v4740_v15  ;;  %v3759_v28 = vmul.f32 %v9140_v63, %v9493_v45 }
 0x47e   : > { %v4459_v3 = vmul.f32 %v9264_v30, %v9590_v27  ;;  %v3406_v22 = vadd.f32 1.0, %v7058_v29  ;;  %7073 = vrcp.f32 %v4615_v40  ;;  %v3692_v33 = vadd.f32 %v9598_v34, %v3660_v37 }
 0x47f   : > { %v9609_v48 = vadd.f32 %v4458_v36, %v4390_v24  ;;  %v3404_v31 = vadd.f32 1.0, %v7060_v7  ;;  %v9612_v8 = vmul.f32 %v7056_v53, %v9409_v1  ;;  %v3407_v39 = vadd.f32 1.0, %v7062_v50 }
 0x480   : > { %v9614_v60 = vadd.f32 %v4459_v3, %v4391_v2  ;;  %7075 = vpow2.f32 %v9509_v13  ;;  %v7064_v15 = vpop.eup %7063  ;;  %v4743_v45 = vsel %vm3512_vm6, %v9573_v47, 0.0  ;;  %v3791_v30 = vadd.f32 %v3759_v28, %v3691_v43  ;;  %v7340_v28 = vld [vmem:[#allocation11] ss:$0 sm:$0xff]  ;;  %v10555_v3 = vld [vmem:[#allocation42_spill] sm:$0xff] }
 0x481   : > { %10553 = vst [vmem:[#allocation41_spill] sm:$0xff] %v9612_v8  ;;  %v3760_v29 = vmul.f32 %v9140_v63, %v9518_v41  ;;  %7077 = vpow2.f32 %v6038_v35  ;;  %v4744_v44 = vadd.f32 %v4743_v45, %v4742_v26  ;;  %v3693_v7 = vadd.f32 %v9598_v34, %v3661_v6 }
 0x482   : > { %v3662_v1 = vmul.f32 %v9122_v4, %v9545_v56  ;;  %7079 = vrcp.f32 %v3406_v22  ;;  %v3859_v13 = vmul.f32 %v9150_v11, %v9520_v62  ;;  %v6039_v40 = vmul.f32 -1.442695, %v9609_v48 }
 0x483   : > { %v3792_v53 = vadd.f32 %v3760_v29, %v3692_v33  ;;  %7081 = vrcp.f32 %v3404_v31  ;;  %v9628_v24 = vmul.f32 %v7064_v15, %v9440_v57  ;;  %v4745_v41 = vsel %vm3512_vm6, %v9612_v8, 0.0 }
 0x484   : > { %v7066_v37 = vpop.eup %7065  ;;  %v6040_v6 = vmul.f32 -1.442695, %v9614_v60  ;;  %7083 = vrcp.f32 %v3407_v39  ;;  %v3860_v50 = vmul.f32 %v9150_v11, %v9526_v46  ;;  %v3891_v43 = vadd.f32 %v3859_v13, %v3791_v30 }
 0x485   : > { %10554 = vst [vmem:[#allocation50_spill] sm:$0xff] %v9628_v24  ;;  %v7068_v2 = vpop.eup %7067  ;;  %7085 = vpow2.f32 %v9532_v21  ;;  %v9637_v62 = vmul.f32 -1.442695, %v9452_v23  ;;  %v3793_v35 = vadd.f32 %v3761_v10, %v3693_v7  ;;  %v3959_v57 = vmul.f32 %v9162_v51, %v9537_v49 }
 0x486   : > { %v7070_v36 = vpop.eup %7069  ;;  %v3499_v26 = vmul.f32 %v7068_v2, %v9257_v16  ;;  %v9643_v22 = vadd.f32 %v7340_v28, %v10555_v3  ;;  %v4746_v31 = vadd.f32 %v4745_v41, %v4744_v44  ;;  %v3861_v46 = vmul.f32 %v9150_v11, %v9586_v61 }
 0x487   : > { %v7072_v33 = vpop.eup %7071  ;;  %v3892_v21 = vadd.f32 %v3860_v50, %v3792_v53  ;;  %7087 = vpow2.f32 %v6039_v40  ;;  %v4747_v39 = vsel %vm3512_vm6, %v9628_v24, 0.0  ;;  %v3694_v10 = vadd.f32 %v9598_v34, %v3662_v1  ;;  %v10557_v50 = vld [vmem:[#allocation43_spill] sm:$0xff] }
 0x488   : > { %7089 = vpow2.f32 %v6040_v6  ;;  %3587 = vst.msk [vmem:[#allocation2 + $0xf9] sm:$0xff] %vm3512_vm6, %v3499_v26  ;;  %v3497_v16 = vmul.f32 %v7072_v33, %v9277_v18  ;;  %v7074_v49 = vpop.eup %7073  ;;  %v9653_v15 = vmul.f32 %v7066_v37, %v9444_v59  ;;  %v4059_v45 = vmul.f32 %v9175_v5, %v9556_v54  ;;  %v3627_v37 = vld [vmem:[#allocation2 + $0xd8] sm:$0xff] }
 0x489   : > { %v3960_v30 = vmul.f32 %v9162_v51, %v9545_v56  ;;  %v3991_v29 = vadd.f32 %v3959_v57, %v3891_v43  ;;  %v3762_v7 = vmul.f32 %v9140_v63, %v9565_v14  ;;  %v3862_v1 = vmul.f32 %v9150_v11, %v9590_v27 }
 0x48a   : > { %10556 = vst [vmem:[#allocation42_spill] sm:$0xff] %v9653_v15  ;;  %v7076_v44 = vpop.eup %7075  ;;  %v3893_v53 = vadd.f32 %v3861_v46, %v3793_v35  ;;  %v4616_v18 = vadd.f32 1.0, %v7070_v36  ;;  %3585 = vst.msk [vmem:[#allocation2 + $0xe1] sm:$0xff] %vm3512_vm6, %v3497_v16  ;;  %v4748_v13 = vadd.f32 %v4747_v39, %v4746_v31  ;;  %v4060_v54 = vmul.f32 %v9175_v5, %v9565_v14  ;;  %v10558_v36 = vld [vmem:[#allocation45_spill] sm:$0xff] }
 0x48b   : > { %v7078_v59 = vpop.eup %7077  ;;  %v4159_v56 = vmul.f32 %v9191_v42, %v9586_v61  ;;  %v3992_v40 = vadd.f32 %v3960_v30, %v3892_v21  ;;  %v3794_v6 = vadd.f32 %v3762_v7, %v3694_v10  ;;  %v4160_v2 = vmul.f32 %v9191_v42, %v9590_v27  ;;  %v3727_v7 = vld [vmem:[#allocation2 + $0xd9] sm:$0xff] }
 0x48c   : > { %v7080_v41 = vpop.eup %7079  ;;  %v9671_v43 = vadd.f32 %v7340_v28, %v10557_v50  ;;  %v9674_v35 = vadd.f32 %v7340_v28, %v10558_v36  ;;  %v9677_v26 = vmul.f32 %v7074_v49, %v9475_v12  ;;  %v4749_v14 = vsel %vm3512_vm6, %v9653_v15, 0.0 }
 0x48d   : > { %v7082_v57 = vpop.eup %7081  ;;  %v4091_v61 = vadd.f32 %v4059_v45, %v3991_v29  ;;  %v3502_v3 = vmul.f32 %v7080_v41, %v9353_v17  ;;  %v4617_v31 = vadd.f32 1.0, %v7078_v59  ;;  %7091 = vrcp.f32 %v4616_v18  ;;  %v4241_v18 = vld [vmem:[#allocation2 + $0x1a0] sm:$0xff] }
 0x48e   : > { %10559 = vst [vmem:[#allocation43_spill] sm:$0xff] %v9677_v26  ;;  %v7084_v33 = vpop.eup %7083  ;;  %v3961_v27 = vmul.f32 %v9162_v51, %v3627_v37  ;;  %v3500_v46 = vmul.f32 %v7082_v57, %v9359_v32  ;;  %v4750_v39 = vadd.f32 %v4749_v14, %v4748_v13  ;;  %v4092_v10 = vadd.f32 %v4060_v54, %v3992_v40 }
 0x48f   : > { %v7086_v21 = vpop.eup %7085  ;;  %3590 = vst.msk [vmem:[#allocation2 + $0x121] sm:$0xff] %vm3512_vm6, %v3502_v3  ;;  %v3503_v12 = vmul.f32 %v7084_v33, %v9391_v0  ;;  %v9687_v16 = vadd.f32 %v7340_v28, %v9321_v9  ;;  %v3894_v49 = vadd.f32 %v3862_v1, %v3794_v6  ;;  %v9691_v17 = vmul.f32 -1.442695, %v9456_v25  ;;  %v4240_v1 = vld [vmem:[#allocation2 + $0x198] sm:$0xff]  ;;  %v9708_v6 = vld [vmem:[#allocation2 + $0xf0] sm:$0xff] }
 0x490   : > { %3588 = vst.msk [vmem:[#allocation2 + $0x109] sm:$0xff] %vm3512_vm6, %v3500_v46  ;;  %v9694_v45 = vmul.f32 -1.442695, %v9643_v22  ;;  %v9697_v32 = vmul.f32 -1.442695, %v9671_v43  ;;  %v3663_v29 = vmul.f32 %v9122_v4, %v3627_v37  ;;  %v4191_v0 = vadd.f32 %v4159_v56, %v4091_v61  ;;  %v9726_v46 = vld [vmem:[#allocation2 + $0xf1] sm:$0xff] }
 0x491   : > { %v7088_v30 = vpop.eup %7087  ;;  %3591 = vst.msk [vmem:[#allocation2 + $0x129] sm:$0xff] %vm3512_vm6, %v3503_v12  ;;  %v3405_v9 = vadd.f32 1.0, %v7076_v44  ;;  %v9702_v28 = vmul.f32 -1.442695, %v9674_v35  ;;  %7093 = vrcp.f32 %v4617_v31  ;;  %v4751_v13 = vsel %vm3512_vm6, %v9677_v26, 0.0  ;;  %v3628_v50 = vld [vmem:[#allocation2 + $0xe0] sm:$0xff] }
 0x492   : > { %v7090_v59 = vpop.eup %7089  ;;  %v3993_v54 = vadd.f32 %v3961_v27, %v3893_v53  ;;  %v3410_v40 = vadd.f32 1.0, %v7086_v21  ;;  %v9706_v41 = vadd.f32 %v4751_v13, %v4750_v39  ;;  %v4260_v56 = vmul.f32 %v9221_v52, %v3627_v37  ;;  %v9722_v27 = vld [vmem:[#allocation2 + $0xe1] sm:$0xff] }
 0x493   : > { %v4192_v44 = vadd.f32 %v4160_v2, %v4092_v10  ;;  %v9712_v36 = vmul.f32 -1.442695, %v9687_v16  ;;  %v4618_v57 = vadd.f32 1.0, %v7088_v30  ;;  %v4061_v14 = vmul.f32 %v9175_v5, %v3727_v7  ;;  %v3827_v37 = vld [vmem:[#allocation2 + $0xda] sm:$0xff] }
 0x494   : > { %v9716_v61 = vmul.f32 %v9221_v52, %v4240_v1  ;;  %v9719_v53 = vmul.f32 %v9221_v52, %v4241_v18  ;;  %v4619_v3 = vadd.f32 1.0, %v7090_v59  ;;  %v3695_v33 = vadd.f32 %v9598_v34, %v3663_v29  ;;  %v9733_v29 = vld [vmem:[#allocation2 + $0xe2] sm:$0xff] }
 0x495   : > { %v4292_v31 = vadd.f32 %v4260_v56, %v4191_v0  ;;  %7095 = vrcp.f32 %v3405_v9  ;;  %v3665_v2 = vmul.f32 %v9122_v4, %v9708_v6  ;;  %v4093_v21 = vadd.f32 %v4061_v14, %v3993_v54  ;;  %v9736_v9 = vld [vmem:[#allocation2 + $0xf8] sm:$0xff] }
 0x496   : > { %10560 = vst [vmem:[#allocation45_spill] sm:$0xff] %v9716_v61  ;;  %10561 = vst [vmem:[#allocation51_spill] sm:$0xff] %v9719_v53  ;;  %v3962_v39 = vmul.f32 %v9162_v51, %v3628_v50  ;;  %7097 = vrcp.f32 %v3410_v40  ;;  %v4262_v10 = vmul.f32 %v9221_v52, %v9708_v6  ;;  %v3763_v12 = vmul.f32 %v9140_v63, %v3727_v7  ;;  %v9743_v40 = vld [vmem:[#allocation2 + $0xf9] sm:$0xff] }
 0x497   : > { %v4360_v30 = vmul.f32 %v9226_v58, %v3727_v7  ;;  %7099 = vpow2.f32 %v9535_v38  ;;  %v7092_v0 = vpop.eup %7091  ;;  %v4062_v18 = vmul.f32 %v9175_v5, %v9722_v27  ;;  %v4161_v59 = vmul.f32 %v9191_v42, %v3827_v37  ;;  %v9745_v56 = vld [vmem:[#allocation2 + $0xf2] sm:$0xff] }
 0x498   : > { %7101 = vrcp.f32 %v4618_v57  ;;  %v3994_v1 = vadd.f32 %v3962_v39, %v3894_v49  ;;  %v4362_v13 = vmul.f32 %v9226_v58, %v9726_v46  ;;  %v3795_v54 = vadd.f32 %v3763_v12, %v3695_v33  ;;  %v9881_v20 = vld [vmem:[#allocation2 + $0x129] sm:$0xff] }
 0x499   : > { %7103 = vrcp.f32 %v4619_v3  ;;  %v4392_v7 = vadd.f32 %v4360_v30, %v4292_v31  ;;  %v4162_v57 = vmul.f32 %v9191_v42, %v9733_v29  ;;  %v4193_v49 = vadd.f32 %v4161_v59, %v4093_v21  ;;  %v9756_v31 = vld [vmem:[#allocation12 + $0x8] ss:$0 sm:$0xff] }
 0x49a   : > { %v4094_v38 = vadd.f32 %v4062_v18, %v3994_v1  ;;  %v4261_v14 = vmul.f32 %v9221_v52, %v3628_v50  ;;  %v9751_v39 = vmul.f32 %v7092_v0, %v9563_v19  ;;  %v4263_v3 = vmul.f32 %v9221_v52, %v9736_v9  ;;  %v9759_v1 = vld [vmem:[#allocation2 + $0xfa] sm:$0xff] }
 0x49b   : > { %v3664_v33 = vmul.f32 %v9122_v4, %v3628_v50  ;;  %v4460_v12 = vmul.f32 %v9756_v31, %v3827_v37  ;;  %v7094_v30 = vpop.eup %7093  ;;  %v4294_v21 = vadd.f32 %v4262_v10, %v4193_v49  ;;  %v4361_v59 = vmul.f32 %v9226_v58, %v9722_v27 }
 0x49c   : > { %10562 = vst [vmem:[#allocation52_spill] sm:$0xff] %v9751_v39  ;;  %v4194_v18 = vadd.f32 %v4162_v57, %v4094_v38  ;;  %v4293_v26 = vadd.f32 %v4261_v14, %v4192_v44  ;;  %v4363_v19 = vmul.f32 %v9226_v58, %v9743_v40  ;;  %v4462_v0 = vmul.f32 %v9756_v31, %v9745_v56 }
 0x49d   : > { %v9767_v50 = vadd.f32 %v4460_v12, %v4392_v7  ;;  %7105 = vpow2.f32 %v9637_v62  ;;  %v4394_v8 = vadd.f32 %v4362_v13, %v4294_v21  ;;  %v4461_v44 = vmul.f32 %v9756_v31, %v9733_v29 }
 0x49e   : > { %v4295_v15 = vadd.f32 %v4263_v3, %v4194_v18  ;;  %v4393_v24 = vadd.f32 %v4361_v59, %v4293_v26  ;;  %v9773_v38 = vmul.f32 %v7094_v30, %v9580_v55  ;;  %v4463_v57 = vmul.f32 %v9756_v31, %v9759_v1 }
 0x49f   : > { %v7096_v10 = vpop.eup %7095  ;;  %v3863_v49 = vmul.f32 %v9150_v11, %v3827_v37  ;;  %v6041_v7 = vmul.f32 -1.442695, %v9767_v50  ;;  %v4753_v62 = vsel %vm3512_vm6, %v9751_v39, 0.0  ;;  %v3696_v26 = vadd.f32 %v9598_v34, %v3664_v33  ;;  %v4340_v37 = vld [vmem:[#allocation2 + $0x199] sm:$0xff] }
 0x4a0   : > { %10563 = vst [vmem:[#allocation53_spill] sm:$0xff] %v9773_v38  ;;  %v7098_v14 = vpop.eup %7097  ;;  %v4395_v13 = vadd.f32 %v4363_v19, %v4295_v15  ;;  %v9782_v3 = vadd.f32 %v4461_v44, %v4393_v24  ;;  %v3697_v55 = vadd.f32 %v9598_v34, %v3665_v2  ;;  %v9785_v18 = vadd.f32 %v4462_v0, %v4394_v8  ;;  %v4341_v24 = vld [vmem:[#allocation2 + $0x1a1] sm:$0xff] }
 0x4a1   : > { %v7100_v12 = vpop.eup %7099  ;;  %v3895_v30 = vadd.f32 %v3863_v49, %v3795_v54  ;;  %7107 = vpow2.f32 %v9691_v17  ;;  %v3764_v59 = vmul.f32 %v9140_v63, %v9722_v27  ;;  %v4754_v19 = vadd.f32 %v4753_v62, %v9706_v41  ;;  %v4440_v41 = vld [vmem:[#allocation2 + $0x19a] sm:$0xff]  ;;  %v4441_v62 = vld [vmem:[#allocation2 + $0x1a2] sm:$0xff] }
 0x4a2   : > { %v7102_v21 = vpop.eup %7101  ;;  %v9790_v47 = vadd.f32 %v4463_v57, %v4395_v13  ;;  %7109 = vpow2.f32 %v6041_v7  ;;  %v6042_v15 = vmul.f32 -1.442695, %v9782_v3  ;;  %v3765_v8 = vmul.f32 %v9140_v63, %v9726_v46 }
 0x4a3   : > { %v7104_v33 = vpop.eup %7103  ;;  %v3963_v17 = vmul.f32 %v9162_v51, %v9708_v6  ;;  %v3666_v2 = vmul.f32 %v9122_v4, %v9736_v9  ;;  %v4755_v27 = vsel %vm3512_vm6, %v9773_v38, 0.0  ;;  %v4063_v54 = vmul.f32 %v9175_v5, %v9726_v46 }
 0x4a4   : > { %v3796_v0 = vadd.f32 %v3764_v59, %v3696_v26  ;;  %v9805_v44 = vmul.f32 %v9226_v58, %v4340_v37  ;;  %v3797_v57 = vadd.f32 %v3765_v8, %v3697_v55  ;;  %v6043_v7 = vmul.f32 -1.442695, %v9785_v18  ;;  %v10570_v8 = vld [vmem:[#allocation46_spill] sm:$0xff] }
 0x4a5   : > { %v3995_v49 = vadd.f32 %v3963_v17, %v3895_v30  ;;  %v9809_v6 = vmul.f32 %v9226_v58, %v4341_v24  ;;  %v9812_v13 = vmul.f32 %v7102_v21, %v9609_v48  ;;  %v3864_v38 = vmul.f32 %v9150_v11, %v9733_v29  ;;  %v10571_v17 = vld [vmem:[#allocation47_spill] sm:$0xff] }
 0x4a6   : > { %10564 = vst [vmem:[#allocation54_spill] sm:$0xff] %v9805_v44  ;;  %7111 = vpow2.f32 %v6042_v15  ;;  %v6044_v46 = vmul.f32 -1.442695, %v9790_v47  ;;  %v4756_v37 = vadd.f32 %v4755_v27, %v4754_v19  ;;  %v3698_v55 = vadd.f32 %v9598_v34, %v3666_v2  ;;  %v3633_v19 = vld [vmem:[#allocation2 + $0x120] sm:$0xff] }
 0x4a7   : > { %10565 = vst [vmem:[#allocation55_spill] sm:$0xff] %v9809_v6  ;;  %10566 = vst [vmem:[#allocation56_spill] sm:$0xff] %v9812_v13  ;;  %v7106_v26 = vpop.eup %7105  ;;  %7113 = vpow2.f32 %v9694_v45  ;;  %v9820_v30 = vmul.f32 %v9756_v31, %v4440_v41  ;;  %v3766_v59 = vmul.f32 %v9140_v63, %v9743_v40  ;;  %v3896_v48 = vadd.f32 %v3864_v38, %v3796_v0 }
 0x4a8   : > { %7115 = vpow2.f32 %v9697_v32  ;;  %v9826_v29 = vmul.f32 %v9756_v31, %v4441_v62  ;;  %v9829_v21 = vmul.f32 %v7104_v33, %v9614_v60  ;;  %v3964_v15 = vmul.f32 %v9162_v51, %v9736_v9  ;;  %v3631_v33 = vld [vmem:[#allocation2 + $0x108] sm:$0xff] }
 0x4a9   : > { %10567 = vst [vmem:[#allocation57_spill] sm:$0xff] %v9820_v30  ;;  %7117 = vpow2.f32 %v6043_v7  ;;  %v4095_v45 = vadd.f32 %v4063_v54, %v3995_v49  ;;  %v4757_v24 = vsel %vm3512_vm6, %v9812_v13, 0.0  ;;  %v3501_v38 = vmul.f32 %v7096_v10, %v10570_v8 }
 0x4aa   : > { %10568 = vst [vmem:[#allocation58_spill] sm:$0xff] %v9826_v29  ;;  %10569 = vst [vmem:[#allocation59_spill] sm:$0xff] %v9829_v21  ;;  %7119 = vpow2.f32 %v6044_v46  ;;  %v3506_v32 = vmul.f32 %v7098_v14, %v10571_v17  ;;  %v4758_v27 = vadd.f32 %v4757_v24, %v4756_v37  ;;  %v3798_v0 = vadd.f32 %v3766_v59, %v3698_v55 }
 0x4ab   : > { %v7108_v2 = vpop.eup %7107  ;;  %v3865_v60 = vmul.f32 %v9150_v11, %v9745_v56  ;;  %v4163_v9 = vmul.f32 %v9191_v42, %v9745_v56  ;;  %v3866_v41 = vmul.f32 %v9150_v11, %v9759_v1  ;;  %v4064_v49 = vmul.f32 %v9175_v5, %v9743_v40  ;;  %3589 = vst.msk [vmem:[#allocation2 + $0x111] sm:$0xff] %vm3512_vm6, %v3501_v38  ;;  %v3733_v56 = vld [vmem:[#allocation2 + $0x121] sm:$0xff] }
 0x4ac   : > { %v7110_v54 = vpop.eup %7109  ;;  %v3996_v10 = vadd.f32 %v3964_v15, %v3896_v48  ;;  %3594 = vst.msk [vmem:[#allocation2 + $0x151] sm:$0xff] %vm3512_vm6, %v3506_v32  ;;  %v3408_v14 = vadd.f32 1.0, %v7100_v12  ;;  %v4164_v7 = vmul.f32 %v9191_v42, %v9759_v1  ;;  %v3669_v62 = vmul.f32 %v9122_v4, %v3633_v19 }
 0x4ad   : > { %v4195_v46 = vadd.f32 %v4163_v9, %v4095_v45  ;;  %v3411_v37 = vadd.f32 1.0, %v7106_v26  ;;  %v3897_v55 = vadd.f32 %v3865_v60, %v3797_v57  ;;  %v4759_v59 = vsel %vm3512_vm6, %v9829_v21, 0.0  ;;  %v3731_v26 = vld [vmem:[#allocation2 + $0x109] sm:$0xff] }
 0x4ae   : > { %v3667_v40 = vmul.f32 %v9122_v4, %v3631_v33  ;;  %v3409_v48 = vadd.f32 1.0, %v7108_v2  ;;  %v3898_v15 = vadd.f32 %v3866_v41, %v3798_v0  ;;  %v4620_v24 = vadd.f32 1.0, %v7110_v54  ;;  %v9869_v41 = vld [vmem:[#allocation2 + $0x128] sm:$0xff] }
 0x4af   : > { %v9853_v8 = vadd.f32 %v4759_v59, %v4758_v27  ;;  %v4264_v12 = vmul.f32 %v9221_v52, %v3631_v33  ;;  %v3769_v1 = vmul.f32 %v9140_v63, %v3733_v56  ;;  %v9858_v17 = vmul.f32 %v9162_v51, %v3633_v19 }
 0x4b0   : > { %v7112_v38 = vpop.eup %7111  ;;  %v4096_v57 = vadd.f32 %v4064_v49, %v3996_v10  ;;  %7121 = vrcp.f32 %v3408_v14  ;;  %v3701_v32 = vadd.f32 %v9598_v34, %v3669_v62  ;;  %v3965_v2 = vmul.f32 %v9162_v51, %v3631_v33 }
 0x4b1   : > { %v7114_v45 = vpop.eup %7113  ;;  %v4296_v0 = vadd.f32 %v4264_v12, %v4195_v46  ;;  %7123 = vrcp.f32 %v3411_v37  ;;  %v9863_v60 = vmul.f32 %v9175_v5, %v3733_v56  ;;  %v9866_v9 = vmul.f32 %v9221_v52, %v3633_v19 }
 0x4b2   : > { %v7116_v27 = vpop.eup %7115  ;;  %v3699_v54 = vadd.f32 %v9598_v34, %v3667_v40  ;;  %7125 = vrcp.f32 %v3409_v48  ;;  %v4621_v10 = vadd.f32 1.0, %v7112_v38  ;;  %v9872_v14 = vmul.f32 %v9226_v58, %v3733_v56  ;;  %v3632_v62 = vld [vmem:[#allocation2 + $0x110] sm:$0xff] }
 0x4b3   : > { %v7118_v49 = vpop.eup %7117  ;;  %7127 = vrcp.f32 %v4620_v24  ;;  %v4364_v33 = vmul.f32 %v9226_v58, %v3731_v26  ;;  %v3767_v37 = vmul.f32 %v9140_v63, %v3731_v26  ;;  %v3668_v19 = vmul.f32 %v9122_v4, %v3632_v62  ;;  %v3831_v59 = vld [vmem:[#allocation2 + $0x10a] sm:$0xff] }
 0x4b4   : > { %v7120_v46 = vpop.eup %7119  ;;  %v3966_v40 = vmul.f32 %v9162_v51, %v3632_v62  ;;  %v4196_v12 = vadd.f32 %v4164_v7, %v4096_v57  ;;  %v3801_v21 = vadd.f32 %v3769_v1, %v3701_v32  ;;  %v3997_v48 = vadd.f32 %v3965_v2, %v3897_v55  ;;  %v3732_v56 = vld [vmem:[#allocation2 + $0x111] sm:$0xff] }
 0x4b5   : > { %v4396_v13 = vadd.f32 %v4364_v33, %v4296_v0  ;;  %v3670_v24 = vmul.f32 %v9122_v4, %v9869_v41  ;;  %v3799_v38 = vadd.f32 %v3767_v37, %v3699_v54  ;;  %v4065_v39 = vmul.f32 %v9175_v5, %v3731_v26  ;;  %v3832_v1 = vld [vmem:[#allocation2 + $0x112] sm:$0xff] }
 0x4b6   : > { %v3998_v29 = vadd.f32 %v3966_v40, %v3898_v15  ;;  %v4265_v6 = vmul.f32 %v9221_v52, %v3632_v62  ;;  %v4622_v30 = vadd.f32 1.0, %v7118_v49  ;;  %v4623_v53 = vadd.f32 1.0, %v7120_v46 }
 0x4b7   : > { %7129 = vrcp.f32 %v4621_v10  ;;  %v4464_v7 = vmul.f32 %v9756_v31, %v3831_v59  ;;  %v3700_v55 = vadd.f32 %v9598_v34, %v3668_v19  ;;  %v4066_v57 = vmul.f32 %v9175_v5, %v3732_v56 }
 0x4b8   : > { %v4297_v32 = vadd.f32 %v4265_v6, %v4196_v12  ;;  %v4365_v2 = vmul.f32 %v9226_v58, %v3732_v56  ;;  %v4097_v0 = vadd.f32 %v4065_v39, %v3997_v48  ;;  %v3702_v26 = vadd.f32 %v9598_v34, %v3670_v24  ;;  %v3833_v12 = vld [vmem:[#allocation2 + $0x122] sm:$0xff]  ;;  %v3834_v48 = vld [vmem:[#allocation2 + $0x12a] sm:$0xff] }
 0x4b9   : > { %v3770_v15 = vmul.f32 %v9140_v63, %v9881_v20  ;;  %v9891_v54 = vadd.f32 %v4464_v7, %v4396_v13  ;;  %v3768_v10 = vmul.f32 %v9140_v63, %v3732_v56  ;;  %v4098_v33 = vadd.f32 %v4066_v57, %v3998_v29 }
 0x4ba   : > { %v7122_v49 = vpop.eup %7121  ;;  %v4397_v62 = vadd.f32 %v4365_v2, %v4297_v32  ;;  %v3414_v46 = vadd.f32 1.0, %v7114_v45  ;;  %7131 = vrcp.f32 %v4622_v30  ;;  %v4165_v6 = vmul.f32 %v9191_v42, %v3831_v59  ;;  %v10572_v2 = vld [vmem:[#allocation48_spill] sm:$0xff] }
 0x4bb   : > { %v7124_v37 = vpop.eup %7123  ;;  %v4465_v19 = vmul.f32 %v9756_v31, %v3832_v1  ;;  %v6045_v39 = vmul.f32 -1.442695, %v9891_v54  ;;  %7133 = vrcp.f32 %v4623_v53  ;;  %v3800_v13 = vadd.f32 %v3768_v10, %v3700_v55 }
 0x4bc   : > { %v7126_v40 = vpop.eup %7125  ;;  %v4166_v24 = vmul.f32 %v9191_v42, %v3832_v1  ;;  %v3412_v7 = vadd.f32 1.0, %v7116_v27  ;;  %v3867_v29 = vmul.f32 %v9150_v11, %v3831_v59  ;;  %v3868_v45 = vmul.f32 %v9150_v11, %v3832_v1 }
 0x4bd   : > { %v7128_v56 = vpop.eup %7127  ;;  %v4197_v30 = vadd.f32 %v4165_v6, %v4097_v0  ;;  %v9900_v57 = vadd.f32 %v4465_v19, %v4397_v62  ;;  %7135 = vpow2.f32 %v6045_v39  ;;  %v3504_v44 = vmul.f32 %v7122_v49, %v10572_v2  ;;  %v3637_v49 = vld [vmem:[#allocation2 + $0x150] sm:$0xff] }
 0x4be   : > { %v4198_v32 = vadd.f32 %v4166_v24, %v4098_v33  ;;  %v3507_v53 = vmul.f32 %v7124_v37, %v9452_v23  ;;  %v3869_v61 = vmul.f32 %v9150_v11, %v3833_v12  ;;  %v3870_v55 = vmul.f32 %v9150_v11, %v3834_v48 }
 0x4bf   : > { %v3899_v10 = vadd.f32 %v3867_v29, %v3799_v38  ;;  %v3505_v27 = vmul.f32 %v7126_v40, %v9456_v25  ;;  %v9908_v59 = vmul.f32 %v7128_v56, %v9767_v50  ;;  %v3968_v1 = vmul.f32 %v9162_v51, %v9869_v41  ;;  %3592 = vst.msk [vmem:[#allocation2 + $0x139] sm:$0xff] %vm3512_vm6, %v3504_v44 }
 0x4c0   : > { %v4267_v0 = vmul.f32 %v9221_v52, %v9869_v41  ;;  %v3900_v33 = vadd.f32 %v3868_v45, %v3800_v13  ;;  %3595 = vst.msk [vmem:[#allocation2 + $0x159] sm:$0xff] %vm3512_vm6, %v3507_v53  ;;  %v3901_v62 = vadd.f32 %v3869_v61, %v3801_v21  ;;  %v4068_v25 = vmul.f32 %v9175_v5, %v9881_v20 }
 0x4c1   : > { %v7130_v23 = vpop.eup %7129  ;;  %v6046_v50 = vmul.f32 -1.442695, %v9900_v57  ;;  %3593 = vst.msk [vmem:[#allocation2 + $0x141] sm:$0xff] %vm3512_vm6, %v3505_v27  ;;  %7137 = vrcp.f32 %v3414_v46  ;;  %v3802_v38 = vadd.f32 %v3770_v15, %v3702_v26  ;;  %v4298_v37 = vadd.f32 %v9866_v9, %v4197_v30  ;;  %v3737_v15 = vld [vmem:[#allocation2 + $0x151] sm:$0xff] }
 0x4c2   : > { %v4299_v41 = vadd.f32 %v4267_v0, %v4198_v32  ;;  %7139 = vrcp.f32 %v3412_v7  ;;  %v4367_v44 = vmul.f32 %v9226_v58, %v9881_v20  ;;  %v3999_v6 = vadd.f32 %v9858_v17, %v3899_v10 }
 0x4c3   : > { %v3673_v61 = vmul.f32 %v9122_v4, %v3637_v49  ;;  %7141 = vpow2.f32 %v9702_v28  ;;  %v9927_v21 = vmul.f32 %v7130_v23, %v9782_v3  ;;  %v4761_v46 = vsel %vm3512_vm6, %v9908_v59, 0.0 }
 0x4c4   : > { %v4000_v26 = vadd.f32 %v3968_v1, %v3900_v33  ;;  %7143 = vpow2.f32 %v9712_v36  ;;  %v7132_v9 = vpop.eup %7131  ;;  %v4167_v19 = vmul.f32 %v9191_v42, %v3833_v12  ;;  %v4168_v20 = vmul.f32 %v9191_v42, %v3834_v48 }
 0x4c5   : > { %v4466_v17 = vmul.f32 %v9756_v31, %v3833_v12  ;;  %7145 = vpow2.f32 %v6046_v50  ;;  %v7134_v39 = vpop.eup %7133  ;;  %v3902_v28 = vadd.f32 %v3870_v55, %v3802_v38  ;;  %v4467_v3 = vmul.f32 %v9756_v31, %v3834_v48 }
 0x4c6   : > { %v4398_v40 = vadd.f32 %v9872_v14, %v4298_v37  ;;  %v4399_v13 = vadd.f32 %v4367_v44, %v4299_v41  ;;  %v4762_v24 = vadd.f32 %v4761_v46, %v9853_v8  ;;  %v3705_v7 = vadd.f32 %v9598_v34, %v3673_v61  ;;  %v3635_v56 = vld [vmem:[#allocation2 + $0x138] sm:$0xff] }
 0x4c7   : > { %v3773_v36 = vmul.f32 %v9140_v63, %v3737_v15  ;;  %v4099_v29 = vadd.f32 %v9863_v60, %v3999_v6  ;;  %v7136_v45 = vpop.eup %7135  ;;  %v4763_v12 = vsel %vm3512_vm6, %v9927_v21, 0.0  ;;  %v9944_v30 = vmul.f32 %v9162_v51, %v3637_v49  ;;  %v3735_v8 = vld [vmem:[#allocation2 + $0x139] sm:$0xff] }
 0x4c8   : > { %v3671_v48 = vmul.f32 %v9122_v4, %v3635_v56  ;;  %v4100_v14 = vadd.f32 %v4068_v25, %v4000_v26  ;;  %v9948_v32 = vmul.f32 %v9175_v5, %v3737_v15  ;;  %v3969_v2 = vmul.f32 %v9162_v51, %v3635_v56  ;;  %v3636_v53 = vld [vmem:[#allocation2 + $0x140] sm:$0xff] }
 0x4c9   : > { %v9952_v55 = vmul.f32 %v7132_v9, %v9785_v18  ;;  %v9955_v60 = vmul.f32 %v7134_v39, %v9790_v47  ;;  %v9958_v10 = vmul.f32 %v9221_v52, %v3637_v49  ;;  %v9961_v1 = vadd.f32 %v4466_v17, %v4398_v40  ;;  %v3736_v61 = vld [vmem:[#allocation2 + $0x141] sm:$0xff] }
 0x4ca   : > { %v3703_v27 = vadd.f32 %v9598_v34, %v3671_v48  ;;  %v9963_v0 = vadd.f32 %v4467_v3, %v4399_v13  ;;  %v9965_v23 = vadd.f32 %v4763_v12, %v4762_v24  ;;  %v4624_v25 = vadd.f32 1.0, %v7136_v45  ;;  %v3835_v46 = vld [vmem:[#allocation2 + $0x13a] sm:$0xff] }
 0x4cb   : > { %10573 = vst [vmem:[#allocation46_spill] sm:$0xff] %v9955_v60  ;;  %v7138_v33 = vpop.eup %7137  ;;  %v4199_v50 = vadd.f32 %v4167_v19, %v4099_v29  ;;  %v3672_v18 = vmul.f32 %v9122_v4, %v3636_v53  ;;  %v3771_v47 = vmul.f32 %v9140_v63, %v3735_v8  ;;  %v9969_v37 = vadd.f32 %v3773_v36, %v3705_v7  ;;  %v3836_v36 = vld [vmem:[#allocation2 + $0x142] sm:$0xff] }
 0x4cc   : > { %v7140_v38 = vpop.eup %7139  ;;  %v4200_v49 = vadd.f32 %v4168_v20, %v4100_v14  ;;  %v9972_v41 = vmul.f32 %v9226_v58, %v3737_v15  ;;  %v4001_v6 = vadd.f32 %v3969_v2, %v3901_v62  ;;  %v3970_v26 = vmul.f32 %v9162_v51, %v3636_v53  ;;  %v3638_v14 = vld [vmem:[#allocation2 + $0x158] sm:$0xff] }
 0x4cd   : > { %v7142_v44 = vpop.eup %7141  ;;  %v4765_v9 = vsel %vm3512_vm6, %v9952_v55, 0.0  ;;  %v9979_v19 = vsel %vm3512_vm6, %v9955_v60, 0.0  ;;  %v3803_v39 = vadd.f32 %v3771_v47, %v3703_v27  ;;  %v3704_v20 = vadd.f32 %v9598_v34, %v3672_v18 }
 0x4ce   : > { %v7144_v17 = vpop.eup %7143  ;;  %v6047_v15 = vmul.f32 -1.442695, %v9961_v1  ;;  %v6048_v3 = vmul.f32 -1.442695, %v9963_v0  ;;  %7147 = vrcp.f32 %v4624_v25  ;;  %v4069_v40 = vmul.f32 %v9175_v5, %v3735_v8 }
 0x4cf   : > { %v7146_v62 = vpop.eup %7145  ;;  %v4268_v13 = vmul.f32 %v9221_v52, %v3635_v56  ;;  %v4002_v24 = vadd.f32 %v3970_v26, %v3902_v28  ;;  %v3772_v7 = vmul.f32 %v9140_v63, %v3736_v61  ;;  %v3871_v29 = vmul.f32 %v9150_v11, %v3835_v46 }
 0x4d0   : > { %v3510_v45 = vmul.f32 %v7138_v33, %v9643_v22  ;;  %v3508_v12 = vmul.f32 %v7140_v38, %v9671_v43  ;;  %v4101_v48 = vadd.f32 %v4069_v40, %v4001_v6  ;;  %v4070_v2 = vmul.f32 %v9175_v5, %v3736_v61  ;;  %v3837_v40 = vld [vmem:[#allocation2 + $0x152] sm:$0xff] }
 0x4d1   : > { %v3415_v27 = vadd.f32 1.0, %v7142_v44  ;;  %v3413_v25 = vadd.f32 1.0, %v7144_v17  ;;  %v4625_v18 = vadd.f32 1.0, %v7146_v62  ;;  %v4300_v47 = vadd.f32 %v4268_v13, %v4199_v50  ;;  %v3738_v62 = vld [vmem:[#allocation2 + $0x159] sm:$0xff] }
 0x4d2   : > { %v3804_v60 = vadd.f32 %v3772_v7, %v3704_v20  ;;  %v3903_v56 = vadd.f32 %v3871_v29, %v3803_v39  ;;  %3598 = vst.msk [vmem:[#allocation2 + $0x181] sm:$0xff] %vm3512_vm6, %v3510_v45  ;;  %3596 = vst.msk [vmem:[#allocation2 + $0x169] sm:$0xff] %vm3512_vm6, %v3508_v12  ;;  %v4169_v28 = vmul.f32 %v9191_v42, %v3835_v46 }
 0x4d3   : > { %v4170_v22 = vmul.f32 %v9191_v42, %v3836_v36  ;;  %7149 = vrcp.f32 %v3415_v27  ;;  %v4102_v43 = vadd.f32 %v4070_v2, %v4002_v24  ;;  %v3674_v33 = vmul.f32 %v9122_v4, %v3638_v14 }
 0x4d4   : > { %v3872_v38 = vmul.f32 %v9150_v11, %v3836_v36  ;;  %v4269_v44 = vmul.f32 %v9221_v52, %v3636_v53  ;;  %7151 = vrcp.f32 %v3413_v25  ;;  %v4368_v50 = vmul.f32 %v9226_v58, %v3735_v8 }
 0x4d5   : > { %v4201_v6 = vadd.f32 %v4169_v28, %v4101_v48  ;;  %v4202_v26 = vadd.f32 %v4170_v22, %v4102_v43  ;;  %7153 = vpow2.f32 %v6047_v15  ;;  %v4003_v39 = vadd.f32 %v9944_v30, %v3903_v56  ;;  %v3838_v30 = vld [vmem:[#allocation2 + $0x15a] sm:$0xff] }
 0x4d6   : > { %7155 = vrcp.f32 %v4625_v18  ;;  %v3904_v17 = vadd.f32 %v3872_v38, %v3804_v60  ;;  %v4301_v20 = vadd.f32 %v4269_v44, %v4200_v49  ;;  %v4369_v13 = vmul.f32 %v9226_v58, %v3736_v61 }
 0x4d7   : > { %v4271_v24 = vmul.f32 %v9221_v52, %v3638_v14  ;;  %v4302_v7 = vadd.f32 %v9958_v10, %v4201_v6  ;;  %v4400_v53 = vadd.f32 %v4368_v50, %v4300_v47  ;;  %v3972_v29 = vmul.f32 %v9162_v51, %v3638_v14 }
 0x4d8   : > { %v4468_v8 = vmul.f32 %v9756_v31, %v3835_v46  ;;  %v3706_v15 = vadd.f32 %v9598_v34, %v3674_v33  ;;  %v4766_v60 = vadd.f32 %v4765_v9, %v9965_v23  ;;  %v7148_v45 = vpop.eup %7147  ;;  %v4401_v12 = vadd.f32 %v4369_v13, %v4301_v20 }
 0x4d9   : > { %v4303_v49 = vadd.f32 %v4271_v24, %v4202_v26  ;;  %v4402_v48 = vadd.f32 %v9972_v41, %v4302_v7  ;;  %7157 = vpow2.f32 %v6048_v3  ;;  %v3774_v61 = vmul.f32 %v9140_v63, %v3738_v62  ;;  %v3639_v27 = vld [vmem:[#allocation2 + $0x168] sm:$0xff] }
 0x4da   : > { %v3873_v10 = vmul.f32 %v9150_v11, %v3837_v40  ;;  %v4004_v2 = vadd.f32 %v3972_v29, %v3904_v17  ;;  %v4103_v14 = vadd.f32 %v9948_v32, %v4003_v39  ;;  %v4371_v46 = vmul.f32 %v9226_v58, %v3738_v62  ;;  %v3739_v26 = vld [vmem:[#allocation2 + $0x169] sm:$0xff]  ;;  %v3939_v29 = vld [vmem:[#allocation2 + $0x180] sm:$0xff] }
 0x4db   : > { %v4469_v25 = vmul.f32 %v9756_v31, %v3836_v36  ;;  %v4470_v23 = vmul.f32 %v9756_v31, %v3837_v40  ;;  %v10014_v9 = vadd.f32 %v4468_v8, %v4400_v53  ;;  %v3806_v18 = vadd.f32 %v3774_v61, %v3706_v15 }
 0x4dc   : > { %v3874_v41 = vmul.f32 %v9150_v11, %v3838_v30  ;;  %v4072_v3 = vmul.f32 %v9175_v5, %v3738_v62  ;;  %v4171_v47 = vmul.f32 %v9191_v42, %v3837_v40  ;;  %v4403_v28 = vadd.f32 %v4371_v46, %v4303_v49 }
 0x4dd   : > { %v7150_v56 = vpop.eup %7149  ;;  %v4471_v32 = vmul.f32 %v9756_v31, %v3838_v30  ;;  %v10020_v22 = vadd.f32 %v4469_v25, %v4401_v12  ;;  %v10022_v43 = vadd.f32 %v4470_v23, %v4402_v48  ;;  %v3675_v33 = vmul.f32 %v9122_v4, %v3639_v27 }
 0x4de   : > { %v7152_v36 = vpop.eup %7151  ;;  %v3511_v38 = vmul.f32 %v7150_v56, %v9674_v35  ;;  %v4104_v44 = vadd.f32 %v4072_v3, %v4004_v2  ;;  %v4203_v50 = vadd.f32 %v4171_v47, %v4103_v14  ;;  %v3973_v39 = vmul.f32 %v9162_v51, %v3639_v27 }
 0x4df   : > { %v7154_v6 = vpop.eup %7153  ;;  %v3509_v17 = vmul.f32 %v7152_v36, %v9687_v16  ;;  %v10028_v20 = vadd.f32 %v4471_v32, %v4403_v28  ;;  %v6049_v62 = vmul.f32 -1.442695, %v10014_v9  ;;  %v3905_v13 = vadd.f32 %v3873_v10, %v9969_v37 }
 0x4e0   : > { %v7156_v40 = vpop.eup %7155  ;;  %3599 = vst.msk [vmem:[#allocation2 + $0x189] sm:$0xff] %vm3512_vm6, %v3511_v38  ;;  %v4172_v24 = vmul.f32 %v9191_v42, %v3838_v30  ;;  %v6050_v35 = vmul.f32 -1.442695, %v10020_v22  ;;  %v4768_v7 = vadd.f32 %v9979_v19, %v4766_v60  ;;  %v10037_v53 = vmul.f32 %v7148_v45, %v9891_v54  ;;  %v4039_v60 = vld [vmem:[#allocation2 + $0x181] sm:$0xff] }
 0x4e1   : > { %3597 = vst.msk [vmem:[#allocation2 + $0x171] sm:$0xff] %vm3512_vm6, %v3509_v17  ;;  %v3906_v16 = vadd.f32 %v3874_v41, %v3806_v18  ;;  %v4272_v8 = vmul.f32 %v9221_v52, %v3639_v27  ;;  %v6051_v15 = vmul.f32 -1.442695, %v10022_v43  ;;  %v3707_v49 = vadd.f32 %v9598_v34, %v3675_v33 }
 0x4e2   : > { %v3775_v37 = vmul.f32 %v9140_v63, %v3739_v26  ;;  %v4204_v30 = vadd.f32 %v4172_v24, %v4104_v44  ;;  %v6052_v12 = vmul.f32 -1.442695, %v10028_v20  ;;  %v4005_v19 = vadd.f32 %v3973_v39, %v3905_v13 }
 0x4e3   : > { %v7158_v48 = vpop.eup %7157  ;;  %v4304_v54 = vadd.f32 %v4272_v8, %v4203_v50  ;;  %7159 = vpow2.f32 %v6049_v62  ;;  %v4626_v45 = vadd.f32 1.0, %v7154_v6  ;;  %v3975_v61 = vmul.f32 %v9162_v51, %v3939_v29 }
 0x4e4   : > { %7161 = vpow2.f32 %v6050_v35  ;;  %v4627_v10 = vadd.f32 1.0, %v7158_v48  ;;  %v10047_v2 = vmul.f32 %v7156_v40, %v9900_v57  ;;  %v4073_v34 = vmul.f32 %v9175_v5, %v3739_v26  ;;  %v7342_v35 = vld [vmem:[#allocation14] ss:$0 sm:$0xff] }
 0x4e5   : > { %v4372_v14 = vmul.f32 %v9226_v58, %v3739_v26  ;;  %7163 = vpow2.f32 %v6051_v15  ;;  %v4769_v27 = vsel %vm3512_vm6, %v10037_v53, 0.0  ;;  %v4075_v46 = vmul.f32 %v9175_v5, %v4039_v60 }
 0x4e6   : > { %v4274_v25 = vmul.f32 %v9221_v52, %v3939_v29  ;;  %v4374_v23 = vmul.f32 %v9226_v58, %v4039_v60  ;;  %7165 = vpow2.f32 %v6052_v12  ;;  %v3807_v18 = vadd.f32 %v3775_v37, %v3707_v49 }
 0x4e7   : > { %v3940_v41 = vld [vmem:[#allocation2 + $0x188] sm:$0xff]  ;;  %v4105_v57 = vadd.f32 %v4073_v34, %v4005_v19  ;;  %v4404_v56 = vadd.f32 %v4372_v14, %v4304_v54  ;;  %7167 = vrcp.f32 %v4626_v45  ;;  %v10057_v38 = vadd.f32 %v4769_v27, %v4768_v7 }
 0x4e8   : > { %v4040_v3 = vld [vmem:[#allocation2 + $0x189] sm:$0xff]  ;;  %v3740_v32 = vld [vmem:[#allocation2 + $0x171] sm:$0xff]  ;;  %v3976_v33 = vmul.f32 %v9162_v51, %v3940_v41  ;;  %7169 = vrcp.f32 %v4627_v10  ;;  %v10061_v44 = vsel %vm3512_vm6, %v10047_v2, 0.0  ;;  %v4275_v24 = vmul.f32 %v9221_v52, %v3940_v41 }
 0x4e9   : > { %v4139_v47 = vld [vmem:[#allocation2 + $0x182] sm:$0xff]  ;;  %v3640_v28 = vld [vmem:[#allocation2 + $0x170] sm:$0xff]  ;;  %v4076_v39 = vmul.f32 %v9175_v5, %v4040_v3  ;;  %v3776_v62 = vmul.f32 %v9140_v63, %v3740_v32  ;;  %v4373_v60 = vmul.f32 %v9226_v58, %v3740_v32 }
 0x4ea   : > { %v3839_v36 = vld [vmem:[#allocation2 + $0x16a] sm:$0xff]  ;;  %v3676_v50 = vmul.f32 %v9122_v4, %v3640_v28  ;;  %v3840_v6 = vld [vmem:[#allocation2 + $0x172] sm:$0xff]  ;;  %v3974_v17 = vmul.f32 %v9162_v51, %v3640_v28  ;;  %v4175_v13 = vmul.f32 %v9191_v42, %v4139_v47  ;;  %v4074_v4 = vmul.f32 %v9175_v5, %v3740_v32 }
 0x4eb   : > { %v3875_v26 = vmul.f32 %v9150_v11, %v3839_v36  ;;  %v4173_v40 = vmul.f32 %v9191_v42, %v3839_v36  ;;  %v3876_v15 = vmul.f32 %v9150_v11, %v3840_v6  ;;  %v4174_v51 = vmul.f32 %v9191_v42, %v3840_v6  ;;  %v4140_v27 = vld [vmem:[#allocation2 + $0x18a] sm:$0xff] }
 0x4ec   : > { %v3708_v7 = vadd.f32 %v7342_v35, %v3676_v50  ;;  %v4006_v8 = vadd.f32 %v3974_v17, %v3906_v16  ;;  %v4273_v37 = vmul.f32 %v9221_v52, %v3640_v28  ;;  %v4375_v16 = vmul.f32 %v9226_v58, %v4040_v3 }
 0x4ed   : > { %v3907_v29 = vadd.f32 %v3875_v26, %v3807_v18  ;;  %v4205_v49 = vadd.f32 %v4173_v40, %v4105_v57  ;;  %v7160_v63 = vpop.eup %7159  ;;  %v4472_v5 = vmul.f32 %v9756_v31, %v3839_v36  ;;  %v4473_v52 = vmul.f32 %v9756_v31, %v3840_v6 }
 0x4ee   : > { %v3808_v12 = vadd.f32 %v3776_v62, %v3708_v7  ;;  %v4106_v19 = vadd.f32 %v4074_v4, %v4006_v8  ;;  %v7162_v54 = vpop.eup %7161  ;;  %v4305_v45 = vadd.f32 %v4273_v37, %v4204_v30  ;;  %v4474_v28 = vmul.f32 %v9756_v31, %v4139_v47  ;;  %v10576_v4 = vld [vmem:[#allocation51_spill] sm:$0xff] }
 0x4ef   : > { %v4007_v48 = vadd.f32 %v3975_v61, %v3907_v29  ;;  %v4306_v10 = vadd.f32 %v4274_v25, %v4205_v49  ;;  %v7164_v34 = vpop.eup %7163  ;;  %v10080_v32 = vadd.f32 %v4472_v5, %v4404_v56  ;;  %v4628_v3 = vadd.f32 1.0, %v7160_v63 }
 0x4f0   : > { %v3908_v11 = vadd.f32 %v3876_v15, %v3808_v12  ;;  %v4206_v18 = vadd.f32 %v4174_v51, %v4106_v19  ;;  %v7166_v41 = vpop.eup %7165  ;;  %v4405_v57 = vadd.f32 %v4373_v60, %v4305_v45  ;;  %v4176_v26 = vmul.f32 %v9191_v42, %v4140_v27  ;;  %v10575_v42 = vld [vmem:[#allocation54_spill] sm:$0xff]  ;;  %v10577_v51 = vld [vmem:[#allocation57_spill] sm:$0xff]  ;;  %v10578_v12 = vld [vmem:[#allocation55_spill] sm:$0xff] }
 0x4f1   : > { %v4107_v14 = vadd.f32 %v4075_v46, %v4007_v48  ;;  %v4406_v61 = vadd.f32 %v4374_v23, %v4306_v10  ;;  %v7168_v30 = vpop.eup %7167  ;;  %v6053_v6 = vmul.f32 -1.442695, %v10080_v32  ;;  %v10574_v23 = vld [vmem:[#allocation45_spill] sm:$0xff]  ;;  %v4475_v56 = vmul.f32 %v9756_v31, %v4140_v27 }
 0x4f2   : > { %v4008_v25 = vadd.f32 %v3976_v33, %v3908_v11  ;;  %v4307_v58 = vadd.f32 %v4275_v24, %v4206_v18  ;;  %v7170_v36 = vpop.eup %7169  ;;  %v10083_v46 = vadd.f32 %v4473_v52, %v4405_v57  ;;  %v4629_v24 = vadd.f32 1.0, %v7162_v54 }
 0x4f3   : > { %v4207_v50 = vadd.f32 %v4175_v13, %v4107_v14  ;;  %v10085_v17 = vadd.f32 %v4474_v28, %v4406_v61  ;;  %7171 = vpow2.f32 %v6053_v6  ;;  %v4630_v8 = vadd.f32 1.0, %v7164_v34 }
 0x4f4   : > { %v4108_v62 = vadd.f32 %v4076_v39, %v4008_v25  ;;  %v4407_v47 = vadd.f32 %v4375_v16, %v4307_v58  ;;  %v6054_v33 = vmul.f32 -1.442695, %v10083_v46  ;;  %7173 = vrcp.f32 %v4628_v3 }
 0x4f5   : > { %v4308_v40 = vadd.f32 %v10574_v23, %v4207_v50  ;;  %v6055_v13 = vmul.f32 -1.442695, %v10085_v17  ;;  %v10096_v39 = vmul.f32 %v7168_v30, %v9961_v1  ;;  %v4772_v31 = vadd.f32 %v10061_v44, %v10057_v38  ;;  %v10579_v44 = vld [vmem:[#allocation58_spill] sm:$0xff] }
 0x4f6   : > { %v4208_v35 = vadd.f32 %v4176_v26, %v4108_v62  ;;  %v10093_v29 = vadd.f32 %v4475_v56, %v4407_v47  ;;  %7175 = vpow2.f32 %v6054_v33  ;;  %v4631_v63 = vadd.f32 1.0, %v7166_v41 }
 0x4f7   : > { %v4408_v7 = vadd.f32 %v10575_v42, %v4308_v40  ;;  %7177 = vpow2.f32 %v6055_v13  ;;  %v10108_v1 = vmul.f32 %v7170_v36, %v9963_v0  ;;  %v4773_v38 = vsel %vm3512_vm6, %v10096_v39, 0.0 }
 0x4f8   : > { %v4309_v15 = vadd.f32 %v10576_v4, %v4208_v35  ;;  %v6056_v37 = vmul.f32 -1.442695, %v10093_v29  ;;  %7179 = vrcp.f32 %v4629_v24  ;;  %v4774_v54 = vadd.f32 %v4773_v38, %v4772_v31 }
 0x4f9   : > { %v10102_v49 = vadd.f32 %v10577_v51, %v4408_v7  ;;  %v4775_v16 = vsel %vm3512_vm6, %v10108_v1, 0.0 }
 0x4fa   : > { %v4409_v48 = vadd.f32 %v10578_v12, %v4309_v15  ;;  %7181 = vpow2.f32 %v6056_v37  ;;  %v4776_v11 = vadd.f32 %v4775_v16, %v4774_v54 }
 0x4fb   : > { %v6057_v19 = vmul.f32 -1.442695, %v10102_v49  ;;  %7183 = vrcp.f32 %v4630_v8 }
 0x4fc   : > { %v4509_v60 = vadd.f32 %v10579_v44, %v4409_v48 }
 0x4fd   : > { %7185 = vpow2.f32 %v6057_v19  ;;  %v7172_v10 = vpop.eup %7171 }
 0x4fe   : > { %7187 = vrcp.f32 %v4631_v63  ;;  %v6058_v45 = vmul.f32 -1.442695, %v4509_v60  ;;  %v7174_v5 = vpop.eup %7173  ;;  %v4632_v34 = vadd.f32 1.0, %v7172_v10 }
 0x4ff   : > { %v10116_v0 = vmul.f32 %v7174_v5, %v10014_v9 }
 0x500   : > { %7189 = vpow2.f32 %v6058_v45  ;;  %v7176_v14 = vpop.eup %7175 }
 0x501   : > { %v7178_v27 = vpop.eup %7177  ;;  %v4633_v18 = vadd.f32 1.0, %v7176_v14  ;;  %7191 = vrcp.f32 %v4632_v34  ;;  %v4777_v57 = vsel %vm3512_vm6, %v10116_v0, 0.0 }
 0x502   : > { %v7180_v52 = vpop.eup %7179  ;;  %v4634_v41 = vadd.f32 1.0, %v7178_v27  ;;  %v4778_v30 = vadd.f32 %v4777_v57, %v4776_v11  ;;  %v10580_v27 = vmov 0.0  }
 0x503   : > { %7193 = vrcp.f32 %v4633_v18  ;;  %v10121_v28 = vmul.f32 %v7180_v52, %v10020_v22  ;;  %v4813_v52 = vld [vmem:[#allocation17] sm:$0x1] }
 0x504   : > { %v7182_v61 = vpop.eup %7181  ;;  %7195 = vrcp.f32 %v4634_v41 }
 0x505   : > { %v7184_v25 = vpop.eup %7183  ;;  %v4635_v50 = vadd.f32 1.0, %v7182_v61  ;;  %v4779_v3 = vsel %vm3512_vm6, %v10121_v28, 0.0 }
 0x506   : > { %v10124_v9 = vmul.f32 %v7184_v25, %v10022_v43  ;;  %v4780_v6 = vadd.f32 %v4779_v3, %v4778_v30 }
 0x507   : > { %v7186_v58 = vpop.eup %7185  ;;  %7197 = vrcp.f32 %v4635_v50 }
 0x508   : > { %v7188_v36 = vpop.eup %7187  ;;  %v4636_v26 = vadd.f32 1.0, %v7186_v58  ;;  %v4781_v22 = vsel %vm3512_vm6, %v10124_v9, 0.0 }
 0x509   : > { %v10129_v62 = vmul.f32 %v7188_v36, %v10028_v20  ;;  %v4782_v23 = vadd.f32 %v4781_v22, %v4780_v6  ;;  %v6815_v22 = vld [vmem:[#allocation21] sm:$0xff]  }
 0x50a   : > { %7199 = vrcp.f32 %v4636_v26  ;;  %v7190_v40 = vpop.eup %7189 }
 0x50b   : > { %v4637_v47 = vadd.f32 1.0, %v7190_v40  ;;  %v4783_v43 = vsel %vm3512_vm6, %v10129_v62, 0.0  ;;  %v7192_v56 = vpop.eup %7191  ;;  %v6817_v40 = vld [vmem:[#allocation21 + $0x10] sm:$0xff]  }
 0x50c   : > { %v4784_v33 = vadd.f32 %v4783_v43, %v4782_v23  ;;  %v10136_v13 = vmul.f32 %v7192_v56, %v10080_v32  ;;  %v6816_v23 = vld [vmem:[#allocation21 + $0x8] sm:$0xff]   ;;  %v4890_v43 = vld [vmem:[#allocation20] sm:$0x1] }
 0x50d   : > { %7201 = vrcp.f32 %v4637_v47  ;;  %v7194_v24 = vpop.eup %7193  ;;  %v6818_v47 = vld [vmem:[#allocation21 + $0x18] sm:$0xff]  }
 0x50e   : > { %v7196_v35 = vpop.eup %7195  ;;  %v10139_v20 = vmul.f32 %v7194_v24, %v10083_v46  ;;  %v4785_v42 = vsel %vm3512_vm6, %v10136_v13, 0.0 }
 0x50f   : > { %v10144_v7 = vmul.f32 %v7196_v35, %v10085_v17  ;;  %v4786_v8 = vadd.f32 %v4785_v42, %v4784_v33 }
 0x510   : > { %v4787_v4 = vsel %vm3512_vm6, %v10139_v20, 0.0 }
 0x511   : > { %v7198_v31 = vpop.eup %7197  ;;  %v4788_v32 = vadd.f32 %v4787_v4, %v4786_v8  ;;  %v4789_v46 = vsel %vm3512_vm6, %v10144_v7, 0.0 }
 0x512   : > { %v10149_v15 = vmul.f32 %v7198_v31, %v10093_v29 }
 0x513   : > { %v4790_v63 = vadd.f32 %v4789_v46, %v4788_v32 }
 0x514   : > { %v7200_v51 = vpop.eup %7199  ;;  %v4791_v17 = vsel %vm3512_vm6, %v10149_v15, 0.0 }
 0x515   : > { %v10154_v37 = vmul.f32 %v7200_v51, %v10102_v49  ;;  %v4792_v12 = vadd.f32 %v4791_v17, %v4790_v63  ;;  %v10581_v51 = vld [vmem:[#allocation36_spill] sm:$0xff] }
 0x516   : > { %v10582_v46 = vsub.s32 0, %v10581_v51  ;;  %v10583_v17 = vld [vmem:[#allocation44_spill] sm:$0xff] }
 0x517   : > { %v4793_v48 = vsel %vm3512_vm6, %v10154_v37, 0.0  ;;  %v7202_v19 = vpop.eup %7201 }
 0x518   : > { %v10160_v38 = vmul.f32 %v7202_v19, %v4509_v60  ;;  %v4794_v29 = vadd.f32 %v4793_v48, %v4792_v12  ;;  %v4889_v60 = vld [vmem:[#allocation18] sm:$0x3]  ;;  %v10584_v48 = vld [vmem:[#allocation37_spill] sm:$0xff] }
 0x519   : > { %v4897_v18 = vsel %vm4895_vm8, %v4889_v60, 0 }
 0x51a   : > { %v4795_v44 = vsel %vm3512_vm6, %v10160_v38, 0.0 }
 0x51b   : > { %v4796_v54 = vadd.f32 %v4795_v44, %v4794_v29  ;;  %v10585_v29 = vld [vmem:[#allocation39_spill] sm:$0xff] }
 0x51d   : > { %v4797_v45 = vrot.slane %v4796_v54, 4 }
 0x51f   : > { %v4798_v10 = vadd.f32 %v4797_v45, %v4796_v54  ;;  %v10586_v54 = vld [vmem:[#allocation38_spill] sm:$0xff] }
 0x521   : > { %v4799_v49 = vrot.slane %v4798_v10, 2 }
 0x523   : > { %v4800_v16 = vadd.f32 %v4799_v49, %v4798_v10  ;;  %v10587_v10 = vld [vmem:[#allocation49_spill] sm:$0xff] }
 0x525   : > { %v4801_v5 = vrot.slane %v4800_v16, 1 }
 0x527   : > { %v4802_v34 = vadd.f32 %v4801_v5, %v4800_v16  ;;  %v10588_v16 = vld [vmem:[#allocation40_spill] sm:$0xff] }
 0x529   : > { %v4803_v11 = vmul.f32 0.00390625, %v4802_v34 }
 0x52b   : > { %v4804_v14 = vpack.c.bf16 %v4803_v11, %v4803_v11 }
 0x52d   : > { %6414 = vmatmul.mubr.msk.bf16.vlgmr.msra.gmra.mrb[60].mxu1 %vm3512_vm6, %v4804_v14 }
 0x52e   : > { %6419 = vmatprep.mubr.msk.bf16.mxu1 %vm7819_vm7, %v10580_v27  ;;  %6418 = vmatpush3.bf16.msra.mxu1 %v4897_v18  ;;  %v10589_v27 = vld [vmem:[#allocation41_spill] sm:$0xff]  ;;  %v10590_v18 = vld [vmem:[#allocation50_spill] sm:$0xff] }
 0x52f   : > { %6423 = vmatprep.subr.bf16.mxu1 %v6815_v22 }
 0x600   : > { %v4875_v41 = vpop.f32.mrb[60].mxu1 }
 0x601   : > { %v4876_v57 = vadd.f32 %v4875_v41, %v4813_v52  ;;  %v6415_v61 = vpop.f32.mrb[61].mxu1  ;;  %v10591_v41 = vld [vmem:[#allocation42_spill] sm:$0xff] }
 0x602   : > { %v4878_v30 = vpop.f32.mrb[62].mxu1  ;;  %v10592_v61 = vld [vmem:[#allocation43_spill] sm:$0xff] }
 0x603   : > { %v6064_v25 = vmul.f32 -1.442695, %v4876_v57  ;;  %v6416_v50 = vpop.f32.mrb[63].mxu1 }
 0x605   : > { %7203 = vpow2.f32 %v6064_v25 }
 0x60f   : > { %v7204_v58 = vpop.eup %7203 }
 0x610   : > { %v4884_v3 = vadd.f32 1.0, %v7204_v58  ;;  %v10593_v58 = vld [vmem:[#allocation52_spill] sm:$0xff] }
 0x612   : > { %7205 = vrcp.f32 %v4884_v3 }
 0x61c   : > { %v7206_v36 = vpop.eup %7205 }
 0x61d   : > { %v4887_v26 = vmul.f32 %v7206_v36, %v4876_v57  ;;  %v10594_v36 = vld [vmem:[#allocation53_spill] sm:$0xff] }
 0x61f   : > { %v4888_v6 = vpack.c.bf16 %v4887_v26, %v4887_v26 }
 0x621   : > { %6420 = vmatmul.mubr.msk.bf16.vlgmr.msra.gmra.mrb[64].mxu1 %vm4891_vm9, %v4888_v6  ;;  %v10595_v6 = vld [vmem:[#allocation56_spill] sm:$0xff] }
 0x622   : > { %6424 = vmatpush3.bf16.msra.mxu1 %v6815_v22 }
 0x623   : > { %6425 = vmatprep.subr.bf16.mxu1 %v6816_v23 }
 0x626   : > { %6426 = vmatpush3.bf16.msra.mxu1 %v6816_v23  ;;  %v10596_v23 = vld [vmem:[#allocation59_spill] sm:$0xff] }
 0x627   : > { %6427 = vmatprep.subr.bf16.mxu1 %v6817_v40 }
 0x62a   : > { %6428 = vmatpush3.bf16.msra.mxu1 %v6817_v40 }
 0x62b   : > { %6429 = vmatprep.subr.bf16.mxu1 %v6818_v47 }
 0x62e   : > { %6430 = vmatpush3.bf16.msra.mxu1 %v6818_v47 }
 0x6f4   : > { %v4933_v56 = vpop.f32.mrb[64].mxu1 }
 0x6f5   : > { %v4934_v33 = vadd.f32 %v4933_v56, %v4890_v43  ;;  %v6421_v24 = vpop.f32.mrb[65].mxu1 }
 0x6f6   : > { %v4936_v35 = vpop.f32.mrb[66].mxu1 }
 0x6f7   : > { %v6066_v42 = vmul.f32 -1.442695, %v4934_v33  ;;  %v6422_v8 = vpop.f32.mrb[67].mxu1  ;;  %v10597_v35 = vld [vmem:[#allocation46_spill] sm:$0xff] }
 0x6f9   : > { %7207 = vpow2.f32 %v6066_v42 }
 0x703   : > { %v7208_v31 = vpop.eup %7207 }
 0x704   : > { %v4942_v4 = vadd.f32 1.0, %v7208_v31 }
 0x706   : > { %7209 = vrcp.f32 %v4942_v4 }
 0x710   : > { %v7210_v32 = vpop.eup %7209 }
 0x711   : > { %v4948_v63 = vrot.slane %v7210_v32, %v10582_v46 }
 0x713   : > { %v4949_v12 = vmul.f32 %v4948_v63, %v10583_v17  ;;  %v4950_v19 = vmul.f32 %v4948_v63, %v10584_v48  ;;  %v4951_v44 = vmul.f32 %v4948_v63, %v10585_v29  ;;  %v4952_v45 = vmul.f32 %v4948_v63, %v10586_v54 }
 0x714   : > { %v4953_v49 = vmul.f32 %v4948_v63, %v10587_v10  ;;  %v4954_v5 = vmul.f32 %v4948_v63, %v10588_v16  ;;  %v4955_v60 = vmul.f32 %v4948_v63, %v10589_v27  ;;  %v4956_v52 = vmul.f32 %v4948_v63, %v10590_v18 }
 0x715   : > { %v4981_v34 = vpack.c.bf16 %v4950_v19, %v4949_v12  ;;  %v4982_v11 = vpack.c.bf16 %v4952_v45, %v4951_v44  ;;  %v4957_v57 = vmul.f32 %v4948_v63, %v10591_v41  ;;  %v4958_v30 = vmul.f32 %v4948_v63, %v10592_v61 }
 0x716   : > { %v4983_v14 = vpack.c.bf16 %v4954_v5, %v4953_v49  ;;  %v4984_v25 = vpack.c.bf16 %v4956_v52, %v4955_v60  ;;  %v4959_v3 = vmul.f32 %v4948_v63, %v10593_v58  ;;  %v4960_v26 = vmul.f32 %v4948_v63, %v10594_v36 }
 0x717   : > { %6431 = vmatprep.mubr.msk.bf16.mxu1 %vm3512_vm6, %v4981_v34  ;;  %v4985_v50 = vpack.c.bf16 %v4958_v30, %v4957_v57  ;;  %v4961_v22 = vmul.f32 %v4948_v63, %v10595_v6  ;;  %v4962_v40 = vmul.f32 %v4948_v63, %v10596_v23  ;;  %v4963_v56 = vmul.f32 %v4948_v63, %v9908_v59 }
 0x718   : > { %6432 = vmatmul.mubr.msk.bf16.vlgmr.msra.gmra.mrb[68].mxu1 %vm3512_vm6, %v4982_v11  ;;  %v4986_v47 = vpack.c.bf16 %v4960_v26, %v4959_v3  ;;  %v4964_v33 = vmul.f32 %v4948_v63, %v9927_v21  ;;  %v4965_v24 = vmul.f32 %v4948_v63, %v9952_v55  ;;  %v4966_v42 = vmul.f32 %v4948_v63, %v10597_v35 }
 0x719   : > { %6435 = vmatprep.mubr.msk.bf16.mxu1 %vm3512_vm6, %v4983_v14  ;;  %v4987_v43 = vpack.c.bf16 %v4962_v40, %v4961_v22  ;;  %v4967_v4 = vmul.f32 %v4948_v63, %v10037_v53  ;;  %v4968_v32 = vmul.f32 %v4948_v63, %v10047_v2  ;;  %v4969_v51 = vmul.f32 %v4948_v63, %v10096_v39 }
 0x71a   : > { %v4988_v8 = vpack.c.bf16 %v4964_v33, %v4963_v56  ;;  %v4989_v31 = vpack.c.bf16 %v4966_v42, %v4965_v24  ;;  %v4970_v59 = vmul.f32 %v4948_v63, %v10108_v1  ;;  %v4971_v55 = vmul.f32 %v4948_v63, %v10116_v0 }
 0x71b   : > { %v4990_v46 = vpack.c.bf16 %v4968_v32, %v4967_v4  ;;  %v4972_v17 = vmul.f32 %v4948_v63, %v10121_v28  ;;  %v4973_v12 = vmul.f32 %v4948_v63, %v10124_v9  ;;  %v4974_v53 = vmul.f32 %v4948_v63, %v10129_v62 }
 0x71c   : > { %v4991_v21 = vpack.c.bf16 %v4970_v59, %v4969_v51  ;;  %v4975_v39 = vmul.f32 %v4948_v63, %v10136_v13  ;;  %v4976_v1 = vmul.f32 %v4948_v63, %v10139_v20  ;;  %v4977_v19 = vmul.f32 %v4948_v63, %v10144_v7  ;;  %v10217_v13 = vld [vmem:[#allocation23] ss:$0 sm:$0xff] }
 0x71d   : > { %v4992_v48 = vpack.c.bf16 %v4972_v17, %v4971_v55  ;;  %v4993_v2 = vpack.c.bf16 %v4974_v53, %v4973_v12  ;;  %v4978_v0 = vmul.f32 %v4948_v63, %v10149_v15  ;;  %v4979_v9 = vmul.f32 %v4948_v63, %v10154_v37 }
 0x71e   : > { %v4994_v29 = vpack.c.bf16 %v4976_v1, %v4975_v39  ;;  %v4980_v62 = vmul.f32 %v4948_v63, %v10160_v38 }
 0x71f   : > { %v4995_v28 = vpack.c.bf16 %v4978_v0, %v4977_v19 }
 0x720   : > { %6436 = vmatmul.mubr.msk.bf16.gmra.mrb[72].mxu1 %vm3512_vm6, %v4984_v25  ;;  %v4996_v44 = vpack.c.bf16 %v4980_v62, %v4979_v9 }
 0x721   : > { %6439 = vmatprep.mubr.msk.bf16.mxu1 %vm3512_vm6, %v4985_v50 }
 0x728   : > { %6440 = vmatmul.mubr.msk.bf16.gmra.mrb[76].mxu1 %vm3512_vm6, %v4986_v47 }
 0x729   : > { %6443 = vmatprep.mubr.msk.bf16.mxu1 %vm3512_vm6, %v4987_v43 }
 0x730   : > { %6444 = vmatmul.mubr.msk.bf16.gmra.mrb[80].mxu1 %vm3512_vm6, %v4988_v8 }
 0x731   : > { %6447 = vmatprep.mubr.msk.bf16.mxu1 %vm3512_vm6, %v4989_v31 }
 0x738   : > { %6448 = vmatmul.mubr.msk.bf16.gmra.mrb[84].mxu1 %vm3512_vm6, %v4990_v46 }
 0x739   : > { %6451 = vmatprep.mubr.msk.bf16.mxu1 %vm3512_vm6, %v4991_v21 }
 0x740   : > { %6452 = vmatmul.mubr.msk.bf16.gmra.mrb[88].mxu1 %vm3512_vm6, %v4992_v48 }
 0x741   : > { %6455 = vmatprep.mubr.msk.bf16.mxu1 %vm3512_vm6, %v4993_v2 }
 0x748   : > { %6456 = vmatmul.mubr.msk.bf16.gmra.mrb[92].mxu1 %vm3512_vm6, %v4994_v29 }
 0x749   : > { %6459 = vmatprep.mubr.msk.bf16.mxu1 %vm3512_vm6, %v4995_v28 }
 0x750   : > { %6460 = vmatmul.mubr.msk.bf16.gmra.mrb[96].mxu1 %vm3512_vm6, %v4996_v44 }
 0x7eb   : > { %v6433_v20 = vpop.f32.mrb[68].mxu1 }
 0x7ec   : > { %v10220_v7 = vadd.f32 %v6433_v20, %v10217_v13  ;;  %v5118_v15 = vpop.f32.mrb[69].mxu1 }
 0x7ed   : > { %v10223_v54 = vadd.f32 %v10217_v13, %v5118_v15  ;;  %v6434_v45 = vpop.f32.mrb[70].mxu1 }
 0x7ee   : > { %v6090_v10 = vmul.f32 -1.442695, %v10220_v7  ;;  %v10227_v37 = vadd.f32 %v6434_v45, %v10217_v13  ;;  %v5121_v38 = vpop.f32.mrb[71].mxu1 }
 0x7ef   : > { %v6088_v63 = vmul.f32 -1.442695, %v10223_v54  ;;  %v10231_v49 = vadd.f32 %v10217_v13, %v5121_v38 }
 0x7f0   : > { %7211 = vpow2.f32 %v6090_v10  ;;  %v6091_v16 = vmul.f32 -1.442695, %v10227_v37 }
 0x7f1   : > { %7213 = vpow2.f32 %v6088_v63  ;;  %v6089_v5 = vmul.f32 -1.442695, %v10231_v49 }
 0x7f2   : > { %7215 = vpow2.f32 %v6091_v16 }
 0x7f3   : > { %7217 = vpow2.f32 %v6089_v5  ;;  %v6437_v34 = vpop.f32.mrb[72].mxu1 }
 0x7f4   : > { %v10236_v11 = vadd.f32 %v6437_v34, %v10217_v13  ;;  %v5134_v14 = vpop.f32.mrb[73].mxu1 }
 0x7f5   : > { %v10239_v27 = vadd.f32 %v10217_v13, %v5134_v14  ;;  %v6438_v60 = vpop.f32.mrb[74].mxu1 }
 0x7f6   : > { %v6094_v18 = vmul.f32 -1.442695, %v10236_v11  ;;  %v10243_v52 = vadd.f32 %v6438_v60, %v10217_v13  ;;  %v5137_v41 = vpop.f32.mrb[75].mxu1 }
 0x7f7   : > { %v6092_v57 = vmul.f32 -1.442695, %v10239_v27  ;;  %v10247_v61 = vadd.f32 %v10217_v13, %v5137_v41 }
 0x7f8   : > { %7219 = vpow2.f32 %v6094_v18  ;;  %v6095_v30 = vmul.f32 -1.442695, %v10243_v52 }
 0x7f9   : > { %7221 = vpow2.f32 %v6092_v57  ;;  %v6093_v25 = vmul.f32 -1.442695, %v10247_v61 }
 0x7fa   : > { %v7212_v50 = vpop.eup %7211  ;;  %7223 = vpow2.f32 %v6095_v30 }
 0x7fb   : > { %v7214_v58 = vpop.eup %7213  ;;  %v5343_v3 = vadd.f32 1.0, %v7212_v50  ;;  %7225 = vpow2.f32 %v6093_v25  ;;  %v6441_v36 = vpop.f32.mrb[76].mxu1 }
 0x7fc   : > { %v7216_v26 = vpop.eup %7215  ;;  %v5341_v6 = vadd.f32 1.0, %v7214_v58  ;;  %v10252_v22 = vadd.f32 %v6441_v36, %v10217_v13  ;;  %v5150_v23 = vpop.f32.mrb[77].mxu1 }
 0x7fd   : > { %v7218_v40 = vpop.eup %7217  ;;  %7227 = vrcp.f32 %v5343_v3  ;;  %v5344_v47 = vadd.f32 1.0, %v7216_v26  ;;  %v10255_v43 = vadd.f32 %v10217_v13, %v5150_v23  ;;  %v6442_v56 = vpop.f32.mrb[78].mxu1 }
 0x7fe   : > { %7229 = vrcp.f32 %v5341_v6  ;;  %v5342_v33 = vadd.f32 1.0, %v7218_v40  ;;  %v6098_v24 = vmul.f32 -1.442695, %v10252_v22  ;;  %v10259_v35 = vadd.f32 %v6442_v56, %v10217_v13  ;;  %v5153_v42 = vpop.f32.mrb[79].mxu1 }
 0x7ff   : > { %7231 = vrcp.f32 %v5344_v47  ;;  %v6096_v8 = vmul.f32 -1.442695, %v10255_v43  ;;  %v10263_v31 = vadd.f32 %v10217_v13, %v5153_v42 }
 0x800   : > { %7233 = vrcp.f32 %v5342_v33  ;;  %v6099_v4 = vmul.f32 -1.442695, %v10259_v35 }
 0x801   : > { %7235 = vpow2.f32 %v6098_v24  ;;  %v6097_v32 = vmul.f32 -1.442695, %v10263_v31 }
 0x802   : > { %v7220_v51 = vpop.eup %7219  ;;  %7237 = vpow2.f32 %v6096_v8 }
 0x803   : > { %v7222_v59 = vpop.eup %7221  ;;  %v5347_v46 = vadd.f32 1.0, %v7220_v51  ;;  %7239 = vpow2.f32 %v6099_v4  ;;  %v6445_v21 = vpop.f32.mrb[80].mxu1 }
 0x804   : > { %v7224_v55 = vpop.eup %7223  ;;  %v5345_v17 = vadd.f32 1.0, %v7222_v59  ;;  %7241 = vpow2.f32 %v6097_v32  ;;  %v10268_v12 = vadd.f32 %v6445_v21, %v10217_v13  ;;  %v5166_v53 = vpop.f32.mrb[81].mxu1 }
 0x805   : > { %v7226_v48 = vpop.eup %7225  ;;  %7243 = vrcp.f32 %v5347_v46  ;;  %v5348_v2 = vadd.f32 1.0, %v7224_v55  ;;  %v10271_v39 = vadd.f32 %v10217_v13, %v5166_v53  ;;  %v6446_v1 = vpop.f32.mrb[82].mxu1 }
 0x806   : > { %7245 = vrcp.f32 %v5345_v17  ;;  %v5346_v19 = vadd.f32 1.0, %v7226_v48  ;;  %v6102_v0 = vmul.f32 -1.442695, %v10268_v12  ;;  %v10275_v29 = vadd.f32 %v6446_v1, %v10217_v13  ;;  %v5169_v28 = vpop.f32.mrb[83].mxu1 }
 0x807   : > { %v7228_v9 = vpop.eup %7227  ;;  %7247 = vrcp.f32 %v5348_v2  ;;  %v6100_v62 = vmul.f32 -1.442695, %v10271_v39  ;;  %v10279_v44 = vadd.f32 %v10217_v13, %v5169_v28 }
 0x808   : > { %v7230_v20 = vpop.eup %7229  ;;  %7249 = vrcp.f32 %v5346_v19  ;;  %v6103_v15 = vmul.f32 -1.442695, %v10275_v29  ;;  %v5439_v60 = vmul.f32 %v7228_v9, %v10220_v7 }
 0x809   : > { %v7232_v45 = vpop.eup %7231  ;;  %7251 = vpow2.f32 %v6102_v0  ;;  %v6101_v10 = vmul.f32 -1.442695, %v10279_v44  ;;  %v5437_v16 = vmul.f32 %v7230_v20, %v10223_v54 }
 0x80a   : > { %v7234_v38 = vpop.eup %7233  ;;  %7253 = vpow2.f32 %v6100_v62  ;;  %v5440_v25 = vmul.f32 %v7232_v45, %v10227_v37 }
 0x80b   : > { %v7236_v63 = vpop.eup %7235  ;;  %v5438_v5 = vmul.f32 %v7234_v38, %v10231_v49  ;;  %7255 = vpow2.f32 %v6103_v15  ;;  %v6449_v34 = vpop.f32.mrb[84].mxu1 }
 0x80c   : > { %v7238_v14 = vpop.eup %7237  ;;  %v5351_v18 = vadd.f32 1.0, %v7236_v63  ;;  %7257 = vpow2.f32 %v6101_v10  ;;  %v10287_v41 = vadd.f32 %v6449_v34, %v10217_v13  ;;  %v5182_v57 = vpop.f32.mrb[85].mxu1 }
 0x80d   : > { %v7240_v30 = vpop.eup %7239  ;;  %v5469_v50 = vadd.f32 %v5438_v5, %v5437_v16  ;;  %v5349_v58 = vadd.f32 1.0, %v7238_v14  ;;  %v10291_v54 = vadd.f32 %v10217_v13, %v5182_v57  ;;  %v6450_v49 = vpop.f32.mrb[86].mxu1 }
 0x80e   : > { %v7242_v3 = vpop.eup %7241  ;;  %7259 = vrcp.f32 %v5351_v18  ;;  %v5352_v36 = vadd.f32 1.0, %v7240_v30  ;;  %v6106_v7 = vmul.f32 -1.442695, %v10287_v41  ;;  %v10295_v26 = vadd.f32 %v6450_v49, %v10217_v13  ;;  %v5185_v6 = vpop.f32.mrb[87].mxu1 }
 0x80f   : > { %v7244_v23 = vpop.eup %7243  ;;  %v5470_v40 = vadd.f32 %v5469_v50, %v5439_v60  ;;  %7261 = vrcp.f32 %v5349_v58  ;;  %v5350_v47 = vadd.f32 1.0, %v7242_v3  ;;  %v6104_v37 = vmul.f32 -1.442695, %v10291_v54 }
 0x810   : > { %v7246_v56 = vpop.eup %7245  ;;  %7263 = vrcp.f32 %v5352_v36  ;;  %v6107_v33 = vmul.f32 -1.442695, %v10295_v26  ;;  %v10300_v24 = vadd.f32 %v10217_v13, %v5185_v6  ;;  %v5443_v46 = vmul.f32 %v7244_v23, %v10236_v11 }
 0x811   : > { %v7248_v42 = vpop.eup %7247  ;;  %v5441_v8 = vmul.f32 %v7246_v56, %v10239_v27  ;;  %v5471_v4 = vadd.f32 %v5470_v40, %v5440_v25  ;;  %7265 = vrcp.f32 %v5350_v47 }
 0x812   : > { %v7250_v32 = vpop.eup %7249  ;;  %7267 = vpow2.f32 %v6106_v7  ;;  %v6105_v51 = vmul.f32 -1.442695, %v10300_v24  ;;  %v5444_v48 = vmul.f32 %v7248_v42, %v10243_v52 }
 0x813   : > { %v7252_v59 = vpop.eup %7251  ;;  %v5472_v21 = vadd.f32 %v5471_v4, %v5441_v8  ;;  %v5442_v55 = vmul.f32 %v7250_v32, %v10247_v61  ;;  %7269 = vpow2.f32 %v6104_v37  ;;  %v6453_v17 = vpop.f32.mrb[88].mxu1 }
 0x814   : > { %v7254_v53 = vpop.eup %7253  ;;  %v5355_v2 = vadd.f32 1.0, %v7252_v59  ;;  %7271 = vpow2.f32 %v6107_v33  ;;  %v10308_v27 = vadd.f32 %v6453_v17, %v10217_v13  ;;  %v5198_v1 = vpop.f32.mrb[89].mxu1 }
 0x815   : > { %v7256_v19 = vpop.eup %7255  ;;  %v5473_v0 = vadd.f32 %v5472_v21, %v5442_v55  ;;  %v5353_v28 = vadd.f32 1.0, %v7254_v53  ;;  %7273 = vpow2.f32 %v6105_v51  ;;  %v10311_v11 = vadd.f32 %v10217_v13, %v5198_v1  ;;  %v6454_v9 = vpop.f32.mrb[90].mxu1 }
 0x816   : > { %v7258_v61 = vpop.eup %7257  ;;  %7275 = vrcp.f32 %v5355_v2  ;;  %v5356_v62 = vadd.f32 1.0, %v7256_v19  ;;  %v6110_v20 = vmul.f32 -1.442695, %v10308_v27  ;;  %v10315_v52 = vadd.f32 %v6454_v9, %v10217_v13  ;;  %v5201_v15 = vpop.f32.mrb[91].mxu1 }
 0x817   : > { %v5474_v45 = vadd.f32 %v5473_v0, %v5443_v46  ;;  %7277 = vrcp.f32 %v5353_v28  ;;  %v5354_v10 = vadd.f32 1.0, %v7258_v61  ;;  %v6108_v38 = vmul.f32 -1.442695, %v10311_v11 }
 0x818   : > { %v7260_v63 = vpop.eup %7259  ;;  %7279 = vrcp.f32 %v5356_v62  ;;  %v6111_v16 = vmul.f32 -1.442695, %v10315_v52  ;;  %v10320_v5 = vadd.f32 %v10217_v13, %v5201_v15 }
 0x819   : > { %v7262_v34 = vpop.eup %7261  ;;  %v5475_v14 = vadd.f32 %v5474_v45, %v5444_v48  ;;  %7281 = vrcp.f32 %v5354_v10  ;;  %v5447_v6 = vmul.f32 %v7260_v63, %v10252_v22 }
 0x81a   : > { %v7264_v60 = vpop.eup %7263  ;;  %v5445_v18 = vmul.f32 %v7262_v34, %v10255_v43  ;;  %7283 = vpow2.f32 %v6110_v20  ;;  %v6109_v57 = vmul.f32 -1.442695, %v10320_v5 }
 0x81b   : > { %v7266_v30 = vpop.eup %7265  ;;  %7285 = vpow2.f32 %v6108_v38  ;;  %v6457_v25 = vpop.f32.mrb[92].mxu1  ;;  %v5448_v37 = vmul.f32 %v7264_v60, %v10259_v35 }
 0x81c   : > { %v7268_v50 = vpop.eup %7267  ;;  %v5476_v58 = vadd.f32 %v5475_v14, %v5445_v18  ;;  %v5446_v49 = vmul.f32 %v7266_v30, %v10263_v31  ;;  %7287 = vpow2.f32 %v6111_v16  ;;  %v10326_v3 = vadd.f32 %v6457_v25, %v10217_v13  ;;  %v5214_v36 = vpop.f32.mrb[93].mxu1 }
 0x81d   : > { %v7270_v7 = vpop.eup %7269  ;;  %v5359_v23 = vadd.f32 1.0, %v7268_v50  ;;  %7289 = vpow2.f32 %v6109_v57  ;;  %v10330_v43 = vadd.f32 %v10217_v13, %v5214_v36  ;;  %v6458_v40 = vpop.f32.mrb[94].mxu1 }
 0x81e   : > { %v7272_v47 = vpop.eup %7271  ;;  %v5477_v56 = vadd.f32 %v5476_v58, %v5446_v49  ;;  %v5357_v33 = vadd.f32 1.0, %v7270_v7  ;;  %v10334_v31 = vadd.f32 %v6458_v40, %v10217_v13  ;;  %v5217_v42 = vpop.f32.mrb[95].mxu1  ;;  %v6114_v22 = vmul.f32 -1.442695, %v10326_v3 }
 0x81f   : > { %v7274_v8 = vpop.eup %7273  ;;  %7291 = vrcp.f32 %v5359_v23  ;;  %v5360_v4 = vadd.f32 1.0, %v7272_v47  ;;  %v10338_v32 = vadd.f32 %v10217_v13, %v5217_v42  ;;  %v6112_v35 = vmul.f32 -1.442695, %v10330_v43 }
 0x820   : > { %v7276_v51 = vpop.eup %7275  ;;  %v5478_v59 = vadd.f32 %v5477_v56, %v5447_v6  ;;  %7293 = vrcp.f32 %v5357_v33  ;;  %v5358_v46 = vadd.f32 1.0, %v7274_v8  ;;  %v6115_v55 = vmul.f32 -1.442695, %v10334_v31 }
 0x821   : > { %v7278_v21 = vpop.eup %7277  ;;  %7295 = vrcp.f32 %v5360_v4  ;;  %v6113_v2 = vmul.f32 -1.442695, %v10338_v32  ;;  %v5451_v19 = vmul.f32 %v7276_v51, %v10268_v12 }
 0x822   : > { %v7280_v17 = vpop.eup %7279  ;;  %v5449_v53 = vmul.f32 %v7278_v21, %v10271_v39  ;;  %v5479_v48 = vadd.f32 %v5478_v59, %v5448_v37  ;;  %7297 = vrcp.f32 %v5358_v46 }
 0x823   : > { %v7282_v1 = vpop.eup %7281  ;;  %7299 = vpow2.f32 %v6114_v22  ;;  %v6461_v0 = vpop.f32.mrb[96].mxu1  ;;  %v5452_v39 = vmul.f32 %v7280_v17, %v10275_v29 }
 0x824   : > { %v7284_v28 = vpop.eup %7283  ;;  %v5480_v9 = vadd.f32 %v5479_v48, %v5449_v53  ;;  %v5450_v61 = vmul.f32 %v7282_v1, %v10279_v44  ;;  %7301 = vpow2.f32 %v6112_v35  ;;  %v10347_v62 = vadd.f32 %v6461_v0, %v10217_v13  ;;  %v5230_v20 = vpop.f32.mrb[97].mxu1 }
 0x825   : > { %v7286_v15 = vpop.eup %7285  ;;  %v5363_v45 = vadd.f32 1.0, %v7284_v28  ;;  %7303 = vpow2.f32 %v6115_v55  ;;  %v10351_v10 = vadd.f32 %v10217_v13, %v5230_v20  ;;  %v6462_v12 = vpop.f32.mrb[98].mxu1 }
 0x826   : > { %v7288_v38 = vpop.eup %7287  ;;  %v5481_v63 = vadd.f32 %v5480_v9, %v5450_v61  ;;  %v5361_v16 = vadd.f32 1.0, %v7286_v15  ;;  %7305 = vpow2.f32 %v6113_v2  ;;  %v6118_v44 = vmul.f32 -1.442695, %v10347_v62  ;;  %v5233_v34 = vpop.f32.mrb[99].mxu1 }
 0x827   : > { %v7290_v14 = vpop.eup %7289  ;;  %7307 = vrcp.f32 %v5363_v45  ;;  %v5364_v60 = vadd.f32 1.0, %v7288_v38  ;;  %v6116_v18 = vmul.f32 -1.442695, %v10351_v10  ;;  %v10356_v29 = vadd.f32 %v6462_v12, %v10217_v13 }
 0x828   : > { %v5482_v57 = vadd.f32 %v5481_v63, %v5451_v19  ;;  %7309 = vrcp.f32 %v5361_v16  ;;  %v5362_v30 = vadd.f32 1.0, %v7290_v14  ;;  %v10359_v25 = vadd.f32 %v10217_v13, %v5233_v34 }
 0x829   : > { %v7292_v50 = vpop.eup %7291  ;;  %7311 = vrcp.f32 %v5364_v60  ;;  %v6119_v58 = vmul.f32 -1.442695, %v10356_v29 }
 0x82a   : > { %v7294_v49 = vpop.eup %7293  ;;  %v5483_v36 = vadd.f32 %v5482_v57, %v5452_v39  ;;  %7313 = vrcp.f32 %v5362_v30  ;;  %v6117_v7 = vmul.f32 -1.442695, %v10359_v25  ;;  %v5455_v8 = vmul.f32 %v7292_v50, %v10287_v41 }
 0x82b   : > { %v7296_v6 = vpop.eup %7295  ;;  %v5453_v23 = vmul.f32 %v7294_v49, %v10291_v54  ;;  %7315 = vpow2.f32 %v6118_v44 }
 0x82c   : > { %v7298_v40 = vpop.eup %7297  ;;  %7317 = vpow2.f32 %v6116_v18  ;;  %v5456_v59 = vmul.f32 %v7296_v6, %v10295_v26 }
 0x82d   : > { %v7300_v47 = vpop.eup %7299  ;;  %v5484_v37 = vadd.f32 %v5483_v36, %v5453_v23  ;;  %v5454_v13 = vmul.f32 %v7298_v40, %v10300_v24  ;;  %7319 = vpow2.f32 %v6119_v58 }
 0x82e   : > { %v7302_v56 = vpop.eup %7301  ;;  %v5367_v33 = vadd.f32 1.0, %v7300_v47  ;;  %7321 = vpow2.f32 %v6117_v7 }
 0x82f   : > { %v7304_v42 = vpop.eup %7303  ;;  %v5485_v4 = vadd.f32 %v5484_v37, %v5454_v13  ;;  %v5365_v22 = vadd.f32 1.0, %v7302_v56 }
 0x830   : > { %v7306_v51 = vpop.eup %7305  ;;  %v5368_v35 = vadd.f32 1.0, %v7304_v42 }
 0x831   : > { %v7308_v54 = vpop.eup %7307  ;;  %v5486_v46 = vadd.f32 %v5485_v4, %v5455_v8  ;;  %7323 = vrcp.f32 %v5365_v22  ;;  %v5366_v21 = vadd.f32 1.0, %v7306_v51 }
 0x832   : > { %v7310_v55 = vpop.eup %7309  ;;  %7325 = vrcp.f32 %v5367_v33  ;;  %v5459_v28 = vmul.f32 %v7308_v54, %v10308_v27 }
 0x833   : > { %v7312_v24 = vpop.eup %7311  ;;  %v5457_v17 = vmul.f32 %v7310_v55, %v10311_v11  ;;  %v5487_v53 = vadd.f32 %v5486_v46, %v5456_v59  ;;  %7327 = vrcp.f32 %v5366_v21 }
 0x834   : > { %v7314_v48 = vpop.eup %7313  ;;  %7329 = vrcp.f32 %v5368_v35  ;;  %v5460_v15 = vmul.f32 %v7312_v24, %v10315_v52 }
 0x835   : > { %v7316_v2 = vpop.eup %7315  ;;  %v5488_v41 = vadd.f32 %v5487_v53, %v5457_v17  ;;  %v5458_v1 = vmul.f32 %v7314_v48, %v10320_v5 }
 0x836   : > { %v7318_v19 = vpop.eup %7317  ;;  %v5371_v26 = vadd.f32 1.0, %v7316_v2 }
 0x837   : > { %v7320_v0 = vpop.eup %7319  ;;  %v5489_v9 = vadd.f32 %v5488_v41, %v5458_v1  ;;  %v5369_v61 = vadd.f32 1.0, %v7318_v19 }
 0x838   : > { %v7322_v20 = vpop.eup %7321  ;;  %v5372_v11 = vadd.f32 1.0, %v7320_v0 }
 0x839   : > { %v5490_v39 = vadd.f32 %v5489_v9, %v5459_v28  ;;  %7331 = vrcp.f32 %v5369_v61  ;;  %v5370_v45 = vadd.f32 1.0, %v7322_v20 }
 0x83a   : > { %7333 = vrcp.f32 %v5371_v26 }
 0x83b   : > { %v7324_v12 = vpop.eup %7323  ;;  %v5491_v38 = vadd.f32 %v5490_v39, %v5460_v15  ;;  %7335 = vrcp.f32 %v5370_v45 }
 0x83c   : > { %v7326_v5 = vpop.eup %7325  ;;  %v5461_v63 = vmul.f32 %v7324_v12, %v10330_v43  ;;  %7337 = vrcp.f32 %v5372_v11 }
 0x83d   : > { %v7328_v16 = vpop.eup %7327  ;;  %v5463_v14 = vmul.f32 %v7326_v5, %v10326_v3 }
 0x83e   : > { %v5492_v44 = vadd.f32 %v5491_v38, %v5461_v63  ;;  %v5462_v27 = vmul.f32 %v7328_v16, %v10338_v32  ;;  %v7330_v34 = vpop.eup %7329 }
 0x83f   : > { %v5464_v60 = vmul.f32 %v7330_v34, %v10334_v31 }
 0x840   : > { %v5493_v52 = vadd.f32 %v5492_v44, %v5462_v27 }
 0x842   : > { %v5494_v18 = vadd.f32 %v5493_v52, %v5463_v14 }
 0x843   : > { %v7332_v57 = vpop.eup %7331 }
 0x844   : > { %v7334_v30 = vpop.eup %7333  ;;  %v5465_v50 = vmul.f32 %v7332_v57, %v10351_v10  ;;  %v5495_v58 = vadd.f32 %v5494_v18, %v5464_v60 }
 0x845   : > { %v7336_v43 = vpop.eup %7335  ;;  %v5467_v32 = vmul.f32 %v7334_v30, %v10347_v62 }
 0x846   : > { %v5496_v49 = vadd.f32 %v5495_v58, %v5465_v50  ;;  %v5466_v36 = vmul.f32 %v7336_v43, %v10359_v25  ;;  %v7338_v7 = vpop.eup %7337 }
 0x847   : > { %v5468_v3 = vmul.f32 %v7338_v7, %v10356_v29 }
 0x848   : > { %v5497_v6 = vadd.f32 %v5496_v49, %v5466_v36 }
 0x84a   : > { %v5498_v31 = vadd.f32 %v5497_v6, %v5467_v32 }
 0x84c   : > { %v5499_v23 = vadd.f32 %v5498_v31, %v5468_v3 }
 0x84e   : > { %v5500_v40 = vrot.slane %v5499_v23, 4 }
 0x850   : > { %v5501_v47 = vadd.f32 %v5500_v40, %v5499_v23 }
 0x852   : > { %v5502_v10 = vrot.slane %v5501_v47, 2 }
 0x854   : > { %v5503_v37 = vadd.f32 %v5502_v10, %v5501_v47 }
 0x856   : > { %v5504_v13 = vrot.slane %v5503_v37, 1 }
 0x858   : > { %v5505_v56 = vadd.f32 %v5504_v13, %v5503_v37 }
 0x85a   : > { %v5506_v25 = vmul.f32 0.00390625, %v5505_v56 }
 0x85c   : > { %5507 = vst [vmem:[%s617_s13] sm:$0x1] %v5506_v25 }
 0x85d   : > { %7722 = shalt.err (!%p7719_p7)
}
 0x85e   : > { %s7723_s5 = scalar_lea.hbm %s10384_s1, 16  ;;  %s7727_s22 = scalar_lea.hbm %s10599_s29, 32 }
 0x85f   : > { %p7724_p5 = scmp.ne.s32.totalorder %s10384_s1, %s7723_s5  ;;  %p7728_p1 = scmp.lt.u32.totalorder %s10384_s1, %s10599_s29 }
 0x860   : > { %p7729_p13 = scmp.lt.u32.totalorder %s7727_s22, %s7723_s5  ;;  %p7731_p2 = scmp.lt.u32.totalorder %s7723_s5, %s10384_s1 }
 0x861   : > { %p7725_p9 = pnand %p7724_p5, %p10600_p8 }
 0x862   : > { %p7730_p0 = por %p7729_p13, %p7728_p1 }
 0x863   : > { %p7726_p12 = pneg %p7725_p9 }
 0x864   : > { %p7732_p4 = por %p7731_p2, %p7730_p0 }
 0x866   : > { %p7733_p10 = pnand %p7732_p4, %p7726_p12 }
 0x868   : > { %7736 = shalt.err (!%p7733_p10)
}
 0x869   : > { %6651 = dma.vmem_to_hbm [thread:$0]  (%p10600_p8), %s10386_s15, 16, %s10384_s1, %s5509_s21  }
 0x86a PF: > { %s10601_s20 = sld [smem:[#allocation33_spill]]  ;;  %p10602_p11 = scmp.ne.s32.totalorder %s10507_s19, 0 }
 0x86b   : > { %p10603_p3 = scmp.ge.s32.totalorder %s7799_s28, 2 }
 0x86d   : > { %p6695_p6 = pnand %p10603_p3, %p10602_p11 }
 0x870   : > { %s5533_s25 = sand.u32 1, %s10601_s20  }
 0x871   : > { %s5534_s4 = scalar_lea.sflag [#allocation5], %s5533_s25 }
 0x872   : > { %7782 = dma.done.wait (!%p6695_p6), %s5534_s4, 16  }
 0x873   : > { %7784 = vsyncadd (!%p6695_p6), %s5534_s4, 4294967280  ;;  %p32_p7 = scmp.ge.s32.totalorder %s8187_s18, 4   ;;  %s10604_s25 = smov %s7791_s26 }
 0x874   : > { %s10605_s26 = smov %s7795_s27  ;;  %s10606_s27 = smov %s8198_s14 }
 0x875   : > { %s10607_s28 = smov %s8187_s18  ;;  %34 = sbr.rel (!%p32_p7) target bundleno = 19 (0x13), region = 171 }
 0x87c   :  { %5538 = vsyncpa [#allocation4], 1 }
 0x87d   :  { %5540 = vsyncpa [#allocation4 + $0x1], 1 }
 0x87e   :  { %5541 = vsyncpa [#allocation7], 1 }
 0x87f   :  { %5542 = vsyncpa [#allocation10], 1 }
 0x880   :  { %5543 = vsyncpa [#allocation13], 1 }
 0x881   :  { %5544 = vsyncpa [#allocation16], 1 }
 0x882   :  { %5545 = vsyncpa [#allocation19], 1 }
 0x883   :  { %5546 = vsyncpa [#allocation22], 1 }
 0x884   :  { %5547 = vsyncpa [#allocation5], 1 }
 0x885   :  { %5549 = vsyncpa [#allocation5 + $0x1], 1 }

</bundles_post_ra>
